<compile_context>
chip_gen: v6e
topology: v6e:2x2x1
jax: 0.10.0
libtpu: 0.0.40
codegen_flags: <defaults>
</compile_context>

<pallas_src>
import functools
import math

import jax
import jax.numpy as jnp
from jax import lax
from jax.experimental import pallas as pl
from jax.experimental.pallas import tpu as pltpu


def _round_up(x, m):
    return (x + m - 1) // m * m


def _upblock_fused_kernel(x_ref, w1_ref, b1_ref, w2_ref, b2_ref, o_ref,
                          xpad_ref, mpad_ref, cols1_ref, cols2_ref,
                          *, H, W, col_off, negative_slope):
    """One batch element: leaky(conv2(leaky(conv1(x)))), fully in VMEM.

    Layouts (channels on lanes throughout):
      x_ref    : (1, H*W, Cin)            unpadded input image
      xpad_ref : (Hp, Wc, Cin)   scratch  zero-ringed padded input
      mpad_ref : (Hp, Wc, Coutp) scratch  zero-ringed padded mid activation
      cols*    : (H*W, 9*C)      scratch  im2col buffers (one matmul per conv)
      o_ref    : (1, H*W, Coutp)          lane-dense output block
    with Hp = H+2 and Wc an aligned row pitch; the image interior sits at
    rows [1, H] and columns [col_off, col_off+W).
    """
    Hp, Wc, Cin = xpad_ref.shape
    Cp = mpad_ref.shape[2]
    M = H * W
    slope = jnp.float32(negative_slope)

    def leaky(a):
        return jnp.where(a >= 0, a, slope * a)

    def zero_pad_ring(ref):
        # Only the p=1 zero ring (plus the alignment slack columns) must be
        # zero; the interior is fully rewritten each grid step, so we never
        # zero-fill the whole buffer.
        C = ref.shape[2]
        ref[:, 0:col_off, :] = jnp.zeros((Hp, col_off, C), ref.dtype)
        ref[:, col_off + W:Wc, :] = jnp.zeros((Hp, Wc - col_off - W, C), ref.dtype)
        ref[0:1, col_off:col_off + W, :] = jnp.zeros((1, W, C), ref.dtype)
        ref[H + 1:H + 2, col_off:col_off + W, :] = jnp.zeros((1, W, C), ref.dtype)

    def build_cols(src_ref, cols_ref, C):
        # im2col: gather the 9 taps into the contraction dim so each conv is
        # ONE MXU matmul with K = 9*C (instead of 9 accumulating K=C matmuls).
        for dy in range(3):
            for dx in range(3):
                t = dy * 3 + dx
                c0 = col_off + dx - 1
                win = src_ref[dy:dy + H, c0:c0 + W, :]            # (H, W, C)
                cols_ref[:, t * C:(t + 1) * C] = win.reshape(M, C)

    # ---- stage 0: zero the pad rings, place the image in the padded buffer --
    zero_pad_ring(xpad_ref)
    zero_pad_ring(mpad_ref)
    xpad_ref[1:H + 1, col_off:col_off + W, :] = (
        x_ref[0].reshape(H, W, Cin).astype(xpad_ref.dtype))

    # ---- conv1 + bias + leaky -> interior of the padded mid buffer ----------
    build_cols(xpad_ref, cols1_ref, Cin)
    acc1 = jnp.dot(cols1_ref[...], w1_ref[...],
                   preferred_element_type=jnp.float32)            # (M, Coutp) f32
    acc1 = leaky(acc1 + b1_ref[...])
    mpad_ref[1:H + 1, col_off:col_off + W, :] = (
        acc1.reshape(H, W, Cp).astype(mpad_ref.dtype))

    # ---- conv2 + bias + leaky -> lane-dense output block --------------------
    build_cols(mpad_ref, cols2_ref, Cp)
    acc2 = jnp.dot(cols2_ref[...], w2_ref[...],
                   preferred_element_type=jnp.float32)            # (M, Coutp) f32
    acc2 = leaky(acc2 + b2_ref[...])
    o_ref[0, :, :] = acc2.astype(o_ref.dtype)


def upblock_pallas(x_nhwc, w1_hwio, b1, w2_hwio, b2, scale1, scale2,
                   *, negative_slope=0.2, compute_dtype=jnp.bfloat16):
    """Fused UpBlock forward on NHWC input. Returns NHWC."""
    N, H, W, Cin = x_nhwc.shape
    Cout = w1_hwio.shape[-1]
    Coutp = _round_up(Cout, 128)     # lane-dense mid/output channels
    col_off = 16                     # interior column start (f32 & bf16 aligned)
    Wc = col_off + W + 16            # padded row pitch (>= col_off+W+1, aligned)
    Hp = H + 2
    M = H * W

    # Fold the weight-standardization scale into the weights (conv(x*s) ==
    # conv_{w*s}(x)), pad channels for lane density, flatten the 9 taps into
    # the contraction dim and cast to the MXU feed dtype -- all once, in the
    # wrapper, instead of per pixel / per tap in the kernel.
    w1f = jnp.pad(w1_hwio * scale1, ((0, 0), (0, 0), (0, 0), (0, Coutp - Cout)))
    w1f = w1f.reshape(9 * Cin, Coutp).astype(compute_dtype)
    w2f = jnp.pad(w2_hwio * scale2,
                  ((0, 0), (0, 0), (0, Coutp - Cout), (0, Coutp - Cout)))
    w2f = w2f.reshape(9 * Coutp, Coutp).astype(compute_dtype)
    b1p = jnp.pad(b1.astype(jnp.float32), (0, Coutp - Cout)).reshape(1, Coutp)
    b2p = jnp.pad(b2.astype(jnp.float32), (0, Coutp - Cout)).reshape(1, Coutp)

    x_flat = x_nhwc.reshape(N, M, Cin)          # contiguous reshape (free)

    kernel = functools.partial(
        _upblock_fused_kernel, H=H, W=W, col_off=col_off,
        negative_slope=float(negative_slope))

    # Explicit scoped-VMEM budget: scratch + double-buffered I/O + weights,
    # with headroom (never below the 32 MiB default at these sizes).
    cb = jnp.dtype(compute_dtype).itemsize
    xb = jnp.dtype(x_nhwc.dtype).itemsize
    scratch_b = (Hp * Wc * Cin + Hp * Wc * Coutp + M * 9 * Cin + M * 9 * Coutp) * cb
    io_b = 2 * (M * Cin * xb + M * Coutp * xb)
    w_b = 2 * ((9 * Cin * Coutp + 9 * Coutp * Coutp) * cb + 2 * Coutp * 4)
    vmem_limit = int(max(32 * 1024 * 1024, 1.5 * (scratch_b + io_b + w_b)))

    out_flat = pl.pallas_call(
        kernel,
        out_shape=jax.ShapeDtypeStruct((N, M, Coutp), x_nhwc.dtype),
        grid=(N,),
        in_specs=[
            pl.BlockSpec((1, M, Cin), lambda n: (n, 0, 0)),
            pl.BlockSpec((9 * Cin, Coutp), lambda n: (0, 0)),
            pl.BlockSpec((1, Coutp), lambda n: (0, 0)),
            pl.BlockSpec((9 * Coutp, Coutp), lambda n: (0, 0)),
            pl.BlockSpec((1, Coutp), lambda n: (0, 0)),
        ],
        out_specs=pl.BlockSpec((1, M, Coutp), lambda n: (n, 0, 0)),
        scratch_shapes=[
            pltpu.VMEM((Hp, Wc, Cin), compute_dtype),    # padded input
            pltpu.VMEM((Hp, Wc, Coutp), compute_dtype),  # padded mid activation
            pltpu.VMEM((M, 9 * Cin), compute_dtype),     # im2col for conv1
            pltpu.VMEM((M, 9 * Coutp), compute_dtype),   # im2col for conv2
        ],
        compiler_params=pltpu.CompilerParams(
            dimension_semantics=("parallel",),
            vmem_limit_bytes=vmem_limit),
    )(x_flat, w1f, b1p, w2f, b2p)

    # Slice off the channel padding added for lane density.
    return out_flat[:, :, :Cout].reshape(N, H, W, Cout)


def init_upblock_params(key, in_channels, out_channels, gain=2, k=3):
    """Deterministic init matching WSConv2d.__init__ (normal weights, zero bias)."""
    k1, k2 = jax.random.split(key)
    # PyTorch conv weight layout is OIHW; convert to HWIO for the kernel.
    w1_oihw = jax.random.normal(k1, (out_channels, in_channels, k, k),
                                dtype=jnp.float32)
    w2_oihw = jax.random.normal(k2, (out_channels, out_channels, k, k),
                                dtype=jnp.float32)
    return {
        "w1": jnp.transpose(w1_oihw, (2, 3, 1, 0)),        # HWIO
        "b1": jnp.zeros((out_channels,), jnp.float32),
        "scale1": math.sqrt(gain / (in_channels * k * k)),
        "w2": jnp.transpose(w2_oihw, (2, 3, 1, 0)),        # HWIO
        "b2": jnp.zeros((out_channels,), jnp.float32),
        "scale2": math.sqrt(gain / (out_channels * k * k)),
    }


def upblock_forward(x_nchw, params, *, compute_dtype=jnp.bfloat16):
    """UpBlock forward: leaky(conv1(x)) -> leaky(conv2(.)). NCHW in, NCHW out.

    The NCHW<->NHWC transposes only exist to match the PyTorch interface; an
    NHWC end-to-end model would drop them.
    """
    x = jnp.transpose(x_nchw, (0, 2, 3, 1))                 # NCHW -> NHWC
    y = upblock_pallas(x, params["w1"], params["b1"],
                       params["w2"], params["b2"],
                       params["scale1"], params["scale2"],
                       compute_dtype=compute_dtype)
    return jnp.transpose(y, (0, 3, 1, 2))                   # NHWC -> NCHW


def _reference_upblock(x_nchw, params, negative_slope=0.2):
    """Plain-JAX reference (lax.conv) for numerical verification."""
    def ws_conv(x, w_hwio, b, scale):
        y = lax.conv_general_dilated(
            x * scale, w_hwio, window_strides=(1, 1), padding=((1, 1), (1, 1)),
            dimension_numbers=("NHWC", "HWIO", "NHWC"))
        y = y + b.reshape(1, 1, 1, -1)
        return jnp.where(y >= 0, y, negative_slope * y)

    x = jnp.transpose(x_nchw, (0, 2, 3, 1))
    x = ws_conv(x, params["w1"], params["b1"], params["scale1"])
    x = ws_conv(x, params["w2"], params["b2"], params["scale2"])
    return jnp.transpose(x, (0, 3, 1, 2))


if __name__ == "__main__":
    key = jax.random.PRNGKey(0)
    k_x, k_p = jax.random.split(key)

    N, Cin, H, W = 2, 4, 16, 16
    Cout = 8

    x = jax.random.normal(k_x, (N, Cin, H, W), dtype=jnp.float32)  # NCHW, like PyTorch
    params = init_upblock_params(k_p, Cin, Cout)
    ref = _reference_upblock(x, params)

    # Exact path: f32 MXU feed, tight tolerance.
    fwd_f32 = jax.jit(functools.partial(upblock_forward, compute_dtype=jnp.float32))
    out_f32 = jax.block_until_ready(fwd_f32(x, params))
    assert out_f32.shape == (N, Cout, H, W), out_f32.shape
    assert jnp.allclose(out_f32, ref, atol=1e-4, rtol=1e-4), (
        float(jnp.max(jnp.abs(out_f32 - ref))))

    # Default path: bf16 MXU feed (f32 accumulation & activation), looser tolerance.
    fwd_bf16 = jax.jit(upblock_forward)
    out_bf16 = jax.block_until_ready(fwd_bf16(x, params))
    assert out_bf16.shape == (N, Cout, H, W), out_bf16.shape
    assert jnp.allclose(out_bf16, ref, atol=3e-1, rtol=5e-2), (
        float(jnp.max(jnp.abs(out_bf16 - ref))))

    print("KERNEL_OK")
</pallas_src>

<mosaic_0001>
module attributes {stable_mosaic.version = 11 : i64} {
  func.func @_upblock_fused_kernel(%arg0: i32, %arg1: memref<1x256x4xf32, #tpu.memory_space<vmem>>, %arg2: memref<36x128xf32, #tpu.memory_space<vmem>>, %arg3: memref<1x128xf32, #tpu.memory_space<vmem>>, %arg4: memref<1152x128xf32, #tpu.memory_space<vmem>>, %arg5: memref<1x128xf32, #tpu.memory_space<vmem>>, %arg6: memref<1x256x128xf32, #tpu.memory_space<vmem>>, %arg7: memref<18x48x4xf32, #tpu.memory_space<vmem>>, %arg8: memref<18x48x128xf32, #tpu.memory_space<vmem>>, %arg9: memref<256x36xf32, #tpu.memory_space<vmem>>, %arg10: memref<256x1152xf32, #tpu.memory_space<vmem>>) attributes {dimension_semantics = [#tpu.dimension_semantics<parallel>], iteration_bounds = array<i64: 2>, scalar_prefetch = 0 : i64, scratch_operands = 4 : i64, tpu.core_type = #tpu.core_type<tc>, window_params = [{transform_indices = @transform_0, window_bounds = array<i64: 1, 256, 4>}, {pipeline_mode = #tpu.pipeline_mode<synchronous>, transform_indices = @transform_1, window_bounds = array<i64: 36, 128>}, {pipeline_mode = #tpu.pipeline_mode<synchronous>, transform_indices = @transform_2, window_bounds = array<i64: 1, 128>}, {pipeline_mode = #tpu.pipeline_mode<synchronous>, transform_indices = @transform_3, window_bounds = array<i64: 1152, 128>}, {pipeline_mode = #tpu.pipeline_mode<synchronous>, transform_indices = @transform_4, window_bounds = array<i64: 1, 128>}, {transform_indices = @transform_5, window_bounds = array<i64: 1, 256, 128>}]} {
    %cst = arith.constant 0.000000e+00 : f32
    %0 = vector.broadcast %cst : f32 to vector<18x16x4xf32>
    %c0 = arith.constant 0 : index
    %c0_0 = arith.constant 0 : index
    %c0_1 = arith.constant 0 : index
    %1 = vector.load %arg7[%c0, %c0_0, %c0_1] : memref<18x48x4xf32, #tpu.memory_space<vmem>>, vector<18x16x4xf32>
    tpu.vector_store %arg7[%c0, %c0_0, %c0_1], %0 {strides = array<i32>} : memref<18x48x4xf32, #tpu.memory_space<vmem>>, vector<18x16x4xf32>,
    %cst_2 = arith.constant 0.000000e+00 : f32
    %2 = vector.broadcast %cst_2 : f32 to vector<18x16x4xf32>
    %c0_3 = arith.constant 0 : index
    %c32 = arith.constant 32 : index
    %c0_4 = arith.constant 0 : index
    %3 = vector.load %arg7[%c0_3, %c32, %c0_4] : memref<18x48x4xf32, #tpu.memory_space<vmem>>, vector<18x16x4xf32>
    tpu.vector_store %arg7[%c0_3, %c32, %c0_4], %2 {strides = array<i32>} : memref<18x48x4xf32, #tpu.memory_space<vmem>>, vector<18x16x4xf32>,
    %cst_5 = arith.constant 0.000000e+00 : f32
    %4 = vector.broadcast %cst_5 : f32 to vector<1x16x4xf32>
    %c0_6 = arith.constant 0 : index
    %c16 = arith.constant 16 : index
    %c0_7 = arith.constant 0 : index
    %5 = vector.load %arg7[%c0_6, %c16, %c0_7] : memref<18x48x4xf32, #tpu.memory_space<vmem>>, vector<1x16x4xf32>
    tpu.vector_store %arg7[%c0_6, %c16, %c0_7], %4 {strides = array<i32>} : memref<18x48x4xf32, #tpu.memory_space<vmem>>, vector<1x16x4xf32>,
    %cst_8 = arith.constant 0.000000e+00 : f32
    %6 = vector.broadcast %cst_8 : f32 to vector<1x16x4xf32>
    %c17 = arith.constant 17 : index
    %c16_9 = arith.constant 16 : index
    %c0_10 = arith.constant 0 : index
    %7 = vector.load %arg7[%c17, %c16_9, %c0_10] : memref<18x48x4xf32, #tpu.memory_space<vmem>>, vector<1x16x4xf32>
    tpu.vector_store %arg7[%c17, %c16_9, %c0_10], %6 {strides = array<i32>} : memref<18x48x4xf32, #tpu.memory_space<vmem>>, vector<1x16x4xf32>,
    %cst_11 = arith.constant 0.000000e+00 : f32
    %8 = vector.broadcast %cst_11 : f32 to vector<18x16x128xf32>
    %c0_12 = arith.constant 0 : index
    %c0_13 = arith.constant 0 : index
    %c0_14 = arith.constant 0 : index
    %9 = vector.load %arg8[%c0_12, %c0_13, %c0_14] : memref<18x48x128xf32, #tpu.memory_space<vmem>>, vector<18x16x128xf32>
    tpu.vector_store %arg8[%c0_12, %c0_13, %c0_14], %8 {strides = array<i32>} : memref<18x48x128xf32, #tpu.memory_space<vmem>>, vector<18x16x128xf32>,
    %cst_15 = arith.constant 0.000000e+00 : f32
    %10 = vector.broadcast %cst_15 : f32 to vector<18x16x128xf32>
    %c0_16 = arith.constant 0 : index
    %c32_17 = arith.constant 32 : index
    %c0_18 = arith.constant 0 : index
    %11 = vector.load %arg8[%c0_16, %c32_17, %c0_18] : memref<18x48x128xf32, #tpu.memory_space<vmem>>, vector<18x16x128xf32>
    tpu.vector_store %arg8[%c0_16, %c32_17, %c0_18], %10 {strides = array<i32>} : memref<18x48x128xf32, #tpu.memory_space<vmem>>, vector<18x16x128xf32>,
    %cst_19 = arith.constant 0.000000e+00 : f32
    %12 = vector.broadcast %cst_19 : f32 to vector<1x16x128xf32>
    %c0_20 = arith.constant 0 : index
    %c16_21 = arith.constant 16 : index
    %c0_22 = arith.constant 0 : index
    %13 = vector.load %arg8[%c0_20, %c16_21, %c0_22] : memref<18x48x128xf32, #tpu.memory_space<vmem>>, vector<1x16x128xf32>
    tpu.vector_store %arg8[%c0_20, %c16_21, %c0_22], %12 {strides = array<i32>} : memref<18x48x128xf32, #tpu.memory_space<vmem>>, vector<1x16x128xf32>,
    %cst_23 = arith.constant 0.000000e+00 : f32
    %14 = vector.broadcast %cst_23 : f32 to vector<1x16x128xf32>
    %c17_24 = arith.constant 17 : index
    %c16_25 = arith.constant 16 : index
    %c0_26 = arith.constant 0 : index
    %15 = vector.load %arg8[%c17_24, %c16_25, %c0_26] : memref<18x48x128xf32, #tpu.memory_space<vmem>>, vector<1x16x128xf32>
    tpu.vector_store %arg8[%c17_24, %c16_25, %c0_26], %14 {strides = array<i32>} : memref<18x48x128xf32, #tpu.memory_space<vmem>>, vector<1x16x128xf32>,
    %c0_27 = arith.constant 0 : index
    %c0_28 = arith.constant 0 : index
    %c0_29 = arith.constant 0 : index
    %16 = vector.load %arg1[%c0_27, %c0_28, %c0_29] : memref<1x256x4xf32, #tpu.memory_space<vmem>>, vector<1x256x4xf32>
    %17 = vector.shape_cast %16 : vector<1x256x4xf32> to vector<256x4xf32>
    %18 = vector.shape_cast %17 : vector<256x4xf32> to vector<16x16x4xf32>
    %c1 = arith.constant 1 : index
    %c16_30 = arith.constant 16 : index
    %c0_31 = arith.constant 0 : index
    %19 = vector.load %arg7[%c1, %c16_30, %c0_31] : memref<18x48x4xf32, #tpu.memory_space<vmem>>, vector<16x16x4xf32>
    tpu.vector_store %arg7[%c1, %c16_30, %c0_31], %18 {strides = array<i32>} : memref<18x48x4xf32, #tpu.memory_space<vmem>>, vector<16x16x4xf32>,
    %c0_32 = arith.constant 0 : index
    %c15 = arith.constant 15 : index
    %c0_33 = arith.constant 0 : index
    %20 = vector.load %arg7[%c0_32, %c15, %c0_33] : memref<18x48x4xf32, #tpu.memory_space<vmem>>, vector<16x16x4xf32>
    %21 = vector.shape_cast %20 : vector<16x16x4xf32> to vector<256x4xf32>
    %c0_34 = arith.constant 0 : index
    %c0_35 = arith.constant 0 : index
    %22 = vector.load %arg9[%c0_34, %c0_35] : memref<256x36xf32, #tpu.memory_space<vmem>>, vector<256x4xf32>
    tpu.vector_store %arg9[%c0_34, %c0_35], %21 {strides = array<i32>} : memref<256x36xf32, #tpu.memory_space<vmem>>, vector<256x4xf32>,
    %c0_36 = arith.constant 0 : index
    %c16_37 = arith.constant 16 : index
    %c0_38 = arith.constant 0 : index
    %23 = vector.load %arg7[%c0_36, %c16_37, %c0_38] : memref<18x48x4xf32, #tpu.memory_space<vmem>>, vector<16x16x4xf32>
    %24 = vector.shape_cast %23 : vector<16x16x4xf32> to vector<256x4xf32>
    %c0_39 = arith.constant 0 : index
    %c4 = arith.constant 4 : index
    %25 = vector.load %arg9[%c0_39, %c4] : memref<256x36xf32, #tpu.memory_space<vmem>>, vector<256x4xf32>
    tpu.vector_store %arg9[%c0_39, %c4], %24 {strides = array<i32>} : memref<256x36xf32, #tpu.memory_space<vmem>>, vector<256x4xf32>,
    %c0_40 = arith.constant 0 : index
    %c17_41 = arith.constant 17 : index
    %c0_42 = arith.constant 0 : index
    %26 = vector.load %arg7[%c0_40, %c17_41, %c0_42] : memref<18x48x4xf32, #tpu.memory_space<vmem>>, vector<16x16x4xf32>
    %27 = vector.shape_cast %26 : vector<16x16x4xf32> to vector<256x4xf32>
    %c0_43 = arith.constant 0 : index
    %c8 = arith.constant 8 : index
    %28 = vector.load %arg9[%c0_43, %c8] : memref<256x36xf32, #tpu.memory_space<vmem>>, vector<256x4xf32>
    tpu.vector_store %arg9[%c0_43, %c8], %27 {strides = array<i32>} : memref<256x36xf32, #tpu.memory_space<vmem>>, vector<256x4xf32>,
    %c1_44 = arith.constant 1 : index
    %c15_45 = arith.constant 15 : index
    %c0_46 = arith.constant 0 : index
    %29 = vector.load %arg7[%c1_44, %c15_45, %c0_46] : memref<18x48x4xf32, #tpu.memory_space<vmem>>, vector<16x16x4xf32>
    %30 = vector.shape_cast %29 : vector<16x16x4xf32> to vector<256x4xf32>
    %c0_47 = arith.constant 0 : index
    %c12 = arith.constant 12 : index
    %31 = vector.load %arg9[%c0_47, %c12] : memref<256x36xf32, #tpu.memory_space<vmem>>, vector<256x4xf32>
    tpu.vector_store %arg9[%c0_47, %c12], %30 {strides = array<i32>} : memref<256x36xf32, #tpu.memory_space<vmem>>, vector<256x4xf32>,
    %c1_48 = arith.constant 1 : index
    %c16_49 = arith.constant 16 : index
    %c0_50 = arith.constant 0 : index
    %32 = vector.load %arg7[%c1_48, %c16_49, %c0_50] : memref<18x48x4xf32, #tpu.memory_space<vmem>>, vector<16x16x4xf32>
    %33 = vector.shape_cast %32 : vector<16x16x4xf32> to vector<256x4xf32>
    %c0_51 = arith.constant 0 : index
    %c16_52 = arith.constant 16 : index
    %34 = vector.load %arg9[%c0_51, %c16_52] : memref<256x36xf32, #tpu.memory_space<vmem>>, vector<256x4xf32>
    tpu.vector_store %arg9[%c0_51, %c16_52], %33 {strides = array<i32>} : memref<256x36xf32, #tpu.memory_space<vmem>>, vector<256x4xf32>,
    %c1_53 = arith.constant 1 : index
    %c17_54 = arith.constant 17 : index
    %c0_55 = arith.constant 0 : index
    %35 = vector.load %arg7[%c1_53, %c17_54, %c0_55] : memref<18x48x4xf32, #tpu.memory_space<vmem>>, vector<16x16x4xf32>
    %36 = vector.shape_cast %35 : vector<16x16x4xf32> to vector<256x4xf32>
    %c0_56 = arith.constant 0 : index
    %c20 = arith.constant 20 : index
    %37 = vector.load %arg9[%c0_56, %c20] : memref<256x36xf32, #tpu.memory_space<vmem>>, vector<256x4xf32>
    tpu.vector_store %arg9[%c0_56, %c20], %36 {strides = array<i32>} : memref<256x36xf32, #tpu.memory_space<vmem>>, vector<256x4xf32>,
    %c2 = arith.constant 2 : index
    %c15_57 = arith.constant 15 : index
    %c0_58 = arith.constant 0 : index
    %38 = vector.load %arg7[%c2, %c15_57, %c0_58] : memref<18x48x4xf32, #tpu.memory_space<vmem>>, vector<16x16x4xf32>
    %39 = vector.shape_cast %38 : vector<16x16x4xf32> to vector<256x4xf32>
    %c0_59 = arith.constant 0 : index
    %c24 = arith.constant 24 : index
    %40 = vector.load %arg9[%c0_59, %c24] : memref<256x36xf32, #tpu.memory_space<vmem>>, vector<256x4xf32>
    tpu.vector_store %arg9[%c0_59, %c24], %39 {strides = array<i32>} : memref<256x36xf32, #tpu.memory_space<vmem>>, vector<256x4xf32>,
    %c2_60 = arith.constant 2 : index
    %c16_61 = arith.constant 16 : index
    %c0_62 = arith.constant 0 : index
    %41 = vector.load %arg7[%c2_60, %c16_61, %c0_62] : memref<18x48x4xf32, #tpu.memory_space<vmem>>, vector<16x16x4xf32>
    %42 = vector.shape_cast %41 : vector<16x16x4xf32> to vector<256x4xf32>
    %c0_63 = arith.constant 0 : index
    %c28 = arith.constant 28 : index
    %43 = vector.load %arg9[%c0_63, %c28] : memref<256x36xf32, #tpu.memory_space<vmem>>, vector<256x4xf32>
    tpu.vector_store %arg9[%c0_63, %c28], %42 {strides = array<i32>} : memref<256x36xf32, #tpu.memory_space<vmem>>, vector<256x4xf32>,
    %c2_64 = arith.constant 2 : index
    %c17_65 = arith.constant 17 : index
    %c0_66 = arith.constant 0 : index
    %44 = vector.load %arg7[%c2_64, %c17_65, %c0_66] : memref<18x48x4xf32, #tpu.memory_space<vmem>>, vector<16x16x4xf32>
    %45 = vector.shape_cast %44 : vector<16x16x4xf32> to vector<256x4xf32>
    %c0_67 = arith.constant 0 : index
    %c32_68 = arith.constant 32 : index
    %46 = vector.load %arg9[%c0_67, %c32_68] : memref<256x36xf32, #tpu.memory_space<vmem>>, vector<256x4xf32>
    tpu.vector_store %arg9[%c0_67, %c32_68], %45 {strides = array<i32>} : memref<256x36xf32, #tpu.memory_space<vmem>>, vector<256x4xf32>,
    %c0_69 = arith.constant 0 : index
    %c0_70 = arith.constant 0 : index
    %47 = vector.load %arg9[%c0_69, %c0_70] : memref<256x36xf32, #tpu.memory_space<vmem>>, vector<256x36xf32>
    %c0_71 = arith.constant 0 : index
    %c0_72 = arith.constant 0 : index
    %48 = vector.load %arg2[%c0_71, %c0_72] : memref<36x128xf32, #tpu.memory_space<vmem>>, vector<36x128xf32>
    %cst_73 = arith.constant dense<0.000000e+00> : vector<256x128xf32>
    %49 = tpu.matmul %47, %48, %cst_73 {dimension_numbers = #tpu.dot_dimension_numbers<[1], [0], [0], [1], [0, 0, 1, 1], [], []>} : vector<256x36xf32>, vector<36x128xf32>, vector<256x128xf32> -> vector<256x128xf32>
    %c0_74 = arith.constant 0 : index
    %c0_75 = arith.constant 0 : index
    %50 = vector.load %arg3[%c0_74, %c0_75] : memref<1x128xf32, #tpu.memory_space<vmem>>, vector<1x128xf32>
    %51 = vector.broadcast %50 : vector<1x128xf32> to vector<256x128xf32>
    %52 = arith.addf %49, %51 : vector<256x128xf32>
    %cst_76 = arith.constant 0.000000e+00 : f32
    %53 = vector.broadcast %cst_76 : f32 to vector<256x128xf32>
    %54 = arith.cmpf oge, %52, %53 : vector<256x128xf32>
    %cst_77 = arith.constant 2.000000e-01 : f32
    %55 = vector.broadcast %cst_77 : f32 to vector<256x128xf32>
    %56 = arith.mulf %55, %52 : vector<256x128xf32>
    %57 = arith.select %54, %52, %56 : vector<256x128xi1>, vector<256x128xf32>
    %58 = vector.shape_cast %57 : vector<256x128xf32> to vector<16x16x128xf32>
    %c1_78 = arith.constant 1 : index
    %c16_79 = arith.constant 16 : index
    %c0_80 = arith.constant 0 : index
    %59 = vector.load %arg8[%c1_78, %c16_79, %c0_80] : memref<18x48x128xf32, #tpu.memory_space<vmem>>, vector<16x16x128xf32>
    tpu.vector_store %arg8[%c1_78, %c16_79, %c0_80], %58 {strides = array<i32>} : memref<18x48x128xf32, #tpu.memory_space<vmem>>, vector<16x16x128xf32>,
    %c0_81 = arith.constant 0 : index
    %c15_82 = arith.constant 15 : index
    %c0_83 = arith.constant 0 : index
    %60 = vector.load %arg8[%c0_81, %c15_82, %c0_83] : memref<18x48x128xf32, #tpu.memory_space<vmem>>, vector<16x16x128xf32>
    %61 = vector.shape_cast %60 : vector<16x16x128xf32> to vector<256x128xf32>
    %c0_84 = arith.constant 0 : index
    %c0_85 = arith.constant 0 : index
    %62 = vector.load %arg10[%c0_84, %c0_85] : memref<256x1152xf32, #tpu.memory_space<vmem>>, vector<256x128xf32>
    tpu.vector_store %arg10[%c0_84, %c0_85], %61 {strides = array<i32>} : memref<256x1152xf32, #tpu.memory_space<vmem>>, vector<256x128xf32>,
    %c0_86 = arith.constant 0 : index
    %c16_87 = arith.constant 16 : index
    %c0_88 = arith.constant 0 : index
    %63 = vector.load %arg8[%c0_86, %c16_87, %c0_88] : memref<18x48x128xf32, #tpu.memory_space<vmem>>, vector<16x16x128xf32>
    %64 = vector.shape_cast %63 : vector<16x16x128xf32> to vector<256x128xf32>
    %c0_89 = arith.constant 0 : index
    %c128 = arith.constant 128 : index
    %65 = vector.load %arg10[%c0_89, %c128] : memref<256x1152xf32, #tpu.memory_space<vmem>>, vector<256x128xf32>
    tpu.vector_store %arg10[%c0_89, %c128], %64 {strides = array<i32>} : memref<256x1152xf32, #tpu.memory_space<vmem>>, vector<256x128xf32>,
    %c0_90 = arith.constant 0 : index
    %c17_91 = arith.constant 17 : index
    %c0_92 = arith.constant 0 : index
    %66 = vector.load %arg8[%c0_90, %c17_91, %c0_92] : memref<18x48x128xf32, #tpu.memory_space<vmem>>, vector<16x16x128xf32>
    %67 = vector.shape_cast %66 : vector<16x16x128xf32> to vector<256x128xf32>
    %c0_93 = arith.constant 0 : index
    %c256 = arith.constant 256 : index
    %68 = vector.load %arg10[%c0_93, %c256] : memref<256x1152xf32, #tpu.memory_space<vmem>>, vector<256x128xf32>
    tpu.vector_store %arg10[%c0_93, %c256], %67 {strides = array<i32>} : memref<256x1152xf32, #tpu.memory_space<vmem>>, vector<256x128xf32>,
    %c1_94 = arith.constant 1 : index
    %c15_95 = arith.constant 15 : index
    %c0_96 = arith.constant 0 : index
    %69 = vector.load %arg8[%c1_94, %c15_95, %c0_96] : memref<18x48x128xf32, #tpu.memory_space<vmem>>, vector<16x16x128xf32>
    %70 = vector.shape_cast %69 : vector<16x16x128xf32> to vector<256x128xf32>
    %c0_97 = arith.constant 0 : index
    %c384 = arith.constant 384 : index
    %71 = vector.load %arg10[%c0_97, %c384] : memref<256x1152xf32, #tpu.memory_space<vmem>>, vector<256x128xf32>
    tpu.vector_store %arg10[%c0_97, %c384], %70 {strides = array<i32>} : memref<256x1152xf32, #tpu.memory_space<vmem>>, vector<256x128xf32>,
    %c1_98 = arith.constant 1 : index
    %c16_99 = arith.constant 16 : index
    %c0_100 = arith.constant 0 : index
    %72 = vector.load %arg8[%c1_98, %c16_99, %c0_100] : memref<18x48x128xf32, #tpu.memory_space<vmem>>, vector<16x16x128xf32>
    %73 = vector.shape_cast %72 : vector<16x16x128xf32> to vector<256x128xf32>
    %c0_101 = arith.constant 0 : index
    %c512 = arith.constant 512 : index
    %74 = vector.load %arg10[%c0_101, %c512] : memref<256x1152xf32, #tpu.memory_space<vmem>>, vector<256x128xf32>
    tpu.vector_store %arg10[%c0_101, %c512], %73 {strides = array<i32>} : memref<256x1152xf32, #tpu.memory_space<vmem>>, vector<256x128xf32>,
    %c1_102 = arith.constant 1 : index
    %c17_103 = arith.constant 17 : index
    %c0_104 = arith.constant 0 : index
    %75 = vector.load %arg8[%c1_102, %c17_103, %c0_104] : memref<18x48x128xf32, #tpu.memory_space<vmem>>, vector<16x16x128xf32>
    %76 = vector.shape_cast %75 : vector<16x16x128xf32> to vector<256x128xf32>
    %c0_105 = arith.constant 0 : index
    %c640 = arith.constant 640 : index
    %77 = vector.load %arg10[%c0_105, %c640] : memref<256x1152xf32, #tpu.memory_space<vmem>>, vector<256x128xf32>
    tpu.vector_store %arg10[%c0_105, %c640], %76 {strides = array<i32>} : memref<256x1152xf32, #tpu.memory_space<vmem>>, vector<256x128xf32>,
    %c2_106 = arith.constant 2 : index
    %c15_107 = arith.constant 15 : index
    %c0_108 = arith.constant 0 : index
    %78 = vector.load %arg8[%c2_106, %c15_107, %c0_108] : memref<18x48x128xf32, #tpu.memory_space<vmem>>, vector<16x16x128xf32>
    %79 = vector.shape_cast %78 : vector<16x16x128xf32> to vector<256x128xf32>
    %c0_109 = arith.constant 0 : index
    %c768 = arith.constant 768 : index
    %80 = vector.load %arg10[%c0_109, %c768] : memref<256x1152xf32, #tpu.memory_space<vmem>>, vector<256x128xf32>
    tpu.vector_store %arg10[%c0_109, %c768], %79 {strides = array<i32>} : memref<256x1152xf32, #tpu.memory_space<vmem>>, vector<256x128xf32>,
    %c2_110 = arith.constant 2 : index
    %c16_111 = arith.constant 16 : index
    %c0_112 = arith.constant 0 : index
    %81 = vector.load %arg8[%c2_110, %c16_111, %c0_112] : memref<18x48x128xf32, #tpu.memory_space<vmem>>, vector<16x16x128xf32>
    %82 = vector.shape_cast %81 : vector<16x16x128xf32> to vector<256x128xf32>
    %c0_113 = arith.constant 0 : index
    %c896 = arith.constant 896 : index
    %83 = vector.load %arg10[%c0_113, %c896] : memref<256x1152xf32, #tpu.memory_space<vmem>>, vector<256x128xf32>
    tpu.vector_store %arg10[%c0_113, %c896], %82 {strides = array<i32>} : memref<256x1152xf32, #tpu.memory_space<vmem>>, vector<256x128xf32>,
    %c2_114 = arith.constant 2 : index
    %c17_115 = arith.constant 17 : index
    %c0_116 = arith.constant 0 : index
    %84 = vector.load %arg8[%c2_114, %c17_115, %c0_116] : memref<18x48x128xf32, #tpu.memory_space<vmem>>, vector<16x16x128xf32>
    %85 = vector.shape_cast %84 : vector<16x16x128xf32> to vector<256x128xf32>
    %c0_117 = arith.constant 0 : index
    %c1024 = arith.constant 1024 : index
    %86 = vector.load %arg10[%c0_117, %c1024] : memref<256x1152xf32, #tpu.memory_space<vmem>>, vector<256x128xf32>
    tpu.vector_store %arg10[%c0_117, %c1024], %85 {strides = array<i32>} : memref<256x1152xf32, #tpu.memory_space<vmem>>, vector<256x128xf32>,
    %c0_118 = arith.constant 0 : index
    %c0_119 = arith.constant 0 : index
    %87 = vector.load %arg10[%c0_118, %c0_119] : memref<256x1152xf32, #tpu.memory_space<vmem>>, vector<256x1152xf32>
    %c0_120 = arith.constant 0 : index
    %c0_121 = arith.constant 0 : index
    %88 = vector.load %arg4[%c0_120, %c0_121] : memref<1152x128xf32, #tpu.memory_space<vmem>>, vector<1152x128xf32>
    %cst_122 = arith.constant dense<0.000000e+00> : vector<256x128xf32>
    %89 = tpu.matmul %87, %88, %cst_122 {dimension_numbers = #tpu.dot_dimension_numbers<[1], [0], [0], [1], [0, 0, 1, 1], [], []>} : vector<256x1152xf32>, vector<1152x128xf32>, vector<256x128xf32> -> vector<256x128xf32>
    %c0_123 = arith.constant 0 : index
    %c0_124 = arith.constant 0 : index
    %90 = vector.load %arg5[%c0_123, %c0_124] : memref<1x128xf32, #tpu.memory_space<vmem>>, vector<1x128xf32>
    %91 = vector.broadcast %90 : vector<1x128xf32> to vector<256x128xf32>
    %92 = arith.addf %89, %91 : vector<256x128xf32>
    %cst_125 = arith.constant 0.000000e+00 : f32
    %93 = vector.broadcast %cst_125 : f32 to vector<256x128xf32>
    %94 = arith.cmpf oge, %92, %93 : vector<256x128xf32>
    %cst_126 = arith.constant 2.000000e-01 : f32
    %95 = vector.broadcast %cst_126 : f32 to vector<256x128xf32>
    %96 = arith.mulf %95, %92 : vector<256x128xf32>
    %97 = arith.select %94, %92, %96 : vector<256x128xi1>, vector<256x128xf32>
    %c0_127 = arith.constant 0 : index
    %c0_128 = arith.constant 0 : index
    %c0_129 = arith.constant 0 : index
    %98 = vector.load %arg6[%c0_127, %c0_128, %c0_129] : memref<1x256x128xf32, #tpu.memory_space<vmem>>, vector<1x256x128xf32>
    %99 = vector.shape_cast %98 : vector<1x256x128xf32> to vector<256x128xf32>
    %100 = vector.shape_cast %97 : vector<256x128xf32> to vector<1x256x128xf32>
    tpu.vector_store %arg6[%c0_127, %c0_128, %c0_129], %100 {strides = array<i32>} : memref<1x256x128xf32, #tpu.memory_space<vmem>>, vector<1x256x128xf32>,
    return
  }
  func.func @transform_0(%arg0: i32) -> (i32, i32, i32) {
    %c0_i32 = arith.constant 0 : i32
    %c0_i32_0 = arith.constant 0 : i32
    %c0_i32_1 = arith.constant 0 : i32
    return %arg0, %c0_i32, %c0_i32_0 : i32, i32, i32
  }
  func.func @transform_1(%arg0: i32) -> (i32, i32) {
    %c0_i32 = arith.constant 0 : i32
    %c0_i32_0 = arith.constant 0 : i32
    %c0_i32_1 = arith.constant 0 : i32
    return %c0_i32, %c0_i32_0 : i32, i32
  }
  func.func @transform_2(%arg0: i32) -> (i32, i32) {
    %c0_i32 = arith.constant 0 : i32
    %c0_i32_0 = arith.constant 0 : i32
    %c0_i32_1 = arith.constant 0 : i32
    return %c0_i32, %c0_i32_0 : i32, i32
  }
  func.func @transform_3(%arg0: i32) -> (i32, i32) {
    %c0_i32 = arith.constant 0 : i32
    %c0_i32_0 = arith.constant 0 : i32
    %c0_i32_1 = arith.constant 0 : i32
    return %c0_i32, %c0_i32_0 : i32, i32
  }
  func.func @transform_4(%arg0: i32) -> (i32, i32) {
    %c0_i32 = arith.constant 0 : i32
    %c0_i32_0 = arith.constant 0 : i32
    %c0_i32_1 = arith.constant 0 : i32
    return %c0_i32, %c0_i32_0 : i32, i32
  }
  func.func @transform_5(%arg0: i32) -> (i32, i32, i32) {
    %c0_i32 = arith.constant 0 : i32
    %c0_i32_0 = arith.constant 0 : i32
    %c0_i32_1 = arith.constant 0 : i32
    return %arg0, %c0_i32, %c0_i32_0 : i32, i32, i32
  }
}

</mosaic_0001>

<bundles_post_ra>
// kernel: upblock_forward.1
= control target key start
LH: loop header
LB: loop body
LE: loop exit
PB: predicated region body
PF: predicated region fallthrough
CT: control target
= control target key end

     0   :  { %s5250_s18 = smov 0   ;;  %s7795_s0 = inlined_call_operand.vmem [shape: f32[2,256,4], index: 0, kind: input, shape index: {}]   ;;  %s7796_s1 = inlined_call_operand.vmem [shape: f32[36,128], index: 1, kind: input, shape index: {}]   ;;  %s7797_s2 = inlined_call_operand.vmem [shape: f32[1,128], index: 2, kind: input, shape index: {}]   ;;  %s7798_s3 = inlined_call_operand.vmem [shape: f32[1152,128], index: 3, kind: input, shape index: {}]   ;;  %s7799_s4 = inlined_call_operand.vmem [shape: f32[1,128], index: 4, kind: input, shape index: {}]   ;;  %s7800_s5 = inlined_call_operand.vmem [shape: f32[2,256,128], index: 5, kind: output, shape index: {}]  }
   0x1 LB: > { %s4877_s19 = sadd.s32 4294967295, %s5209_s18   ;;  %p4881_p0 = scmp.ge.s32.totalorder %s5209_s18, 1  ;;  %s5209_s18 = sphi %s5250_s18, %s15_s18  }
   0x2   : > { %p187_p1 = scmp.lt.s32.totalorder %s5209_s18, 3 }
   0x4   : > { %p188_p2 = pnand %p4881_p0, %p187_p1 }
   0x6   : > { %191 = sbr.rel (%p188_p2) target bundleno = 1250 (0x4e2), region = 40 }
   0xb   : > { %vm225_vm0 = vcmask 31744   ;;  %v5211_v0 = vmov 0.0   ;;  %p215_p3 = scmp.lt.s32.totalorder %s4877_s19, 1  ;;  %s5212_s24 = smov 4   ;;  %v2090_v31 = vld [vmem:[%s7796_s1 + $0x20] sm:$0xf] }
   0xc   : > { %298 = vst.msk [vmem:[#allocation2 + $0x10] sm:$0xff] %vm225_vm0, %v5211_v0  ;;  %227 = vst.msk [vmem:[#allocation2 + $0x8] sm:$0xff] %vm225_vm0, %v5211_v0  ;;  %3569 = vmatprep.subr.mxu1 %v5211_v0  ;;  %3633 = vmatprep.mubr.f32.mxu1 %v5211_v0  ;;  %s5213_s25 = smov 8   ;;  %s5214_s26 = smov 12   ;;  %vm2195_vm1 = vcmask 1043456   ;;  %v2089_v34 = vld [vmem:[%s7796_s1 + $0x18] sm:$0xff] }
   0xd   : > { %229 = vst.msk [vmem:[#allocation2 + $0x38] sm:$0xff] %vm225_vm0, %v5211_v0  ;;  %231 = vst.msk [vmem:[#allocation2 + $0x68] sm:$0xff] %vm225_vm0, %v5211_v0  ;;  %s7843_s19 = smov (!%p215_p3, %s4877_s19), 1  ;;  %s5215_s27 = smov 16   ;;  %5010 = vmatprep.subr.msk.mxu0 %vm2195_vm1, %v2090_v31  ;;  %v2088_v35 = vld [vmem:[%s7796_s1 + $0x10] sm:$0xff]  ;;  %v2087_v38 = vld [vmem:[%s7796_s1 + $0x8] sm:$0xff] }
   0xe   : > { %233 = vst.msk [vmem:[#allocation2 + $0x98] sm:$0xff] %vm225_vm0, %v5211_v0  ;;  %235 = vst.msk [vmem:[#allocation2 + $0xc8] sm:$0xff] %vm225_vm0, %v5211_v0  ;;  %s4923_s20 = sshll.u32 %s7843_s19, 8  ;;  %s5216_s28 = smov 20   ;;  %5011 = vmatpush3.msk.msra.mxu0 %vm2195_vm1, %v2090_v31  ;;  %v2086_v40 = vld [vmem:[%s7796_s1] sm:$0xff]  ;;  %vm669_vm2 = vcmask 64544  }
   0xf   : > { %237 = vst.msk [vmem:[#allocation2 + $0xf8] sm:$0xff] %vm225_vm0, %v5211_v0  ;;  %239 = vst.msk [vmem:[#allocation2 + $0x128] sm:$0xff] %vm225_vm0, %v5211_v0  ;;  %s5393_s23 = scalar_lea.vmem %s7795_s0, %s4923_s20  ;;  %5012 = vmatprep.subr.mxu0 %v2089_v34  ;;  %s5217_s8 = smov 24   ;;  %vm862_vm3 = vcmask 97344   ;;  %vm1055_vm4 = vcmask 130144   ;;  %vm1248_vm5 = vcmask 162944  }
  0x10   : > { %241 = vst.msk [vmem:[#allocation2 + $0x158] sm:$0xff] %vm225_vm0, %v5211_v0  ;;  %243 = vst.msk [vmem:[#allocation2 + $0x188] sm:$0xff] %vm225_vm0, %v5211_v0  ;;  %v380_v1 = vld [vmem:[%s5393_s23] sm:$0xff]  ;;  %v381_v2 = vld [vmem:[%s5393_s23 + $0x8] sm:$0xff]  ;;  %5013 = vmatpush3.msra.mxu0 %v2089_v34  ;;  %s5218_s13 = smov 28   ;;  %s5219_s16 = smov 32  }
  0x11   : > { %245 = vst.msk [vmem:[#allocation2 + $0x1b8] sm:$0xff] %vm225_vm0, %v5211_v0  ;;  %247 = vst.msk [vmem:[#allocation2 + $0x1e8] sm:$0xff] %vm225_vm0, %v5211_v0  ;;  %v382_v3 = vld [vmem:[%s5393_s23 + $0x10] sm:$0xff]  ;;  %v383_v8 = vld [vmem:[%s5393_s23 + $0x18] sm:$0xff]  ;;  %5014 = vmatprep.subr.mxu0 %v2088_v35  ;;  %vm1441_vm6 = vcmask 195744   ;;  %vm1635_vm7 = vcmask 228544  }
  0x12   : > { %249 = vst.msk [vmem:[#allocation2 + $0x218] sm:$0xff] %vm225_vm0, %v5211_v0  ;;  %251 = vst.msk [vmem:[#allocation2 + $0x248] sm:$0xff] %vm225_vm0, %v5211_v0  ;;  %v384_v9 = vld [vmem:[%s5393_s23 + $0x20] sm:$0xff]  ;;  %v385_v10 = vld [vmem:[%s5393_s23 + $0x28] sm:$0xff]  ;;  %5015 = vmatpush3.msra.mxu0 %v2088_v35  ;;  %vm1828_vm8 = vcmask 261344   ;;  %vm2021_vm9 = vcmask 294144  }
  0x13   : > { %253 = vst.msk [vmem:[#allocation2 + $0x278] sm:$0xff] %vm225_vm0, %v5211_v0  ;;  %255 = vst.msk [vmem:[#allocation2 + $0x2a8] sm:$0xff] %vm225_vm0, %v5211_v0  ;;  %v509_v4 = vld [vmem:[#allocation2 + $0x10] sm:$0xff]  ;;  %v387_v12 = vld [vmem:[%s5393_s23 + $0x38] sm:$0xff]  ;;  %5016 = vmatprep.subr.mxu0 %v2087_v38  ;;  %vm2098_vm10 = vcmask 293888  }
  0x14   : > { %257 = vst.msk [vmem:[#allocation2 + $0x2d8] sm:$0xff] %vm225_vm0, %v5211_v0  ;;  %259 = vst.msk [vmem:[#allocation2 + $0x308] sm:$0xff] %vm225_vm0, %v5211_v0  ;;  %573 = vrot.lane.b32.xlu0 %v509_v4, %s5212_s24  ;;  %v386_v11 = vld [vmem:[%s5393_s23 + $0x30] sm:$0xff]  ;;  %v388_v14 = vld [vmem:[%s5393_s23 + $0x40] sm:$0xff]  ;;  %5017 = vmatpush3.msra.mxu0 %v2087_v38 }
  0x15   : > { %261 = vst.msk [vmem:[#allocation2 + $0x338] sm:$0xff] %vm225_vm0, %v5211_v0  ;;  %262 = vst.msk [vmem:[#allocation2 + $0x20] sm:$0xff] %vm225_vm0, %v5211_v0  ;;  %v445_v13 = vld [vmem:[#allocation2 + $0xf] sm:$0xff]  ;;  %v391_v33 = vld [vmem:[%s5393_s23 + $0x58] sm:$0xff]  ;;  %5018 = vmatprep.subr.mxu0 %v2086_v40 }
  0x16   : > { %264 = vst.msk [vmem:[#allocation2 + $0x50] sm:$0xff] %vm225_vm0, %v5211_v0  ;;  %266 = vst.msk [vmem:[#allocation2 + $0x80] sm:$0xff] %vm225_vm0, %v5211_v0  ;;  %v389_v15 = vld [vmem:[%s5393_s23 + $0x48] sm:$0xff]  ;;  %v390_v32 = vld [vmem:[%s5393_s23 + $0x50] sm:$0xff]  ;;  %5019 = vmatpush3.msra.mxu0 %v2086_v40 }
  0x17   : > { %268 = vst.msk [vmem:[#allocation2 + $0xb0] sm:$0xff] %vm225_vm0, %v5211_v0  ;;  %270 = vst.msk [vmem:[#allocation2 + $0xe0] sm:$0xff] %vm225_vm0, %v5211_v0  ;;  %3794 = vmatprep.subr.mxu0 %v5211_v0  ;;  %v392_v44 = vld [vmem:[%s5393_s23 + $0x60] sm:$0xff]  ;;  %v393_v45 = vld [vmem:[%s5393_s23 + $0x68] sm:$0xff] }
  0x18   : > { %272 = vst.msk [vmem:[#allocation2 + $0x110] sm:$0xff] %vm225_vm0, %v5211_v0  ;;  %274 = vst.msk [vmem:[#allocation2 + $0x140] sm:$0xff] %vm225_vm0, %v5211_v0  ;;  %v394_v52 = vld [vmem:[%s5393_s23 + $0x70] sm:$0xff]  ;;  %v395_v53 = vld [vmem:[%s5393_s23 + $0x78] sm:$0xff] }
  0x19   : > { %276 = vst.msk [vmem:[#allocation2 + $0x170] sm:$0xff] %vm225_vm0, %v5211_v0  ;;  %278 = vst.msk [vmem:[#allocation2 + $0x1a0] sm:$0xff] %vm225_vm0, %v5211_v0  ;;  %v396_v60 = vld [vmem:[%s5393_s23 + $0x80] sm:$0xff]  ;;  %v397_v61 = vld [vmem:[%s5393_s23 + $0x88] sm:$0xff] }
  0x1a   : > { %280 = vst.msk [vmem:[#allocation2 + $0x1d0] sm:$0xff] %vm225_vm0, %v5211_v0  ;;  %282 = vst.msk [vmem:[#allocation2 + $0x200] sm:$0xff] %vm225_vm0, %v5211_v0 }
  0x1b   : > { %284 = vst.msk [vmem:[#allocation2 + $0x230] sm:$0xff] %vm225_vm0, %v5211_v0  ;;  %286 = vst.msk [vmem:[#allocation2 + $0x260] sm:$0xff] %vm225_vm0, %v5211_v0 }
  0x1c   : > { %288 = vst.msk [vmem:[#allocation2 + $0x290] sm:$0xff] %vm225_vm0, %v5211_v0  ;;  %290 = vst.msk [vmem:[#allocation2 + $0x2c0] sm:$0xff] %vm225_vm0, %v5211_v0 }
  0x1d   : > { %292 = vst.msk [vmem:[#allocation2 + $0x2f0] sm:$0xff] %vm225_vm0, %v5211_v0  ;;  %294 = vst.msk [vmem:[#allocation2 + $0x320] sm:$0xff] %vm225_vm0, %v5211_v0 }
  0x1e   : > { %296 = vst.msk [vmem:[#allocation2 + $0x350] sm:$0xff] %vm225_vm0, %v5211_v0  ;;  %299 = vst.msk [vmem:[#allocation2 + $0x18] sm:$0xff] %vm225_vm0, %v5211_v0 }
  0x1f   : > { %301 = vst.msk [vmem:[#allocation2 + $0x340] sm:$0xff] %vm225_vm0, %v5211_v0  ;;  %302 = vst.msk [vmem:[#allocation2 + $0x348] sm:$0xff] %vm225_vm0, %v5211_v0 }
  0x20   : > { %303 = vst [vmem:[#allocation3] sm:$0xff] %v5211_v0  ;;  %304 = vst [vmem:[#allocation3 + $0x8] sm:$0xff] %v5211_v0 }
  0x21   : > { %306 = vst [vmem:[#allocation3 + $0x38] sm:$0xff] %v5211_v0  ;;  %308 = vst [vmem:[#allocation3 + $0x68] sm:$0xff] %v5211_v0 }
  0x22   : > { %310 = vst [vmem:[#allocation3 + $0x98] sm:$0xff] %v5211_v0  ;;  %312 = vst [vmem:[#allocation3 + $0xc8] sm:$0xff] %v5211_v0 }
  0x23   : > { %314 = vst [vmem:[#allocation3 + $0xf8] sm:$0xff] %v5211_v0  ;;  %316 = vst [vmem:[#allocation3 + $0x128] sm:$0xff] %v5211_v0 }
  0x24   : > { %318 = vst [vmem:[#allocation3 + $0x158] sm:$0xff] %v5211_v0  ;;  %320 = vst [vmem:[#allocation3 + $0x188] sm:$0xff] %v5211_v0 }
  0x25   : > { %322 = vst [vmem:[#allocation3 + $0x1b8] sm:$0xff] %v5211_v0  ;;  %324 = vst [vmem:[#allocation3 + $0x1e8] sm:$0xff] %v5211_v0  ;;  %v702_v5 = vld [vmem:[#allocation2 + $0x11] sm:$0xff]  ;;  %v703_v7 = vld [vmem:[#allocation2 + $0x19] sm:$0xff] }
  0x26   : > { %326 = vst [vmem:[#allocation3 + $0x218] sm:$0xff] %v5211_v0  ;;  %328 = vst [vmem:[#allocation3 + $0x248] sm:$0xff] %v5211_v0  ;;  %v510_v6 = vld [vmem:[#allocation2 + $0x18] sm:$0xff]  ;;  %766 = vrot.lane.b32.xlu1 %v702_v5, %s5213_s25 }
  0x27   : > { %330 = vst [vmem:[#allocation3 + $0x278] sm:$0xff] %v5211_v0  ;;  %332 = vst [vmem:[#allocation3 + $0x2a8] sm:$0xff] %v5211_v0  ;;  %v446_v16 = vld [vmem:[#allocation2 + $0x17] sm:$0xff]  ;;  %575 = vrot.lane.b32.xlu0 %v510_v6, %s5212_s24 }
  0x28   : > { %334 = vst [vmem:[#allocation3 + $0x2d8] sm:$0xff] %v5211_v0  ;;  %336 = vst [vmem:[#allocation3 + $0x308] sm:$0xff] %v5211_v0 }
  0x29   : > { %338 = vst [vmem:[#allocation3 + $0x338] sm:$0xff] %v5211_v0  ;;  %339 = vst [vmem:[#allocation3 + $0x20] sm:$0xff] %v5211_v0 }
  0x2a   : > { %341 = vst [vmem:[#allocation3 + $0x50] sm:$0xff] %v5211_v0  ;;  %343 = vst [vmem:[#allocation3 + $0x80] sm:$0xff] %v5211_v0  ;;  %768 = vrot.lane.b32.xlu1 %v703_v7, %s5213_s25 }
  0x2b   : > { %345 = vst [vmem:[#allocation3 + $0xb0] sm:$0xff] %v5211_v0  ;;  %347 = vst [vmem:[#allocation3 + $0xe0] sm:$0xff] %v5211_v0 }
  0x2c   : > { %349 = vst [vmem:[#allocation3 + $0x110] sm:$0xff] %v5211_v0  ;;  %351 = vst [vmem:[#allocation3 + $0x140] sm:$0xff] %v5211_v0 }
  0x2d   : > { %353 = vst [vmem:[#allocation3 + $0x170] sm:$0xff] %v5211_v0  ;;  %355 = vst [vmem:[#allocation3 + $0x1a0] sm:$0xff] %v5211_v0 }
  0x2e   : > { %357 = vst [vmem:[#allocation3 + $0x1d0] sm:$0xff] %v5211_v0  ;;  %359 = vst [vmem:[#allocation3 + $0x200] sm:$0xff] %v5211_v0 }
  0x2f   : > { %361 = vst [vmem:[#allocation3 + $0x230] sm:$0xff] %v5211_v0  ;;  %363 = vst [vmem:[#allocation3 + $0x260] sm:$0xff] %v5211_v0 }
  0x30   : > { %365 = vst [vmem:[#allocation3 + $0x290] sm:$0xff] %v5211_v0  ;;  %367 = vst [vmem:[#allocation3 + $0x2c0] sm:$0xff] %v5211_v0 }
  0x31   : > { %369 = vst [vmem:[#allocation3 + $0x2f0] sm:$0xff] %v5211_v0  ;;  %371 = vst [vmem:[#allocation3 + $0x320] sm:$0xff] %v5211_v0 }
  0x32   : > { %373 = vst [vmem:[#allocation3 + $0x350] sm:$0xff] %v5211_v0  ;;  %375 = vst [vmem:[#allocation3 + $0x10] sm:$0xff] %v5211_v0 }
  0x33   : > { %376 = vst [vmem:[#allocation3 + $0x18] sm:$0xff] %v5211_v0  ;;  %378 = vst [vmem:[#allocation3 + $0x340] sm:$0xff] %v5211_v0 }
  0x34   : > { %379 = vst [vmem:[#allocation3 + $0x348] sm:$0xff] %v5211_v0  ;;  %413 = vst.msk [vmem:[#allocation2 + $0x40] sm:$0xff] %vm225_vm0, %v380_v1 }
  0x35   : > { %414 = vst.msk [vmem:[#allocation2 + $0x48] sm:$0xff] %vm225_vm0, %v381_v2  ;;  %415 = vst.msk [vmem:[#allocation2 + $0x70] sm:$0xff] %vm225_vm0, %v382_v3 }
  0x36   : > { %416 = vst.msk [vmem:[#allocation2 + $0x78] sm:$0xff] %vm225_vm0, %v383_v8  ;;  %417 = vst.msk [vmem:[#allocation2 + $0xa0] sm:$0xff] %vm225_vm0, %v384_v9 }
  0x37   : > { %418 = vst.msk [vmem:[#allocation2 + $0xa8] sm:$0xff] %vm225_vm0, %v385_v10  ;;  %419 = vst.msk [vmem:[#allocation2 + $0xd0] sm:$0xff] %vm225_vm0, %v386_v11 }
  0x38   : > { %420 = vst.msk [vmem:[#allocation2 + $0xd8] sm:$0xff] %vm225_vm0, %v387_v12  ;;  %477 = vst.msk [vmem:[#allocation4] sm:$0xff] %vm225_vm0, %v445_v13 }
  0x39   : > { %421 = vst.msk [vmem:[#allocation2 + $0x100] sm:$0xff] %vm225_vm0, %v388_v14  ;;  %422 = vst.msk [vmem:[#allocation2 + $0x108] sm:$0xff] %vm225_vm0, %v389_v15 }
  0x3a   : > { %478 = vst.msk [vmem:[#allocation4 + $0x8] sm:$0xff] %vm225_vm0, %v446_v16  ;;  %423 = vst.msk [vmem:[#allocation2 + $0x130] sm:$0xff] %vm225_vm0, %v390_v32 }
  0x3b   : > { %v895_v17 = vld [vmem:[#allocation2 + $0x3f] sm:$0xff]  ;;  %424 = vst.msk [vmem:[#allocation2 + $0x138] sm:$0xff] %vm225_vm0, %v391_v33  ;;  %425 = vst.msk [vmem:[#allocation2 + $0x160] sm:$0xff] %vm225_vm0, %v392_v44 }
  0x3c   : > { %v896_v18 = vld [vmem:[#allocation2 + $0x47] sm:$0xff]  ;;  %479 = vst.msk [vmem:[#allocation4 + $0x10] sm:$0xff] %vm225_vm0, %v895_v17  ;;  %959 = vrot.lane.b32.xlu0 %v895_v17, %s5214_s26  ;;  %v5425_v19 = vld [vmem:[#allocation2 + $0x6f] sm:$0xff]  ;;  %426 = vst.msk [vmem:[#allocation2 + $0x168] sm:$0xff] %vm225_vm0, %v393_v45 }
  0x3d   : > { %480 = vst.msk [vmem:[#allocation4 + $0x18] sm:$0xff] %vm225_vm0, %v896_v18  ;;  %961 = vrot.lane.b32.xlu1 %v896_v18, %s5214_s26  ;;  %v5427_v20 = vld [vmem:[#allocation2 + $0x77] sm:$0xff]  ;;  %v1088_v21 = vld [vmem:[#allocation2 + $0x40] sm:$0xff]  ;;  %v1089_v22 = vld [vmem:[#allocation2 + $0x48] sm:$0xff] }
  0x3e   : > { %481 = vst.msk [vmem:[#allocation4 + $0x20] sm:$0xff] %vm225_vm0, %v5425_v19  ;;  %482 = vst.msk [vmem:[#allocation4 + $0x28] sm:$0xff] %vm225_vm0, %v5427_v20  ;;  %v5433_v23 = vld [vmem:[#allocation2 + $0x9f] sm:$0xff]  ;;  %v5435_v24 = vld [vmem:[#allocation2 + $0xa7] sm:$0xff] }
  0x3f   : > { %483 = vst.msk [vmem:[#allocation4 + $0x30] sm:$0xff] %vm225_vm0, %v5433_v23  ;;  %484 = vst.msk [vmem:[#allocation4 + $0x38] sm:$0xff] %vm225_vm0, %v5435_v24  ;;  %v5443_v25 = vld [vmem:[#allocation2 + $0xcf] sm:$0xff]  ;;  %v5445_v26 = vld [vmem:[#allocation2 + $0xd7] sm:$0xff] }
  0x40   : > { %1152 = vrot.lane.b32.xlu0 %v1088_v21, %s5215_s27  ;;  %v1281_v27 = vld [vmem:[#allocation2 + $0x41] sm:$0xff]  ;;  %v1282_v28 = vld [vmem:[#allocation2 + $0x49] sm:$0xff]  ;;  %485 = vst.msk [vmem:[#allocation4 + $0x40] sm:$0xff] %vm225_vm0, %v5443_v25  ;;  %486 = vst.msk [vmem:[#allocation4 + $0x48] sm:$0xff] %vm225_vm0, %v5445_v26 }
  0x41   : > { %1154 = vrot.lane.b32.xlu1 %v1089_v22, %s5215_s27  ;;  %v5451_v29 = vld [vmem:[#allocation2 + $0xff] sm:$0xff]  ;;  %v5453_v30 = vld [vmem:[#allocation2 + $0x107] sm:$0xff]  ;;  %v1668_v36 = vld [vmem:[#allocation2 + $0x70] sm:$0xff]  ;;  %427 = vst.msk [vmem:[#allocation2 + $0x190] sm:$0xff] %vm225_vm0, %v394_v52 }
  0x42   : > { %487 = vst.msk [vmem:[#allocation4 + $0x50] sm:$0xff] %vm225_vm0, %v5451_v29  ;;  %488 = vst.msk [vmem:[#allocation4 + $0x58] sm:$0xff] %vm225_vm0, %v5453_v30  ;;  %v1669_v37 = vld [vmem:[#allocation2 + $0x78] sm:$0xff]  ;;  %v5483_v39 = vld [vmem:[#allocation2 + $0x12f] sm:$0xff] }
  0x43   : > { %v1861_v41 = vld [vmem:[#allocation2 + $0x71] sm:$0xff]  ;;  %489 = vst.msk [vmem:[#allocation4 + $0x60] sm:$0xff] %vm225_vm0, %v5483_v39  ;;  %v1862_v43 = vld [vmem:[#allocation2 + $0x79] sm:$0xff]  ;;  %v5519_v47 = vld [vmem:[#allocation2 + $0x167] sm:$0xff] }
  0x44   : > { %1345 = vrot.lane.b32.xlu0 %v1281_v27, %s5216_s28  ;;  %v5488_v42 = vld [vmem:[#allocation2 + $0x137] sm:$0xff]  ;;  %v5513_v46 = vld [vmem:[#allocation2 + $0x15f] sm:$0xff]  ;;  %v1671_v49 = vld [vmem:[#allocation2 + $0xa8] sm:$0xff]  ;;  %492 = vst.msk [vmem:[#allocation4 + $0x78] sm:$0xff] %vm225_vm0, %v5519_v47 }
  0x45   : > { %1347 = vrot.lane.b32.xlu1 %v1282_v28, %s5216_s28  ;;  %490 = vst.msk [vmem:[#allocation4 + $0x68] sm:$0xff] %vm225_vm0, %v5488_v42  ;;  %491 = vst.msk [vmem:[#allocation4 + $0x70] sm:$0xff] %vm225_vm0, %v5513_v46  ;;  %v1670_v48 = vld [vmem:[#allocation2 + $0xa0] sm:$0xff]  ;;  %v1864_v51 = vld [vmem:[#allocation2 + $0xa9] sm:$0xff] }
  0x46   : > { %v1863_v50 = vld [vmem:[#allocation2 + $0xa1] sm:$0xff]  ;;  %428 = vst.msk [vmem:[#allocation2 + $0x198] sm:$0xff] %vm225_vm0, %v395_v53  ;;  %v1672_v56 = vld [vmem:[#allocation2 + $0xd0] sm:$0xff]  ;;  %v1673_v57 = vld [vmem:[#allocation2 + $0xd8] sm:$0xff] }
  0x47   : > { %v1865_v58 = vld [vmem:[#allocation2 + $0xd1] sm:$0xff]  ;;  %v1866_v59 = vld [vmem:[#allocation2 + $0xd9] sm:$0xff]  ;;  %429 = vst.msk [vmem:[#allocation2 + $0x1c0] sm:$0xff] %vm225_vm0, %v396_v60  ;;  %430 = vst.msk [vmem:[#allocation2 + $0x1c8] sm:$0xff] %vm225_vm0, %v397_v61 }
  0x48   : > { %1539 = vrot.lane.b32.xlu0 %v5425_v19, %s5217_s8  ;;  %v5545_v54 = vld [vmem:[#allocation2 + $0x18f] sm:$0xff]  ;;  %v5587_v2 = vld [vmem:[#allocation2 + $0x100] sm:$0xff]  ;;  %v3425_v60 = vld [vmem:[%s7798_s3 + $0x38] sm:$0xff] }
  0x49   : > { %1541 = vrot.lane.b32.xlu1 %v5427_v20, %s5217_s8  ;;  %493 = vst.msk [vmem:[#allocation4 + $0x80] sm:$0xff] %vm225_vm0, %v5545_v54  ;;  %v5589_v3 = vld [vmem:[#allocation2 + $0x108] sm:$0xff]  ;;  %v398_v18 = vld [vmem:[%s5393_s23 + $0x90] sm:$0xff]  ;;  %v5663_v33 = vld [vmem:[#allocation2 + $0x139] sm:$0xff] }
  0x4a   : > { %v5597_v6 = vld [vmem:[#allocation2 + $0x101] sm:$0xff]  ;;  %v5604_v9 = vld [vmem:[#allocation2 + $0x109] sm:$0xff]  ;;  %431 = vst.msk [vmem:[#allocation2 + $0x1f0] sm:$0xff] %vm225_vm0, %v398_v18 }
  0x4b   : > { %v400_v52 = vld [vmem:[%s5393_s23 + $0xa0] sm:$0xff]  ;;  %v3424_v61 = vld [vmem:[%s7798_s3 + $0x30] sm:$0xff]  ;;  %v3419_v18 = vld [vmem:[%s7798_s3 + $0x8] sm:$0xff] }
  0x4c   : > { %1732 = vrot.lane.b32.xlu0 %v1668_v36, %s5218_s13  ;;  %433 = vst.msk [vmem:[#allocation2 + $0x220] sm:$0xff] %vm225_vm0, %v400_v52 }
  0x4d   : > { %1734 = vrot.lane.b32.xlu1 %v1669_v37, %s5218_s13  ;;  %v5551_v55 = vld [vmem:[#allocation2 + $0x197] sm:$0xff] }
  0x4e   : > { %494 = vst.msk [vmem:[#allocation4 + $0x88] sm:$0xff] %vm225_vm0, %v5551_v55  ;;  %v5578_v1 = vld [vmem:[#allocation2 + $0x1bf] sm:$0xff] }
  0x4f   : > { %495 = vst.msk [vmem:[#allocation4 + $0x90] sm:$0xff] %vm225_vm0, %v5578_v1  ;;  %v5895_v52 = vld [vmem:[#allocation2 + $0x199] sm:$0xff] }
  0x50   : > { %1925 = vrot.lane.b32.xlu0 %v1861_v41, %s5219_s16 }
  0x51   : > { %577 = vrot.lane.b32.xlu1 %v1088_v21, %s5212_s24 }
  0x54   : > { %1927 = vrot.lane.b32.xlu0 %v1862_v43, %s5219_s16 }
  0x55   : > { %579 = vrot.lane.b32.xlu1 %v1089_v22, %s5212_s24 }
  0x58   : > { %770 = vrot.lane.b32.xlu0 %v1281_v27, %s5213_s25 }
  0x59   : > { %772 = vrot.lane.b32.xlu1 %v1282_v28, %s5213_s25 }
  0x5c   : > { %963 = vrot.lane.b32.xlu0 %v5425_v19, %s5214_s26  ;;  %v399_v19 = vld [vmem:[%s5393_s23 + $0x98] sm:$0xff] }
  0x5d   : > { %965 = vrot.lane.b32.xlu1 %v5427_v20, %s5214_s26  ;;  %432 = vst.msk [vmem:[#allocation2 + $0x1f8] sm:$0xff] %vm225_vm0, %v399_v19  ;;  %v3418_v19 = vld [vmem:[%s7798_s3] sm:$0xff] }
  0x60   : > { %1156 = vrot.lane.b32.xlu0 %v1668_v36, %s5215_s27 }
  0x61   : > { %1158 = vrot.lane.b32.xlu1 %v1669_v37, %s5215_s27 }
  0x64   : > { %1349 = vrot.lane.b32.xlu0 %v1861_v41, %s5216_s28 }
  0x65   : > { %1351 = vrot.lane.b32.xlu1 %v1862_v43, %s5216_s28 }
  0x68   : > { %1543 = vrot.lane.b32.xlu0 %v5433_v23, %s5217_s8 }
  0x69   : > { %1545 = vrot.lane.b32.xlu1 %v5435_v24, %s5217_s8 }
  0x6c   : > { %1736 = vrot.lane.b32.xlu0 %v1670_v48, %s5218_s13 }
  0x6d   : > { %1738 = vrot.lane.b32.xlu1 %v1671_v49, %s5218_s13 }
  0x70   : > { %1929 = vrot.lane.b32.xlu0 %v1863_v50, %s5219_s16 }
  0x71   : > { %581 = vrot.lane.b32.xlu1 %v1668_v36, %s5212_s24  ;;  %v3433_v36 = vld [vmem:[%s7798_s3 + $0x78] sm:$0xff] }
  0x72   : > { %3570 = vmatpush1.msra.mxu1 %v3433_v36  ;;  %v5859_v36 = vld [vmem:[#allocation2 + $0x190] sm:$0xff] }
  0x73   : > { %3571 = vmatprep.subr.mxu1 %v5211_v0 }
  0x74   : > { %1931 = vrot.lane.b32.xlu0 %v1864_v51, %s5219_s16 }
  0x75   : > { %583 = vrot.lane.b32.xlu1 %v1669_v37, %s5212_s24  ;;  %v3432_v37 = vld [vmem:[%s7798_s3 + $0x70] sm:$0xff] }
  0x76   : > { %3572 = vmatpush1.msra.mxu1 %v3432_v37 }
  0x77   : > { %3573 = vmatprep.subr.mxu1 %v5211_v0 }
  0x78   : > { %774 = vrot.lane.b32.xlu0 %v1861_v41, %s5213_s25  ;;  %v3431_v41 = vld [vmem:[%s7798_s3 + $0x68] sm:$0xff] }
  0x79   : > { %776 = vrot.lane.b32.xlu1 %v1862_v43, %s5213_s25  ;;  %v3430_v43 = vld [vmem:[%s7798_s3 + $0x60] sm:$0xff]  ;;  %3574 = vmatpush1.msra.mxu1 %v3431_v41 }
  0x7a   : > { %3575 = vmatprep.subr.mxu1 %v5211_v0  ;;  %v5865_v41 = vld [vmem:[#allocation3] sm:$0xff] }
  0x7b   : > { %3576 = vmatpush1.msra.mxu1 %v3430_v43  ;;  %v3443_v43 = vld [vmem:[%s7798_s3 + $0xc8] sm:$0xff] }
  0x7c   : > { %967 = vrot.lane.b32.xlu0 %v5433_v23, %s5214_s26  ;;  %3577 = vmatprep.subr.mxu1 %v5211_v0 }
  0x7d   : > { %969 = vrot.lane.b32.xlu1 %v5435_v24, %s5214_s26  ;;  %v5643_v24 = vld [vmem:[#allocation2 + $0x130] sm:$0xff] }
  0x80   : > { %1160 = vrot.lane.b32.xlu0 %v1670_v48, %s5215_s27 }
  0x81   : > { %1162 = vrot.lane.b32.xlu1 %v1671_v49, %s5215_s27 }
  0x84   : > { %1353 = vrot.lane.b32.xlu0 %v1863_v50, %s5216_s28 }
  0x85   : > { %1355 = vrot.lane.b32.xlu1 %v1864_v51, %s5216_s28 }
  0x86   : > { %v574_v62 = vpop.permute.xlu0 %573 }
  0x87   : > { %670 = vst.msk [vmem:[#allocation4] sm:$0xff] %vm669_vm2, %v574_v62  ;;  %v5743_v62 = vld [vmem:[#allocation2 + $0x160] sm:$0xff] }
  0x88   : > { %1547 = vrot.lane.b32.xlu0 %v5443_v25, %s5217_s8 }
  0x89   : > { %1549 = vrot.lane.b32.xlu1 %v5445_v26, %s5217_s8 }
  0x8c   : > { %1740 = vrot.lane.b32.xlu0 %v1672_v56, %s5218_s13 }
  0x8d   : > { %1742 = vrot.lane.b32.xlu1 %v1673_v57, %s5218_s13 }
  0x90   : > { %1933 = vrot.lane.b32.xlu0 %v1865_v58, %s5219_s16 }
  0x91   : > { %585 = vrot.lane.b32.xlu1 %v1670_v48, %s5212_s24  ;;  %v3429_v48 = vld [vmem:[%s7798_s3 + $0x58] sm:$0xff] }
  0x92   : > { %3578 = vmatpush1.msra.mxu1 %v3429_v48 }
  0x93   : > { %3579 = vmatprep.subr.mxu1 %v5211_v0 }
  0x94   : > { %1935 = vrot.lane.b32.xlu0 %v1866_v59, %s5219_s16 }
  0x95   : > { %587 = vrot.lane.b32.xlu1 %v1671_v49, %s5212_s24 }
  0x98   : > { %778 = vrot.lane.b32.xlu0 %v1863_v50, %s5213_s25  ;;  %v767_v63 = vpop.permute.xlu1 %766 }
  0x99   : > { %780 = vrot.lane.b32.xlu1 %v1864_v51, %s5213_s25  ;;  %863 = vst.msk [vmem:[#allocation4] sm:$0xff] %vm862_vm3, %v767_v63  ;;  %v576_v4 = vpop.permute.xlu0 %575  ;;  %v3428_v51 = vld [vmem:[%s7798_s3 + $0x50] sm:$0xff]  ;;  %v5745_v63 = vld [vmem:[#allocation2 + $0x168] sm:$0xff] }
  0x9a   : > { %671 = vst.msk [vmem:[#allocation4 + $0x8] sm:$0xff] %vm669_vm2, %v576_v4  ;;  %3580 = vmatpush1.msra.mxu1 %v3428_v51  ;;  %v3441_v51 = vld [vmem:[%s7798_s3 + $0xb8] sm:$0xff] }
  0x9b   : > { %3581 = vmatprep.subr.mxu1 %v5211_v0 }
  0x9c   : > { %971 = vrot.lane.b32.xlu0 %v5443_v25, %s5214_s26  ;;  %v769_v5 = vpop.permute.xlu1 %768  ;;  %v5645_v25 = vld [vmem:[#allocation2 + $0x138] sm:$0xff] }
  0x9d   : > { %973 = vrot.lane.b32.xlu1 %v5445_v26, %s5214_s26  ;;  %864 = vst.msk [vmem:[#allocation4 + $0x8] sm:$0xff] %vm862_vm3, %v769_v5  ;;  %v3423_v5 = vld [vmem:[%s7798_s3 + $0x28] sm:$0xff] }
  0xa0   : > { %1164 = vrot.lane.b32.xlu0 %v1672_v56, %s5215_s27 }
  0xa1   : > { %1166 = vrot.lane.b32.xlu1 %v1673_v57, %s5215_s27 }
  0xa4   : > { %1357 = vrot.lane.b32.xlu0 %v1865_v58, %s5216_s28 }
  0xa5   : > { %1359 = vrot.lane.b32.xlu1 %v1866_v59, %s5216_s28 }
  0xa8   : > { %1551 = vrot.lane.b32.xlu0 %v5451_v29, %s5217_s8 }
  0xa9   : > { %1553 = vrot.lane.b32.xlu1 %v5453_v30, %s5217_s8 }
  0xac   : > { %1744 = vrot.lane.b32.xlu0 %v5587_v2, %s5218_s13 }
  0xad   : > { %1746 = vrot.lane.b32.xlu1 %v5589_v3, %s5218_s13 }
  0xae   : > { %v960_v7 = vpop.permute.xlu0 %959 }
  0xaf   : > { %v962_v8 = vpop.permute.xlu1 %961  ;;  %1056 = vst.msk [vmem:[#allocation4] sm:$0xff] %vm1055_vm4, %v960_v7 }
  0xb0   : > { %1057 = vst.msk [vmem:[#allocation4 + $0x8] sm:$0xff] %vm1055_vm4, %v962_v8  ;;  %1937 = vrot.lane.b32.xlu0 %v5597_v6, %s5219_s16 }
  0xb1   : > { %589 = vrot.lane.b32.xlu1 %v1672_v56, %s5212_s24 }
  0xb2   : > { %v1153_v10 = vpop.permute.xlu0 %1152 }
  0xb3   : > { %v1155_v11 = vpop.permute.xlu1 %1154  ;;  %1249 = vst.msk [vmem:[#allocation4] sm:$0xff] %vm1248_vm5, %v1153_v10  ;;  %v3422_v10 = vld [vmem:[%s7798_s3 + $0x20] sm:$0xff] }
  0xb4   : > { %1250 = vst.msk [vmem:[#allocation4 + $0x8] sm:$0xff] %vm1248_vm5, %v1155_v11  ;;  %1939 = vrot.lane.b32.xlu0 %v5604_v9, %s5219_s16  ;;  %v3421_v11 = vld [vmem:[%s7798_s3 + $0x18] sm:$0xff] }
  0xb5   : > { %591 = vrot.lane.b32.xlu1 %v1673_v57, %s5212_s24  ;;  %v3426_v57 = vld [vmem:[%s7798_s3 + $0x40] sm:$0xff] }
  0xb6   : > { %v1346_v12 = vpop.permute.xlu0 %1345 }
  0xb7   : > { %v1348_v13 = vpop.permute.xlu1 %1347  ;;  %1442 = vst.msk [vmem:[#allocation4] sm:$0xff] %vm1441_vm6, %v1346_v12  ;;  %v5775_v12 = vld [vmem:[#allocation2 + $0x169] sm:$0xff] }
  0xb8   : > { %1443 = vst.msk [vmem:[#allocation4 + $0x8] sm:$0xff] %vm1441_vm6, %v1348_v13  ;;  %782 = vrot.lane.b32.xlu0 %v1865_v58, %s5213_s25 }
  0xb9   : > { %784 = vrot.lane.b32.xlu1 %v1866_v59, %s5213_s25 }
  0xba   : > { %v1540_v14 = vpop.permute.xlu0 %1539 }
  0xbb   : > { %v1542_v15 = vpop.permute.xlu1 %1541  ;;  %1636 = vst.msk [vmem:[#allocation4] sm:$0xff] %vm1635_vm7, %v1540_v14 }
  0xbc   : > { %1637 = vst.msk [vmem:[#allocation4 + $0x8] sm:$0xff] %vm1635_vm7, %v1542_v15  ;;  %975 = vrot.lane.b32.xlu0 %v5451_v29, %s5214_s26  ;;  %v5654_v29 = vld [vmem:[#allocation2 + $0x131] sm:$0xff] }
  0xbd   : > { %977 = vrot.lane.b32.xlu1 %v5453_v30, %s5214_s26  ;;  %v3420_v15 = vld [vmem:[%s7798_s3 + $0x10] sm:$0xff] }
  0xbe   : > { %v1733_v16 = vpop.permute.xlu0 %1732 }
  0xbf   : > { %v1735_v17 = vpop.permute.xlu1 %1734  ;;  %1829 = vst.msk [vmem:[#allocation4] sm:$0xff] %vm1828_vm8, %v1733_v16 }
  0xc0   : > { %1830 = vst.msk [vmem:[#allocation4 + $0x8] sm:$0xff] %vm1828_vm8, %v1735_v17  ;;  %1168 = vrot.lane.b32.xlu0 %v5587_v2, %s5215_s27 }
  0xc1   : > { %1170 = vrot.lane.b32.xlu1 %v5589_v3, %s5215_s27 }
  0xc2   : > { %v1926_v20 = vpop.permute.xlu0 %1925 }
  0xc3   : > { %v578_v21 = vpop.permute.xlu1 %577  ;;  %2022 = vst.msk [vmem:[#allocation4] sm:$0xff] %vm2021_vm9, %v1926_v20 }
  0xc4   : > { %672 = vst.msk [vmem:[#allocation4 + $0x10] sm:$0xff] %vm669_vm2, %v578_v21  ;;  %1361 = vrot.lane.b32.xlu0 %v5597_v6, %s5216_s28 }
  0xc5   : > { %1363 = vrot.lane.b32.xlu1 %v5604_v9, %s5216_s28 }
  0xc6   : > { %v1928_v22 = vpop.permute.xlu0 %1927 }
  0xc7   : > { %v580_v23 = vpop.permute.xlu1 %579  ;;  %2023 = vst.msk [vmem:[#allocation4 + $0x8] sm:$0xff] %vm2021_vm9, %v1928_v22  ;;  %v3449_v22 = vld [vmem:[%s7798_s3 + $0xf8] sm:$0xff] }
  0xc8   : > { %673 = vst.msk [vmem:[#allocation4 + $0x18] sm:$0xff] %vm669_vm2, %v580_v23  ;;  %1555 = vrot.lane.b32.xlu0 %v5483_v39, %s5217_s8 }
  0xc9   : > { %1557 = vrot.lane.b32.xlu1 %v5488_v42, %s5217_s8 }
  0xca   : > { %v771_v26 = vpop.permute.xlu0 %770  ;;  %v2054_v27 = vld [vmem:[#allocation4] sm:$0xff] }
  0xcb   : > { %v773_v28 = vpop.permute.xlu1 %772  ;;  %865 = vst.msk [vmem:[#allocation4 + $0x10] sm:$0xff] %vm862_vm3, %v771_v26  ;;  %5020 = vmatprep.mubr.msk.f32.mxu0 %vm2098_vm10, %v2054_v27  ;;  %v402_v26 = vld [vmem:[%s5393_s23 + $0xb0] sm:$0xff] }
  0xcc   : > { %866 = vst.msk [vmem:[#allocation4 + $0x18] sm:$0xff] %vm862_vm3, %v773_v28  ;;  %1748 = vrot.lane.b32.xlu0 %v5643_v24, %s5218_s13 }
  0xcd   : > { %1750 = vrot.lane.b32.xlu1 %v5645_v25, %s5218_s13  ;;  %435 = vst.msk [vmem:[#allocation2 + $0x250] sm:$0xff] %vm225_vm0, %v402_v26 }
  0xce   : > { %v964_v30 = vpop.permute.xlu0 %963  ;;  %v2055_v31 = vld [vmem:[#allocation4 + $0x8] sm:$0xff] }
  0xcf   : > { %v966_v32 = vpop.permute.xlu1 %965  ;;  %1058 = vst.msk [vmem:[#allocation4 + $0x10] sm:$0xff] %vm1055_vm4, %v964_v30  ;;  %5021 = vmatmul.mubr.msk.f32.vlgmr.msra.gmra.mxu0 %vm2098_vm10, %v2055_v31 }
  0xd0   : > { %1059 = vst.msk [vmem:[#allocation4 + $0x18] sm:$0xff] %vm1055_vm4, %v966_v32  ;;  %1941 = vrot.lane.b32.xlu0 %v5654_v29, %s5219_s16  ;;  %v3445_v32 = vld [vmem:[%s7798_s3 + $0xd8] sm:$0xff] }
  0xd1   : > { %593 = vrot.lane.b32.xlu1 %v5587_v2, %s5212_s24 }
  0xd2   : > { %v1157_v34 = vpop.permute.xlu0 %1156 }
  0xd3   : > { %v1159_v35 = vpop.permute.xlu1 %1158  ;;  %1251 = vst.msk [vmem:[#allocation4 + $0x10] sm:$0xff] %vm1248_vm5, %v1157_v34  ;;  %v3444_v34 = vld [vmem:[%s7798_s3 + $0xd0] sm:$0xff] }
  0xd4   : > { %1252 = vst.msk [vmem:[#allocation4 + $0x18] sm:$0xff] %vm1248_vm5, %v1159_v35  ;;  %1943 = vrot.lane.b32.xlu0 %v5663_v33, %s5219_s16 }
  0xd5   : > { %595 = vrot.lane.b32.xlu1 %v5589_v3, %s5212_s24 }
  0xd6   : > { %v1350_v38 = vpop.permute.xlu0 %1349 }
  0xd7   : > { %v1352_v40 = vpop.permute.xlu1 %1351  ;;  %1444 = vst.msk [vmem:[#allocation4 + $0x10] sm:$0xff] %vm1441_vm6, %v1350_v38 }
  0xd8   : > { %1445 = vst.msk [vmem:[#allocation4 + $0x18] sm:$0xff] %vm1441_vm6, %v1352_v40  ;;  %786 = vrot.lane.b32.xlu0 %v5597_v6, %s5213_s25  ;;  %v5758_v6 = vld [vmem:[#allocation2 + $0x161] sm:$0xff] }
  0xd9   : > { %788 = vrot.lane.b32.xlu1 %v5604_v9, %s5213_s25 }
  0xda   : > { %v1544_v44 = vpop.permute.xlu0 %1543 }
  0xdb   : > { %v1546_v45 = vpop.permute.xlu1 %1545  ;;  %1638 = vst.msk [vmem:[#allocation4 + $0x10] sm:$0xff] %vm1635_vm7, %v1544_v44  ;;  %v5878_v44 = vld [vmem:[#allocation2 + $0x191] sm:$0xff] }
  0xdc   : > { %1639 = vst.msk [vmem:[#allocation4 + $0x18] sm:$0xff] %vm1635_vm7, %v1546_v45  ;;  %979 = vrot.lane.b32.xlu0 %v5483_v39, %s5214_s26  ;;  %v3427_v39 = vld [vmem:[%s7798_s3 + $0x48] sm:$0xff] }
  0xdd   : > { %981 = vrot.lane.b32.xlu1 %v5488_v42, %s5214_s26  ;;  %v401_v42 = vld [vmem:[%s5393_s23 + $0xa8] sm:$0xff]  ;;  %3582 = vmatpush1.msra.mxu1 %v3427_v39 }
  0xde   : > { %v1737_v49 = vpop.permute.xlu0 %1736  ;;  %434 = vst.msk [vmem:[#allocation2 + $0x228] sm:$0xff] %vm225_vm0, %v401_v42  ;;  %3583 = vmatprep.subr.mxu1 %v5211_v0 }
  0xdf   : > { %v1739_v50 = vpop.permute.xlu1 %1738  ;;  %1831 = vst.msk [vmem:[#allocation4 + $0x10] sm:$0xff] %vm1828_vm8, %v1737_v49  ;;  %3584 = vmatpush1.msra.mxu1 %v3426_v57 }
  0xe0   : > { %1832 = vst.msk [vmem:[#allocation4 + $0x18] sm:$0xff] %vm1828_vm8, %v1739_v50  ;;  %1172 = vrot.lane.b32.xlu0 %v5643_v24, %s5215_s27  ;;  %3585 = vmatprep.subr.mxu1 %v5211_v0  ;;  %v3442_v50 = vld [vmem:[%s7798_s3 + $0xc0] sm:$0xff] }
  0xe1   : > { %1174 = vrot.lane.b32.xlu1 %v5645_v25, %s5215_s27  ;;  %3586 = vmatpush1.msra.mxu1 %v3425_v60 }
  0xe2   : > { %v1930_v53 = vpop.permute.xlu0 %1929  ;;  %3587 = vmatprep.subr.mxu1 %v5211_v0 }
  0xe3   : > { %v582_v56 = vpop.permute.xlu1 %581  ;;  %2024 = vst.msk [vmem:[#allocation4 + $0x10] sm:$0xff] %vm2021_vm9, %v1930_v53  ;;  %3588 = vmatpush1.msra.mxu1 %v3424_v61  ;;  %v3440_v53 = vld [vmem:[%s7798_s3 + $0xb0] sm:$0xff] }
  0xe4   : > { %674 = vst.msk [vmem:[#allocation4 + $0x20] sm:$0xff] %vm669_vm2, %v582_v56  ;;  %1365 = vrot.lane.b32.xlu0 %v5654_v29, %s5216_s28  ;;  %3589 = vmatprep.subr.mxu1 %v5211_v0 }
  0xe5   : > { %1367 = vrot.lane.b32.xlu1 %v5663_v33, %s5216_s28  ;;  %3590 = vmatpush1.msra.mxu1 %v3423_v5 }
  0xe6   : > { %v1932_v58 = vpop.permute.xlu0 %1931  ;;  %3591 = vmatprep.subr.mxu1 %v5211_v0 }
  0xe7   : > { %v584_v59 = vpop.permute.xlu1 %583  ;;  %2025 = vst.msk [vmem:[#allocation4 + $0x18] sm:$0xff] %vm2021_vm9, %v1932_v58  ;;  %3592 = vmatpush1.msra.mxu1 %v3422_v10  ;;  %v3439_v58 = vld [vmem:[%s7798_s3 + $0xa8] sm:$0xff] }
  0xe8   : > { %675 = vst.msk [vmem:[#allocation4 + $0x28] sm:$0xff] %vm669_vm2, %v584_v59  ;;  %1559 = vrot.lane.b32.xlu0 %v5513_v46, %s5217_s8  ;;  %3593 = vmatprep.subr.mxu1 %v5211_v0  ;;  %v3438_v59 = vld [vmem:[%s7798_s3 + $0xa0] sm:$0xff] }
  0xe9   : > { %1561 = vrot.lane.b32.xlu1 %v5519_v47, %s5217_s8  ;;  %3594 = vmatpush1.msra.mxu1 %v3421_v11 }
  0xea   : > { %v775_v2 = vpop.permute.xlu0 %774  ;;  %v2056_v4 = vld [vmem:[#allocation4 + $0x10] sm:$0xff]  ;;  %3595 = vmatprep.subr.mxu1 %v5211_v0 }
  0xeb   : > { %v777_v3 = vpop.permute.xlu1 %776  ;;  %867 = vst.msk [vmem:[#allocation4 + $0x20] sm:$0xff] %vm862_vm3, %v775_v2  ;;  %5023 = vmatprep.mubr.msk.f32.mxu0 %vm2098_vm10, %v2056_v4  ;;  %3596 = vmatpush1.msra.mxu1 %v3420_v15  ;;  %v404_v4 = vld [vmem:[%s5393_s23 + $0xc0] sm:$0xff] }
  0xec   : > { %868 = vst.msk [vmem:[#allocation4 + $0x28] sm:$0xff] %vm862_vm3, %v777_v3  ;;  %1752 = vrot.lane.b32.xlu0 %v5743_v62, %s5218_s13  ;;  %3597 = vmatprep.subr.mxu1 %v5211_v0  ;;  %v3436_v3 = vld [vmem:[%s7798_s3 + $0x90] sm:$0xff]  ;;  %v5972_v15 = vld [vmem:[#allocation2 + $0x1c0] sm:$0xff] }
  0xed   : > { %1754 = vrot.lane.b32.xlu1 %v5745_v63, %s5218_s13  ;;  %3598 = vmatpush1.msra.mxu1 %v3419_v18  ;;  %437 = vst.msk [vmem:[#allocation2 + $0x280] sm:$0xff] %vm225_vm0, %v404_v4 }
  0xee   : > { %v968_v7 = vpop.permute.xlu0 %967  ;;  %v2057_v9 = vld [vmem:[#allocation4 + $0x18] sm:$0xff]  ;;  %3599 = vmatprep.subr.mxu1 %v5211_v0 }
  0xef   : > { %v970_v8 = vpop.permute.xlu1 %969  ;;  %1060 = vst.msk [vmem:[#allocation4 + $0x20] sm:$0xff] %vm1055_vm4, %v968_v7  ;;  %5024 = vmatmul.mubr.msk.f32.gmra.mxu0 %vm2098_vm10, %v2057_v9  ;;  %3600 = vmatpush1.msra.mxu1 %v3418_v19  ;;  %v3434_v7 = vld [vmem:[%s7798_s3 + $0x80] sm:$0xff] }
  0xf0   : > { %1061 = vst.msk [vmem:[#allocation4 + $0x28] sm:$0xff] %vm1055_vm4, %v970_v8  ;;  %1945 = vrot.lane.b32.xlu0 %v5758_v6, %s5219_s16  ;;  %3601 = vmatprep.subr.mxu1 %v5211_v0  ;;  %v2553_v8 = vld [vmem:[#allocation3 + $0xf] sm:$0xff]  ;;  %v1490_v9 = vld [vmem:[#allocation2 + $0x1c7] sm:$0xff] }
  0xf1   : > { %597 = vrot.lane.b32.xlu1 %v5643_v24, %s5212_s24  ;;  %3602 = vmatpush2.msra.mxu1 %v3449_v22 }
  0xf2   : > { %v1161_v13 = vpop.permute.xlu0 %1160  ;;  %3603 = vmatprep.subr.mxu1 %v5211_v0 }
  0xf3   : > { %v1163_v14 = vpop.permute.xlu1 %1162  ;;  %1253 = vst.msk [vmem:[#allocation4 + $0x20] sm:$0xff] %vm1248_vm5, %v1161_v13  ;;  %v2554_v13 = vld [vmem:[#allocation3 + $0x17] sm:$0xff] }
  0xf4   : > { %1254 = vst.msk [vmem:[#allocation4 + $0x28] sm:$0xff] %vm1248_vm5, %v1163_v14  ;;  %1947 = vrot.lane.b32.xlu0 %v5775_v12, %s5219_s16 }
  0xf5   : > { %599 = vrot.lane.b32.xlu1 %v5645_v25, %s5212_s24  ;;  %v3448_v25 = vld [vmem:[%s7798_s3 + $0xf0] sm:$0xff] }
  0xf6   : > { %v1354_v16 = vpop.permute.xlu0 %1353  ;;  %3604 = vmatpush2.msra.mxu1 %v3448_v25 }
  0xf7   : > { %v1356_v17 = vpop.permute.xlu1 %1355  ;;  %1446 = vst.msk [vmem:[#allocation4 + $0x20] sm:$0xff] %vm1441_vm6, %v1354_v16  ;;  %3605 = vmatprep.subr.mxu1 %v5211_v0  ;;  %v5974_v16 = vld [vmem:[#allocation2 + $0x1c8] sm:$0xff] }
  0xf8   : > { %1447 = vst.msk [vmem:[#allocation4 + $0x28] sm:$0xff] %vm1441_vm6, %v1356_v17  ;;  %790 = vrot.lane.b32.xlu0 %v5654_v29, %s5213_s25  ;;  %v3446_v29 = vld [vmem:[%s7798_s3 + $0xe0] sm:$0xff] }
  0xf9   : > { %792 = vrot.lane.b32.xlu1 %v5663_v33, %s5213_s25  ;;  %v5846_v33 = vld [vmem:[#allocation2 + $0x24f] sm:$0xff] }
  0xfa   : > { %v1548_v20 = vpop.permute.xlu0 %1547  ;;  %501 = vst.msk [vmem:[#allocation4 + $0xc0] sm:$0xff] %vm225_vm0, %v5846_v33 }
  0xfb   : > { %v1550_v21 = vpop.permute.xlu1 %1549  ;;  %1640 = vst.msk [vmem:[#allocation4 + $0x20] sm:$0xff] %vm1635_vm7, %v1548_v20  ;;  %v5986_v20 = vld [vmem:[#allocation2 + $0x1c1] sm:$0xff] }
  0xfc   : > { %1641 = vst.msk [vmem:[#allocation4 + $0x28] sm:$0xff] %vm1635_vm7, %v1550_v21  ;;  %983 = vrot.lane.b32.xlu0 %v5513_v46, %s5214_s26  ;;  %v3447_v46 = vld [vmem:[%s7798_s3 + $0xe8] sm:$0xff] }
  0xfd   : > { %985 = vrot.lane.b32.xlu1 %v5519_v47, %s5214_s26  ;;  %v403_v47 = vld [vmem:[%s5393_s23 + $0xb8] sm:$0xff]  ;;  %3606 = vmatpush2.msra.mxu1 %v3447_v46 }
  0xfe   : > { %v1741_v23 = vpop.permute.xlu0 %1740  ;;  %436 = vst.msk [vmem:[#allocation2 + $0x258] sm:$0xff] %vm225_vm0, %v403_v47  ;;  %3607 = vmatprep.subr.mxu1 %v5211_v0 }
  0xff   : > { %v1743_v24 = vpop.permute.xlu1 %1742  ;;  %1833 = vst.msk [vmem:[#allocation4 + $0x20] sm:$0xff] %vm1828_vm8, %v1741_v23  ;;  %3608 = vmatpush2.msra.mxu1 %v3446_v29 }
 0x100   : > { %1834 = vst.msk [vmem:[#allocation4 + $0x28] sm:$0xff] %vm1828_vm8, %v1743_v24  ;;  %1176 = vrot.lane.b32.xlu0 %v5743_v62, %s5215_s27  ;;  %3609 = vmatprep.subr.mxu1 %v5211_v0  ;;  %v5861_v0 = vld [vmem:[#allocation2 + $0x198] sm:$0xff]  ;;  %v5995_v24 = vld [vmem:[#allocation2 + $0x1c9] sm:$0xff] }
 0x101   : > { %1178 = vrot.lane.b32.xlu1 %v5745_v63, %s5215_s27  ;;  %3610 = vmatpush2.msra.mxu1 %v3445_v32  ;;  %v407_v32 = vld [vmem:[%s5393_s23 + $0xd8] sm:$0xff] }
 0x102   : > { %v1934_v27 = vpop.permute.xlu0 %1933  ;;  %3611 = vmatprep.subr.mxu1 %v5865_v41  ;;  %440 = vst.msk [vmem:[#allocation2 + $0x2b8] sm:$0xff] %vm225_vm0, %v407_v32 }
 0x103   : > { %v586_v28 = vpop.permute.xlu1 %585  ;;  %2026 = vst.msk [vmem:[#allocation4 + $0x20] sm:$0xff] %vm2021_vm9, %v1934_v27  ;;  %3612 = vmatpush2.msra.mxu1 %v3444_v34 }
 0x104   : > { %676 = vst.msk [vmem:[#allocation4 + $0x30] sm:$0xff] %vm669_vm2, %v586_v28  ;;  %1369 = vrot.lane.b32.xlu0 %v5758_v6, %s5216_s28  ;;  %3613 = vmatprep.subr.mxu1 %v5865_v41 }
 0x105   : > { %1371 = vrot.lane.b32.xlu1 %v5775_v12, %s5216_s28  ;;  %v5855_v35 = vld [vmem:[#allocation2 + $0x257] sm:$0xff]  ;;  %3614 = vmatpush2.msra.mxu1 %v3443_v43 }
 0x106   : > { %v1936_v30 = vpop.permute.xlu0 %1935  ;;  %502 = vst.msk [vmem:[#allocation4 + $0xc8] sm:$0xff] %vm225_vm0, %v5855_v35  ;;  %3615 = vmatprep.subr.mxu1 %v5865_v41 }
 0x107   : > { %v588_v31 = vpop.permute.xlu1 %587  ;;  %2027 = vst.msk [vmem:[#allocation4 + $0x28] sm:$0xff] %vm2021_vm9, %v1936_v30  ;;  %3616 = vmatpush2.msra.mxu1 %v3442_v50 }
 0x108   : > { %677 = vst.msk [vmem:[#allocation4 + $0x38] sm:$0xff] %vm669_vm2, %v588_v31  ;;  %1563 = vrot.lane.b32.xlu0 %v5545_v54, %s5217_s8  ;;  %3617 = vmatprep.subr.mxu1 %v5865_v41  ;;  %v406_v31 = vld [vmem:[%s5393_s23 + $0xd0] sm:$0xff] }
 0x109   : > { %1565 = vrot.lane.b32.xlu1 %v5551_v55, %s5217_s8  ;;  %3618 = vmatpush2.msra.mxu1 %v3441_v51  ;;  %439 = vst.msk [vmem:[#allocation2 + $0x2b0] sm:$0xff] %vm225_vm0, %v406_v31  ;;  %v6054_v51 = vld [vmem:[#allocation2 + $0x1f1] sm:$0xff] }
 0x10a   : > { %v779_v37 = vpop.permute.xlu0 %778  ;;  %v2058_v40 = vld [vmem:[#allocation4 + $0x20] sm:$0xff]  ;;  %3619 = vmatprep.subr.mxu1 %v5865_v41  ;;  %v411_v31 = vld [vmem:[%s5393_s23 + $0xf8] sm:$0xff] }
 0x10b   : > { %v781_v38 = vpop.permute.xlu1 %780  ;;  %869 = vst.msk [vmem:[#allocation4 + $0x30] sm:$0xff] %vm862_vm3, %v779_v37  ;;  %5026 = vmatprep.mubr.msk.f32.mxu0 %vm2098_vm10, %v2058_v40  ;;  %3620 = vmatpush2.msra.mxu1 %v3440_v53  ;;  %v464_v40 = vld [vmem:[#allocation2 + $0x1c7] sm:$0xff]  ;;  %v6063_v53 = vld [vmem:[#allocation2 + $0x1f9] sm:$0xff] }
 0x10c   : > { %870 = vst.msk [vmem:[#allocation4 + $0x38] sm:$0xff] %vm862_vm3, %v781_v38  ;;  %1756 = vrot.lane.b32.xlu0 %v5859_v36, %s5218_s13  ;;  %3621 = vmatprep.subr.mxu1 %v5865_v41 }
 0x10d   : > { %1758 = vrot.lane.b32.xlu1 %v5861_v0, %s5218_s13  ;;  %3622 = vmatpush2.msra.mxu1 %v3439_v58  ;;  %496 = vst.msk [vmem:[#allocation4 + $0x98] sm:$0xff] %vm225_vm0, %v464_v40  ;;  %444 = vst.msk [vmem:[#allocation2 + $0x318] sm:$0xff] %vm225_vm0, %v411_v31  ;;  %v6175_v40 = vld [vmem:[#allocation2 + $0x258] sm:$0xff] }
 0x10e   : > { %v972_v45 = vpop.permute.xlu0 %971  ;;  %v2059_v49 = vld [vmem:[#allocation4 + $0x28] sm:$0xff]  ;;  %3623 = vmatprep.subr.mxu1 %v5865_v41 }
 0x10f   : > { %v974_v48 = vpop.permute.xlu1 %973  ;;  %1062 = vst.msk [vmem:[#allocation4 + $0x30] sm:$0xff] %vm1055_vm4, %v972_v45  ;;  %5027 = vmatmul.mubr.msk.f32.gmra.mxu0 %vm2098_vm10, %v2059_v49  ;;  %3624 = vmatpush2.msra.mxu1 %v3438_v59  ;;  %v6043_v45 = vld [vmem:[#allocation2 + $0x1f8] sm:$0xff] }
 0x110   : > { %1063 = vst.msk [vmem:[#allocation4 + $0x38] sm:$0xff] %vm1055_vm4, %v974_v48  ;;  %1949 = vrot.lane.b32.xlu0 %v5878_v44, %s5219_s16  ;;  %3625 = vmatprep.subr.mxu1 %v5865_v41  ;;  %v6037_v43 = vld [vmem:[#allocation2 + $0x2b7] sm:$0xff] }
 0x111   : > { %601 = vrot.lane.b32.xlu1 %v5743_v62, %s5212_s24  ;;  %v3437_v62 = vld [vmem:[%s7798_s3 + $0x98] sm:$0xff]  ;;  %506 = vst.msk [vmem:[#allocation4 + $0xe8] sm:$0xff] %vm225_vm0, %v6037_v43 }
 0x112   : > { %v1165_v39 = vpop.permute.xlu0 %1164  ;;  %3626 = vmatpush2.msra.mxu1 %v3437_v62 }
 0x113   : > { %v1167_v42 = vpop.permute.xlu1 %1166  ;;  %1255 = vst.msk [vmem:[#allocation4 + $0x30] sm:$0xff] %vm1248_vm5, %v1165_v39  ;;  %3627 = vmatprep.subr.mxu1 %v5865_v41 }
 0x114   : > { %1256 = vst.msk [vmem:[#allocation4 + $0x38] sm:$0xff] %vm1248_vm5, %v1167_v42  ;;  %1951 = vrot.lane.b32.xlu0 %v5895_v52, %s5219_s16  ;;  %3628 = vmatpush2.msra.mxu1 %v3436_v3  ;;  %v409_v3 = vld [vmem:[%s5393_s23 + $0xe8] sm:$0xff] }
 0x115   : > { %603 = vrot.lane.b32.xlu1 %v5745_v63, %s5212_s24  ;;  %3629 = vmatprep.subr.mxu1 %v5865_v41  ;;  %442 = vst.msk [vmem:[#allocation2 + $0x2e8] sm:$0xff] %vm225_vm0, %v409_v3 }
 0x116   : > { %v1358_v56 = vpop.permute.xlu0 %1357 }
 0x117   : > { %v1360_v57 = vpop.permute.xlu1 %1359  ;;  %1448 = vst.msk [vmem:[#allocation4 + $0x30] sm:$0xff] %vm1441_vm6, %v1358_v56 }
 0x118   : > { %1449 = vst.msk [vmem:[#allocation4 + $0x38] sm:$0xff] %vm1441_vm6, %v1360_v57  ;;  %794 = vrot.lane.b32.xlu0 %v5758_v6, %s5213_s25 }
 0x119   : > { %796 = vrot.lane.b32.xlu1 %v5775_v12, %s5213_s25  ;;  %v5962_v12 = vld [vmem:[#allocation2 + $0x27f] sm:$0xff] }
 0x11a   : > { %v1552_v60 = vpop.permute.xlu0 %1551  ;;  %503 = vst.msk [vmem:[#allocation4 + $0xd0] sm:$0xff] %vm225_vm0, %v5962_v12 }
 0x11b   : > { %v1554_v61 = vpop.permute.xlu1 %1553  ;;  %1642 = vst.msk [vmem:[#allocation4 + $0x30] sm:$0xff] %vm1635_vm7, %v1552_v60 }
 0x11c   : > { %1643 = vst.msk [vmem:[#allocation4 + $0x38] sm:$0xff] %vm1635_vm7, %v1554_v61  ;;  %987 = vrot.lane.b32.xlu0 %v5545_v54, %s5214_s26  ;;  %v3435_v54 = vld [vmem:[%s7798_s3 + $0x88] sm:$0xff] }
 0x11d   : > { %989 = vrot.lane.b32.xlu1 %v5551_v55, %s5214_s26  ;;  %v405_v55 = vld [vmem:[%s5393_s23 + $0xc8] sm:$0xff]  ;;  %3630 = vmatpush2.msra.mxu1 %v3435_v54 }
 0x11e   : > { %v1745_v63 = vpop.permute.xlu0 %1744  ;;  %438 = vst.msk [vmem:[#allocation2 + $0x288] sm:$0xff] %vm225_vm0, %v405_v55  ;;  %3631 = vmatprep.subr.mxu1 %v5865_v41  ;;  %v465_v55 = vld [vmem:[#allocation2 + $0x1ef] sm:$0xff] }
 0x11f   : > { %v1747_v2 = vpop.permute.xlu1 %1746  ;;  %1835 = vst.msk [vmem:[#allocation4 + $0x30] sm:$0xff] %vm1828_vm8, %v1745_v63  ;;  %3632 = vmatpush2.msra.mxu1 %v3434_v7 }
 0x120   : > { %1836 = vst.msk [vmem:[#allocation4 + $0x38] sm:$0xff] %vm1828_vm8, %v1747_v2  ;;  %1180 = vrot.lane.b32.xlu0 %v5859_v36, %s5215_s27  ;;  %3634 = vmatmul.mubr.f32.vlgmr.msra.gmra.mxu1 %v2553_v8  ;;  %v408_v2 = vld [vmem:[%s5393_s23 + $0xe0] sm:$0xff] }
 0x121   : > { %1182 = vrot.lane.b32.xlu1 %v5861_v0, %s5215_s27  ;;  %4019 = vmatprep.subr.mxu1 %v5865_v41  ;;  %441 = vst.msk [vmem:[#allocation2 + $0x2e0] sm:$0xff] %vm225_vm0, %v408_v2  ;;  %497 = vst.msk [vmem:[#allocation4 + $0xa0] sm:$0xff] %vm225_vm0, %v465_v55 }
 0x122   : > { %v1938_v5 = vpop.permute.xlu0 %1937  ;;  %3638 = vmatprep.mubr.f32.mxu1 %v5865_v41  ;;  %v6033_v41 = vld [vmem:[#allocation2 + $0x2af] sm:$0xff] }
 0x123   : > { %v590_v6 = vpop.permute.xlu1 %589  ;;  %2028 = vst.msk [vmem:[#allocation4 + $0x30] sm:$0xff] %vm2021_vm9, %v1938_v5  ;;  %v1493_v5 = vld [vmem:[#allocation2 + $0x21f] sm:$0xff] }
 0x124   : > { %678 = vst.msk [vmem:[#allocation4 + $0x40] sm:$0xff] %vm669_vm2, %v590_v6  ;;  %1373 = vrot.lane.b32.xlu0 %v5878_v44, %s5216_s28  ;;  %3639 = vmatmul.mubr.f32.gmra.mxu1 %v2554_v13  ;;  %v1494_v6 = vld [vmem:[#allocation2 + $0x227] sm:$0xff] }
 0x125   : > { %1375 = vrot.lane.b32.xlu1 %v5895_v52, %s5216_s28  ;;  %v5968_v14 = vld [vmem:[#allocation2 + $0x287] sm:$0xff]  ;;  %505 = vst.msk [vmem:[#allocation4 + $0xe0] sm:$0xff] %vm225_vm0, %v6033_v41 }
 0x126   : > { %v1940_v10 = vpop.permute.xlu0 %1939  ;;  %504 = vst.msk [vmem:[#allocation4 + $0xd8] sm:$0xff] %vm225_vm0, %v5968_v14  ;;  %v6109_v13 = vld [vmem:[#allocation2 + $0x220] sm:$0xff] }
 0x127   : > { %v592_v11 = vpop.permute.xlu1 %591  ;;  %2029 = vst.msk [vmem:[#allocation4 + $0x38] sm:$0xff] %vm2021_vm9, %v1940_v10 }
 0x128   : > { %679 = vst.msk [vmem:[#allocation4 + $0x48] sm:$0xff] %vm669_vm2, %v592_v11  ;;  %1567 = vrot.lane.b32.xlu0 %v5578_v1, %s5217_s8  ;;  %v6101_v10 = vld [vmem:[#allocation2 + $0x2df] sm:$0xff]  ;;  %v6105_v11 = vld [vmem:[#allocation2 + $0x2e7] sm:$0xff] }
 0x129   : > { %1569 = vrot.lane.b32.xlu1 %v1490_v9, %s5217_s8  ;;  %507 = vst.msk [vmem:[#allocation4 + $0xf0] sm:$0xff] %vm225_vm0, %v6101_v10  ;;  %508 = vst.msk [vmem:[#allocation4 + $0xf8] sm:$0xff] %vm225_vm0, %v6105_v11 }
 0x12a   : > { %v783_v17 = vpop.permute.xlu0 %782  ;;  %v2060_v19 = vld [vmem:[#allocation4 + $0x30] sm:$0xff] }
 0x12b   : > { %v785_v18 = vpop.permute.xlu1 %784  ;;  %871 = vst.msk [vmem:[#allocation4 + $0x40] sm:$0xff] %vm862_vm3, %v783_v17  ;;  %5029 = vmatprep.mubr.msk.f32.mxu0 %vm2098_vm10, %v2060_v19  ;;  %v6122_v19 = vld [vmem:[#allocation2 + $0x221] sm:$0xff] }
 0x12c   : > { %872 = vst.msk [vmem:[#allocation4 + $0x48] sm:$0xff] %vm862_vm3, %v785_v18  ;;  %1760 = vrot.lane.b32.xlu0 %v5972_v15, %s5218_s13 }
 0x12d   : > { %1762 = vrot.lane.b32.xlu1 %v5974_v16, %s5218_s13 }
 0x12e   : > { %v976_v21 = vpop.permute.xlu0 %975  ;;  %v2061_v23 = vld [vmem:[#allocation4 + $0x38] sm:$0xff] }
 0x12f   : > { %v978_v22 = vpop.permute.xlu1 %977  ;;  %1064 = vst.msk [vmem:[#allocation4 + $0x40] sm:$0xff] %vm1055_vm4, %v976_v21  ;;  %5030 = vmatmul.mubr.msk.f32.gmra.mxu0 %vm2098_vm10, %v2061_v23  ;;  %v6131_v23 = vld [vmem:[#allocation2 + $0x229] sm:$0xff] }
 0x130   : > { %1065 = vst.msk [vmem:[#allocation4 + $0x48] sm:$0xff] %vm1055_vm4, %v978_v22  ;;  %1953 = vrot.lane.b32.xlu0 %v5986_v20, %s5219_s16 }
 0x131   : > { %605 = vrot.lane.b32.xlu1 %v5859_v36, %s5212_s24  ;;  %v1491_v36 = vld [vmem:[#allocation2 + $0x1ef] sm:$0xff] }
 0x132   : > { %v1169_v25 = vpop.permute.xlu0 %1168 }
 0x133   : > { %v1171_v26 = vpop.permute.xlu1 %1170  ;;  %1257 = vst.msk [vmem:[#allocation4 + $0x40] sm:$0xff] %vm1248_vm5, %v1169_v25 }
 0x134   : > { %1258 = vst.msk [vmem:[#allocation4 + $0x48] sm:$0xff] %vm1248_vm5, %v1171_v26  ;;  %1955 = vrot.lane.b32.xlu0 %v5995_v24, %s5219_s16 }
 0x135   : > { %607 = vrot.lane.b32.xlu1 %v5861_v0, %s5212_s24  ;;  %v1492_v0 = vld [vmem:[#allocation2 + $0x1f7] sm:$0xff] }
 0x136   : > { %v1362_v46 = vpop.permute.xlu0 %1361 }
 0x137   : > { %v1364_v47 = vpop.permute.xlu1 %1363  ;;  %1450 = vst.msk [vmem:[#allocation4 + $0x40] sm:$0xff] %vm1441_vm6, %v1362_v46 }
 0x138   : > { %1451 = vst.msk [vmem:[#allocation4 + $0x48] sm:$0xff] %vm1441_vm6, %v1364_v47  ;;  %798 = vrot.lane.b32.xlu0 %v5878_v44, %s5213_s25  ;;  %v6041_v44 = vld [vmem:[#allocation2 + $0x1f0] sm:$0xff] }
 0x139   : > { %800 = vrot.lane.b32.xlu1 %v5895_v52, %s5213_s25 }
 0x13a   : > { %v1556_v27 = vpop.permute.xlu0 %1555 }
 0x13b   : > { %v1558_v28 = vpop.permute.xlu1 %1557  ;;  %1644 = vst.msk [vmem:[#allocation4 + $0x40] sm:$0xff] %vm1635_vm7, %v1556_v27 }
 0x13c   : > { %1645 = vst.msk [vmem:[#allocation4 + $0x48] sm:$0xff] %vm1635_vm7, %v1558_v28  ;;  %991 = vrot.lane.b32.xlu0 %v5578_v1, %s5214_s26 }
 0x13d   : > { %993 = vrot.lane.b32.xlu1 %v1490_v9, %s5214_s26  ;;  %v466_v9 = vld [vmem:[#allocation2 + $0x1f7] sm:$0xff] }
 0x13e   : > { %v1749_v29 = vpop.permute.xlu0 %1748  ;;  %498 = vst.msk [vmem:[#allocation4 + $0xa8] sm:$0xff] %vm225_vm0, %v466_v9 }
 0x13f   : > { %v1751_v30 = vpop.permute.xlu1 %1750  ;;  %1837 = vst.msk [vmem:[#allocation4 + $0x40] sm:$0xff] %vm1828_vm8, %v1749_v29 }
 0x140   : > { %1838 = vst.msk [vmem:[#allocation4 + $0x48] sm:$0xff] %vm1828_vm8, %v1751_v30  ;;  %1184 = vrot.lane.b32.xlu0 %v5972_v15, %s5215_s27  ;;  %v410_v30 = vld [vmem:[%s5393_s23 + $0xf0] sm:$0xff] }
 0x141   : > { %1186 = vrot.lane.b32.xlu1 %v5974_v16, %s5215_s27  ;;  %443 = vst.msk [vmem:[#allocation2 + $0x310] sm:$0xff] %vm225_vm0, %v410_v30 }
 0x142   : > { %v1942_v1 = vpop.permute.xlu0 %1941 }
 0x143   : > { %v594_v34 = vpop.permute.xlu1 %593  ;;  %2030 = vst.msk [vmem:[#allocation4 + $0x40] sm:$0xff] %vm2021_vm9, %v1942_v1 }
 0x144   : > { %680 = vst.msk [vmem:[#allocation4 + $0x50] sm:$0xff] %vm669_vm2, %v594_v34  ;;  %1377 = vrot.lane.b32.xlu0 %v5986_v20, %s5216_s28  ;;  %v467_v34 = vld [vmem:[#allocation2 + $0x21f] sm:$0xff] }
 0x145   : > { %1379 = vrot.lane.b32.xlu1 %v5995_v24, %s5216_s28  ;;  %499 = vst.msk [vmem:[#allocation4 + $0xb0] sm:$0xff] %vm225_vm0, %v467_v34 }
 0x146   : > { %v1944_v37 = vpop.permute.xlu0 %1943 }
 0x147   : > { %v596_v38 = vpop.permute.xlu1 %595  ;;  %2031 = vst.msk [vmem:[#allocation4 + $0x48] sm:$0xff] %vm2021_vm9, %v1944_v37  ;;  %v468_v37 = vld [vmem:[#allocation2 + $0x227] sm:$0xff] }
 0x148   : > { %681 = vst.msk [vmem:[#allocation4 + $0x58] sm:$0xff] %vm669_vm2, %v596_v38  ;;  %1571 = vrot.lane.b32.xlu0 %v1491_v36, %s5217_s8  ;;  %v6173_v38 = vld [vmem:[#allocation2 + $0x250] sm:$0xff] }
 0x149   : > { %1573 = vrot.lane.b32.xlu1 %v1492_v0, %s5217_s8  ;;  %500 = vst.msk [vmem:[#allocation4 + $0xb8] sm:$0xff] %vm225_vm0, %v468_v37 }
 0x14a   : > { %v787_v48 = vpop.permute.xlu0 %786  ;;  %v2062_v50 = vld [vmem:[#allocation4 + $0x40] sm:$0xff] }
 0x14b   : > { %v789_v49 = vpop.permute.xlu1 %788  ;;  %873 = vst.msk [vmem:[#allocation4 + $0x50] sm:$0xff] %vm862_vm3, %v787_v48  ;;  %5032 = vmatprep.mubr.msk.f32.mxu0 %vm2098_vm10, %v2062_v50  ;;  %v6189_v50 = vld [vmem:[#allocation2 + $0x251] sm:$0xff] }
 0x14c   : > { %874 = vst.msk [vmem:[#allocation4 + $0x58] sm:$0xff] %vm862_vm3, %v789_v49  ;;  %1764 = vrot.lane.b32.xlu0 %v6041_v44, %s5218_s13  ;;  %v6187_v49 = vld [vmem:[%s7797_s2] ss:$0 sm:$0xff] }
 0x14d   : > { %1766 = vrot.lane.b32.xlu1 %v6043_v45, %s5218_s13 }
 0x14e   : > { %v980_v52 = vpop.permute.xlu0 %979  ;;  %v2063_v42 = vld [vmem:[#allocation4 + $0x48] sm:$0xff] }
 0x14f   : > { %v982_v39 = vpop.permute.xlu1 %981  ;;  %1066 = vst.msk [vmem:[#allocation4 + $0x50] sm:$0xff] %vm1055_vm4, %v980_v52  ;;  %5033 = vmatmul.mubr.msk.f32.gmra.mxu0 %vm2098_vm10, %v2063_v42 }
 0x150   : > { %1067 = vst.msk [vmem:[#allocation4 + $0x58] sm:$0xff] %vm1055_vm4, %v982_v39  ;;  %1957 = vrot.lane.b32.xlu0 %v6054_v51, %s5219_s16 }
 0x151   : > { %609 = vrot.lane.b32.xlu1 %v5972_v15, %s5212_s24  ;;  %v6111_v15 = vld [vmem:[#allocation2 + $0x228] sm:$0xff] }
 0x152   : > { %v1173_v56 = vpop.permute.xlu0 %1172 }
 0x153   : > { %v1175_v57 = vpop.permute.xlu1 %1174  ;;  %1259 = vst.msk [vmem:[#allocation4 + $0x50] sm:$0xff] %vm1248_vm5, %v1173_v56 }
 0x154   : > { %1260 = vst.msk [vmem:[#allocation4 + $0x58] sm:$0xff] %vm1248_vm5, %v1175_v57  ;;  %1959 = vrot.lane.b32.xlu0 %v6063_v53, %s5219_s16  ;;  %v6199_v57 = vld [vmem:[#allocation2 + $0x259] sm:$0xff] }
 0x155   : > { %611 = vrot.lane.b32.xlu1 %v5974_v16, %s5212_s24 }
 0x156   : > { %v1366_v58 = vpop.permute.xlu0 %1365 }
 0x157   : > { %v1368_v59 = vpop.permute.xlu1 %1367  ;;  %1452 = vst.msk [vmem:[#allocation4 + $0x50] sm:$0xff] %vm1441_vm6, %v1366_v58 }
 0x158   : > { %1453 = vst.msk [vmem:[#allocation4 + $0x58] sm:$0xff] %vm1441_vm6, %v1368_v59  ;;  %802 = vrot.lane.b32.xlu0 %v5986_v20, %s5213_s25 }
 0x159   : > { %804 = vrot.lane.b32.xlu1 %v5995_v24, %s5213_s25 }
 0x15a   : > { %v1560_v60 = vpop.permute.xlu0 %1559 }
 0x15b   : > { %v1562_v61 = vpop.permute.xlu1 %1561  ;;  %1646 = vst.msk [vmem:[#allocation4 + $0x50] sm:$0xff] %vm1635_vm7, %v1560_v60 }
 0x15c   : > { %1647 = vst.msk [vmem:[#allocation4 + $0x58] sm:$0xff] %vm1635_vm7, %v1562_v61  ;;  %995 = vrot.lane.b32.xlu0 %v1491_v36, %s5214_s26 }
 0x15d   : > { %997 = vrot.lane.b32.xlu1 %v1492_v0, %s5214_s26 }
 0x15e   : > { %v1753_v62 = vpop.permute.xlu0 %1752 }
 0x15f   : > { %v1755_v63 = vpop.permute.xlu1 %1754  ;;  %1839 = vst.msk [vmem:[#allocation4 + $0x50] sm:$0xff] %vm1828_vm8, %v1753_v62 }
 0x160   : > { %1840 = vst.msk [vmem:[#allocation4 + $0x58] sm:$0xff] %vm1828_vm8, %v1755_v63  ;;  %1188 = vrot.lane.b32.xlu0 %v6041_v44, %s5215_s27 }
 0x161   : > { %1190 = vrot.lane.b32.xlu1 %v6043_v45, %s5215_s27 }
 0x162   : > { %v1946_v4 = vpop.permute.xlu0 %1945 }
 0x163   : > { %v598_v54 = vpop.permute.xlu1 %597  ;;  %2032 = vst.msk [vmem:[#allocation4 + $0x50] sm:$0xff] %vm2021_vm9, %v1946_v4 }
 0x164   : > { %682 = vst.msk [vmem:[#allocation4 + $0x60] sm:$0xff] %vm669_vm2, %v598_v54  ;;  %1381 = vrot.lane.b32.xlu0 %v6054_v51, %s5216_s28 }
 0x165   : > { %1383 = vrot.lane.b32.xlu1 %v6063_v53, %s5216_s28 }
 0x166   : > { %v1948_v7 = vpop.permute.xlu0 %1947 }
 0x167   : > { %v600_v8 = vpop.permute.xlu1 %599  ;;  %2033 = vst.msk [vmem:[#allocation4 + $0x58] sm:$0xff] %vm2021_vm9, %v1948_v7 }
 0x168   : > { %683 = vst.msk [vmem:[#allocation4 + $0x68] sm:$0xff] %vm669_vm2, %v600_v8  ;;  %1575 = vrot.lane.b32.xlu0 %v1493_v5, %s5217_s8 }
 0x169   : > { %1577 = vrot.lane.b32.xlu1 %v1494_v6, %s5217_s8 }
 0x16a   : > { %v791_v16 = vpop.permute.xlu0 %790  ;;  %v2064_v18 = vld [vmem:[#allocation4 + $0x50] sm:$0xff] }
 0x16b   : > { %v793_v17 = vpop.permute.xlu1 %792  ;;  %875 = vst.msk [vmem:[#allocation4 + $0x60] sm:$0xff] %vm862_vm3, %v791_v16  ;;  %5035 = vmatprep.mubr.msk.f32.mxu0 %vm2098_vm10, %v2064_v18 }
 0x16c   : > { %876 = vst.msk [vmem:[#allocation4 + $0x68] sm:$0xff] %vm862_vm3, %v793_v17  ;;  %1768 = vrot.lane.b32.xlu0 %v6109_v13, %s5218_s13 }
 0x16d   : > { %1770 = vrot.lane.b32.xlu1 %v6111_v15, %s5218_s13 }
 0x16e   : > { %v984_v20 = vpop.permute.xlu0 %983  ;;  %v2065_v22 = vld [vmem:[#allocation4 + $0x58] sm:$0xff] }
 0x16f   : > { %v986_v21 = vpop.permute.xlu1 %985  ;;  %1068 = vst.msk [vmem:[#allocation4 + $0x60] sm:$0xff] %vm1055_vm4, %v984_v20  ;;  %5036 = vmatmul.mubr.msk.f32.gmra.mxu0 %vm2098_vm10, %v2065_v22  ;;  %v6249_v20 = vld [vmem:[#allocation2 + $0x281] sm:$0xff] }
 0x170   : > { %1069 = vst.msk [vmem:[#allocation4 + $0x68] sm:$0xff] %vm1055_vm4, %v986_v21  ;;  %1961 = vrot.lane.b32.xlu0 %v6122_v19, %s5219_s16 }
 0x171   : > { %613 = vrot.lane.b32.xlu1 %v6041_v44, %s5212_s24 }
 0x172   : > { %v1177_v24 = vpop.permute.xlu0 %1176 }
 0x173   : > { %v1179_v25 = vpop.permute.xlu1 %1178  ;;  %1261 = vst.msk [vmem:[#allocation4 + $0x60] sm:$0xff] %vm1248_vm5, %v1177_v24 }
 0x174   : > { %1262 = vst.msk [vmem:[#allocation4 + $0x68] sm:$0xff] %vm1248_vm5, %v1179_v25  ;;  %1963 = vrot.lane.b32.xlu0 %v6131_v23, %s5219_s16 }
 0x175   : > { %615 = vrot.lane.b32.xlu1 %v6043_v45, %s5212_s24 }
 0x176   : > { %v1370_v26 = vpop.permute.xlu0 %1369 }
 0x177   : > { %v1372_v46 = vpop.permute.xlu1 %1371  ;;  %1454 = vst.msk [vmem:[#allocation4 + $0x60] sm:$0xff] %vm1441_vm6, %v1370_v26 }
 0x178   : > { %1455 = vst.msk [vmem:[#allocation4 + $0x68] sm:$0xff] %vm1441_vm6, %v1372_v46  ;;  %806 = vrot.lane.b32.xlu0 %v6054_v51, %s5213_s25  ;;  %v6259_v46 = vld [vmem:[#allocation2 + $0x289] sm:$0xff] }
 0x179   : > { %808 = vrot.lane.b32.xlu1 %v6063_v53, %s5213_s25 }
 0x17a   : > { %v1564_v47 = vpop.permute.xlu0 %1563 }
 0x17b   : > { %v1566_v27 = vpop.permute.xlu1 %1565  ;;  %1648 = vst.msk [vmem:[#allocation4 + $0x60] sm:$0xff] %vm1635_vm7, %v1564_v47 }
 0x17c   : > { %1649 = vst.msk [vmem:[#allocation4 + $0x68] sm:$0xff] %vm1635_vm7, %v1566_v27  ;;  %999 = vrot.lane.b32.xlu0 %v1493_v5, %s5214_s26 }
 0x17d   : > { %1001 = vrot.lane.b32.xlu1 %v1494_v6, %s5214_s26 }
 0x17e   : > { %v1757_v28 = vpop.permute.xlu0 %1756 }
 0x17f   : > { %v1759_v29 = vpop.permute.xlu1 %1758  ;;  %1841 = vst.msk [vmem:[#allocation4 + $0x60] sm:$0xff] %vm1828_vm8, %v1757_v28 }
 0x180   : > { %1842 = vst.msk [vmem:[#allocation4 + $0x68] sm:$0xff] %vm1828_vm8, %v1759_v29  ;;  %1192 = vrot.lane.b32.xlu0 %v6109_v13, %s5215_s27 }
 0x181   : > { %1194 = vrot.lane.b32.xlu1 %v6111_v15, %s5215_s27 }
 0x182   : > { %v1950_v32 = vpop.permute.xlu0 %1949 }
 0x183   : > { %v602_v1 = vpop.permute.xlu1 %601  ;;  %2034 = vst.msk [vmem:[#allocation4 + $0x60] sm:$0xff] %vm2021_vm9, %v1950_v32 }
 0x184   : > { %684 = vst.msk [vmem:[#allocation4 + $0x70] sm:$0xff] %vm669_vm2, %v602_v1  ;;  %1385 = vrot.lane.b32.xlu0 %v6122_v19, %s5216_s28 }
 0x185   : > { %1387 = vrot.lane.b32.xlu1 %v6131_v23, %s5216_s28 }
 0x186   : > { %v1952_v36 = vpop.permute.xlu0 %1951 }
 0x187   : > { %v604_v0 = vpop.permute.xlu1 %603  ;;  %2035 = vst.msk [vmem:[#allocation4 + $0x68] sm:$0xff] %vm2021_vm9, %v1952_v36 }
 0x188   : > { %685 = vst.msk [vmem:[#allocation4 + $0x78] sm:$0xff] %vm669_vm2, %v604_v0  ;;  %1579 = vrot.lane.b32.xlu0 %v5846_v33, %s5217_s8 }
 0x189   : > { %1581 = vrot.lane.b32.xlu1 %v5855_v35, %s5217_s8 }
 0x18a   : > { %v795_v44 = vpop.permute.xlu0 %794  ;;  %v2066_v48 = vld [vmem:[#allocation4 + $0x60] sm:$0xff] }
 0x18b   : > { %v797_v45 = vpop.permute.xlu1 %796  ;;  %877 = vst.msk [vmem:[#allocation4 + $0x70] sm:$0xff] %vm862_vm3, %v795_v44  ;;  %5038 = vmatprep.mubr.msk.f32.mxu0 %vm2098_vm10, %v2066_v48 }
 0x18c   : > { %878 = vst.msk [vmem:[#allocation4 + $0x78] sm:$0xff] %vm862_vm3, %v797_v45  ;;  %1772 = vrot.lane.b32.xlu0 %v6173_v38, %s5218_s13 }
 0x18d   : > { %1774 = vrot.lane.b32.xlu1 %v6175_v40, %s5218_s13 }
 0x18e   : > { %v988_v51 = vpop.permute.xlu0 %987  ;;  %v2067_v39 = vld [vmem:[#allocation4 + $0x68] sm:$0xff] }
 0x18f   : > { %v990_v52 = vpop.permute.xlu1 %989  ;;  %1070 = vst.msk [vmem:[#allocation4 + $0x70] sm:$0xff] %vm1055_vm4, %v988_v51  ;;  %v5022_v42 = vpop.f32.mrf.mxu0  ;;  %5039 = vmatmul.mubr.msk.f32.gmra.mxu0 %vm2098_vm10, %v2067_v39 }
 0x190   : > { %1071 = vst.msk [vmem:[#allocation4 + $0x78] sm:$0xff] %vm1055_vm4, %v990_v52  ;;  %v2271_v53 = vadd.f32 %v5022_v42, %v6187_v49  ;;  %1965 = vrot.lane.b32.xlu0 %v6189_v50, %s5219_s16  ;;  %v6300_v42 = vld [vmem:[#allocation2 + $0x2b8] sm:$0xff] }
 0x191   : > { %617 = vrot.lane.b32.xlu1 %v6109_v13, %s5212_s24  ;;  %v2265_v56 = vpop.f32.mrf.mxu0 }
 0x192   : > { %vm2425_vm11 = vcmp.ge.f32.partialorder %v2271_v53, 0.0  ;;  %v2457_v58 = vmul.f32 0.2, %v2271_v53  ;;  %v2266_v59 = vadd.f32 %v6187_v49, %v2265_v56  ;;  %v1181_v60 = vpop.permute.xlu0 %1180 }
 0x193   : > { %v1183_v61 = vpop.permute.xlu1 %1182  ;;  %1263 = vst.msk [vmem:[#allocation4 + $0x70] sm:$0xff] %vm1248_vm5, %v1181_v60 }
 0x194   : > { %1264 = vst.msk [vmem:[#allocation4 + $0x78] sm:$0xff] %vm1248_vm5, %v1183_v61  ;;  %v2489_v62 = vsel %vm2425_vm11, %v2271_v53, %v2457_v58  ;;  %vm2424_vm12 = vcmp.ge.f32.partialorder %v2266_v59, 0.0  ;;  %v2456_v63 = vmul.f32 0.2, %v2266_v59  ;;  %1967 = vrot.lane.b32.xlu0 %v6199_v57, %s5219_s16  ;;  %v6309_v53 = vld [vmem:[#allocation2 + $0x2b1] sm:$0xff] }
 0x195   : > { %619 = vrot.lane.b32.xlu1 %v6111_v15, %s5212_s24  ;;  %2522 = vst [vmem:[#allocation3 + $0x48] sm:$0xff] %v2489_v62  ;;  %v6238_v15 = vld [vmem:[#allocation2 + $0x280] sm:$0xff] }
 0x196   : > { %v2488_v2 = vsel %vm2424_vm12, %v2266_v59, %v2456_v63  ;;  %v1374_v3 = vpop.permute.xlu0 %1373 }
 0x197   : > { %v1376_v4 = vpop.permute.xlu1 %1375  ;;  %2521 = vst [vmem:[#allocation3 + $0x40] sm:$0xff] %v2488_v2  ;;  %1456 = vst.msk [vmem:[#allocation4 + $0x70] sm:$0xff] %vm1441_vm6, %v1374_v3  ;;  %3643 = vmatprep.mubr.f32.mxu1 %v2488_v2 }
 0x198   : > { %1457 = vst.msk [vmem:[#allocation4 + $0x78] sm:$0xff] %vm1441_vm6, %v1376_v4  ;;  %810 = vrot.lane.b32.xlu0 %v6122_v19, %s5213_s25  ;;  %v6240_v19 = vld [vmem:[#allocation2 + $0x288] sm:$0xff] }
 0x199   : > { %812 = vrot.lane.b32.xlu1 %v6131_v23, %s5213_s25 }
 0x19a   : > { %v1568_v54 = vpop.permute.xlu0 %1567 }
 0x19b   : > { %v1570_v55 = vpop.permute.xlu1 %1569  ;;  %1650 = vst.msk [vmem:[#allocation4 + $0x70] sm:$0xff] %vm1635_vm7, %v1568_v54 }
 0x19c   : > { %1651 = vst.msk [vmem:[#allocation4 + $0x78] sm:$0xff] %vm1635_vm7, %v1570_v55  ;;  %1003 = vrot.lane.b32.xlu0 %v5846_v33, %s5214_s26 }
 0x19d   : > { %1005 = vrot.lane.b32.xlu1 %v5855_v35, %s5214_s26 }
 0x19e   : > { %v1761_v5 = vpop.permute.xlu0 %1760  ;;  %v2555_v7 = vld [vmem:[#allocation3 + $0x3f] sm:$0xff]  ;;  %v2556_v9 = vld [vmem:[#allocation3 + $0x47] sm:$0xff] }
 0x19f   : > { %v1763_v6 = vpop.permute.xlu1 %1762  ;;  %1843 = vst.msk [vmem:[#allocation4 + $0x70] sm:$0xff] %vm1828_vm8, %v1761_v5  ;;  %3644 = vmatmul.mubr.f32.gmra.mxu1 %v2555_v7 }
 0x1a0   : > { %1844 = vst.msk [vmem:[#allocation4 + $0x78] sm:$0xff] %vm1828_vm8, %v1763_v6  ;;  %1196 = vrot.lane.b32.xlu0 %v6173_v38, %s5215_s27  ;;  %3648 = vmatprep.mubr.f32.mxu1 %v2489_v62  ;;  %v6319_v62 = vld [vmem:[#allocation2 + $0x2b9] sm:$0xff] }
 0x1a1   : > { %1198 = vrot.lane.b32.xlu1 %v6175_v40, %s5215_s27 }
 0x1a2   : > { %v1954_v8 = vpop.permute.xlu0 %1953 }
 0x1a3   : > { %v606_v33 = vpop.permute.xlu1 %605  ;;  %2036 = vst.msk [vmem:[#allocation4 + $0x70] sm:$0xff] %vm2021_vm9, %v1954_v8  ;;  %3649 = vmatmul.mubr.f32.gmra.mxu1 %v2556_v9 }
 0x1a4   : > { %686 = vst.msk [vmem:[#allocation4 + $0x80] sm:$0xff] %vm669_vm2, %v606_v33  ;;  %1389 = vrot.lane.b32.xlu0 %v6189_v50, %s5216_s28 }
 0x1a5   : > { %1391 = vrot.lane.b32.xlu1 %v6199_v57, %s5216_s28 }
 0x1a6   : > { %v1956_v35 = vpop.permute.xlu0 %1955 }
 0x1a7   : > { %v608_v13 = vpop.permute.xlu1 %607  ;;  %2037 = vst.msk [vmem:[#allocation4 + $0x78] sm:$0xff] %vm2021_vm9, %v1956_v35 }
 0x1a8   : > { %687 = vst.msk [vmem:[#allocation4 + $0x88] sm:$0xff] %vm669_vm2, %v608_v13  ;;  %1583 = vrot.lane.b32.xlu0 %v5962_v12, %s5217_s8 }
 0x1a9   : > { %1585 = vrot.lane.b32.xlu1 %v5968_v14, %s5217_s8 }
 0x1aa   : > { %v799_v16 = vpop.permute.xlu0 %798  ;;  %v2068_v18 = vld [vmem:[#allocation4 + $0x70] sm:$0xff] }
 0x1ab   : > { %v801_v17 = vpop.permute.xlu1 %800  ;;  %879 = vst.msk [vmem:[#allocation4 + $0x80] sm:$0xff] %vm862_vm3, %v799_v16  ;;  %5041 = vmatprep.mubr.msk.f32.mxu0 %vm2098_vm10, %v2068_v18 }
 0x1ac   : > { %880 = vst.msk [vmem:[#allocation4 + $0x88] sm:$0xff] %vm862_vm3, %v801_v17  ;;  %1776 = vrot.lane.b32.xlu0 %v6238_v15, %s5218_s13 }
 0x1ad   : > { %1778 = vrot.lane.b32.xlu1 %v6240_v19, %s5218_s13 }
 0x1ae   : > { %v992_v21 = vpop.permute.xlu0 %991  ;;  %v2069_v23 = vld [vmem:[#allocation4 + $0x78] sm:$0xff] }
 0x1af   : > { %v994_v22 = vpop.permute.xlu1 %993  ;;  %1072 = vst.msk [vmem:[#allocation4 + $0x80] sm:$0xff] %vm1055_vm4, %v992_v21  ;;  %v5025_v24 = vpop.f32.mrf.mxu0  ;;  %5042 = vmatmul.mubr.msk.f32.gmra.mxu0 %vm2098_vm10, %v2069_v23 }
 0x1b0   : > { %1073 = vst.msk [vmem:[#allocation4 + $0x88] sm:$0xff] %vm1055_vm4, %v994_v22  ;;  %v2281_v25 = vadd.f32 %v5025_v24, %v6187_v49  ;;  %1969 = vrot.lane.b32.xlu0 %v6249_v20, %s5219_s16  ;;  %v6362_v24 = vld [vmem:[#allocation2 + $0x2e8] sm:$0xff] }
 0x1b1   : > { %621 = vrot.lane.b32.xlu1 %v6173_v38, %s5212_s24  ;;  %v2275_v26 = vpop.f32.mrf.mxu0 }
 0x1b2   : > { %vm2427_vm13 = vcmp.ge.f32.partialorder %v2281_v25, 0.0  ;;  %v2459_v47 = vmul.f32 0.2, %v2281_v25  ;;  %v2276_v27 = vadd.f32 %v6187_v49, %v2275_v26  ;;  %v1185_v28 = vpop.permute.xlu0 %1184  ;;  %v6373_v26 = vld [vmem:[#allocation2 + $0x2e1] sm:$0xff] }
 0x1b3   : > { %v1187_v29 = vpop.permute.xlu1 %1186  ;;  %1265 = vst.msk [vmem:[#allocation4 + $0x80] sm:$0xff] %vm1248_vm5, %v1185_v28 }
 0x1b4   : > { %1266 = vst.msk [vmem:[#allocation4 + $0x88] sm:$0xff] %vm1248_vm5, %v1187_v29  ;;  %v2491_v30 = vsel %vm2427_vm13, %v2281_v25, %v2459_v47  ;;  %vm2426_vm14 = vcmp.ge.f32.partialorder %v2276_v27, 0.0  ;;  %v2458_v31 = vmul.f32 0.2, %v2276_v27  ;;  %1971 = vrot.lane.b32.xlu0 %v6259_v46, %s5219_s16 }
 0x1b5   : > { %2524 = vst [vmem:[#allocation3 + $0x78] sm:$0xff] %v2491_v30  ;;  %623 = vrot.lane.b32.xlu1 %v6175_v40, %s5212_s24 }
 0x1b6   : > { %v2490_v32 = vsel %vm2426_vm14, %v2276_v27, %v2458_v31  ;;  %v1378_v1 = vpop.permute.xlu0 %1377  ;;  %v3465_v31 = vld [vmem:[%s7798_s3 + $0x178] sm:$0xff] }
 0x1b7   : > { %v1380_v34 = vpop.permute.xlu1 %1379  ;;  %2523 = vst [vmem:[#allocation3 + $0x70] sm:$0xff] %v2490_v32  ;;  %1458 = vst.msk [vmem:[#allocation4 + $0x80] sm:$0xff] %vm1441_vm6, %v1378_v1  ;;  %3653 = vmatprep.mubr.f32.mxu1 %v2490_v32  ;;  %v6386_v1 = vld [vmem:[#allocation2 + $0x2e9] sm:$0xff]  ;;  %3795 = vmatpush1.msra.mxu0 %v3465_v31 }
 0x1b8   : > { %1459 = vst.msk [vmem:[#allocation4 + $0x88] sm:$0xff] %vm1441_vm6, %v1380_v34  ;;  %814 = vrot.lane.b32.xlu0 %v6189_v50, %s5213_s25  ;;  %v6298_v50 = vld [vmem:[#allocation2 + $0x2b0] sm:$0xff] }
 0x1b9   : > { %816 = vrot.lane.b32.xlu1 %v6199_v57, %s5213_s25 }
 0x1ba   : > { %v1572_v36 = vpop.permute.xlu0 %1571 }
 0x1bb   : > { %v1574_v0 = vpop.permute.xlu1 %1573  ;;  %1652 = vst.msk [vmem:[#allocation4 + $0x80] sm:$0xff] %vm1635_vm7, %v1572_v36 }
 0x1bc   : > { %1653 = vst.msk [vmem:[#allocation4 + $0x88] sm:$0xff] %vm1635_vm7, %v1574_v0  ;;  %1007 = vrot.lane.b32.xlu0 %v5962_v12, %s5214_s26 }
 0x1bd   : > { %1009 = vrot.lane.b32.xlu1 %v5968_v14, %s5214_s26 }
 0x1be   : > { %v1765_v37 = vpop.permute.xlu0 %1764  ;;  %v2557_v40 = vld [vmem:[#allocation3 + $0x6f] sm:$0xff]  ;;  %v2558_v45 = vld [vmem:[#allocation3 + $0x77] sm:$0xff] }
 0x1bf   : > { %v1767_v38 = vpop.permute.xlu1 %1766  ;;  %1845 = vst.msk [vmem:[#allocation4 + $0x80] sm:$0xff] %vm1828_vm8, %v1765_v37  ;;  %3654 = vmatmul.mubr.f32.gmra.mxu1 %v2557_v40  ;;  %v3464_v40 = vld [vmem:[%s7798_s3 + $0x170] sm:$0xff] }
 0x1c0   : > { %1846 = vst.msk [vmem:[#allocation4 + $0x88] sm:$0xff] %vm1828_vm8, %v1767_v38  ;;  %1200 = vrot.lane.b32.xlu0 %v6238_v15, %s5215_s27  ;;  %3658 = vmatprep.mubr.f32.mxu1 %v2491_v30  ;;  %v6389_v38 = vld [vmem:[#allocation3] sm:$0xff] }
 0x1c1   : > { %1202 = vrot.lane.b32.xlu1 %v6240_v19, %s5215_s27  ;;  %3796 = vmatprep.subr.mxu0 %v6389_v38 }
 0x1c2   : > { %v1958_v44 = vpop.permute.xlu0 %1957  ;;  %3797 = vmatpush1.msra.mxu0 %v3464_v40  ;;  %v3478_v40 = vld [vmem:[%s7798_s3 + $0x1e0] sm:$0xff] }
 0x1c3   : > { %v610_v12 = vpop.permute.xlu1 %609  ;;  %2038 = vst.msk [vmem:[#allocation4 + $0x80] sm:$0xff] %vm2021_vm9, %v1958_v44  ;;  %3659 = vmatmul.mubr.f32.gmra.mxu1 %v2558_v45  ;;  %3798 = vmatprep.subr.mxu0 %v6389_v38  ;;  %v3463_v45 = vld [vmem:[%s7798_s3 + $0x168] sm:$0xff] }
 0x1c4   : > { %688 = vst.msk [vmem:[#allocation4 + $0x90] sm:$0xff] %vm669_vm2, %v610_v12  ;;  %1393 = vrot.lane.b32.xlu0 %v6249_v20, %s5216_s28  ;;  %3799 = vmatpush1.msra.mxu0 %v3463_v45 }
 0x1c5   : > { %1395 = vrot.lane.b32.xlu1 %v6259_v46, %s5216_s28  ;;  %3800 = vmatprep.subr.mxu0 %v6389_v38 }
 0x1c6   : > { %v1960_v14 = vpop.permute.xlu0 %1959 }
 0x1c7   : > { %v612_v48 = vpop.permute.xlu1 %611  ;;  %2039 = vst.msk [vmem:[#allocation4 + $0x88] sm:$0xff] %vm2021_vm9, %v1960_v14 }
 0x1c8   : > { %689 = vst.msk [vmem:[#allocation4 + $0x98] sm:$0xff] %vm669_vm2, %v612_v48  ;;  %1587 = vrot.lane.b32.xlu0 %v6033_v41, %s5217_s8 }
 0x1c9   : > { %1589 = vrot.lane.b32.xlu1 %v6037_v43, %s5217_s8 }
 0x1ca   : > { %v803_v51 = vpop.permute.xlu0 %802  ;;  %v2070_v39 = vld [vmem:[#allocation4 + $0x80] sm:$0xff] }
 0x1cb   : > { %v805_v52 = vpop.permute.xlu1 %804  ;;  %881 = vst.msk [vmem:[#allocation4 + $0x90] sm:$0xff] %vm862_vm3, %v803_v51  ;;  %5044 = vmatprep.mubr.msk.f32.mxu0 %vm2098_vm10, %v2070_v39  ;;  %v3462_v51 = vld [vmem:[%s7798_s3 + $0x160] sm:$0xff] }
 0x1cc   : > { %882 = vst.msk [vmem:[#allocation4 + $0x98] sm:$0xff] %vm862_vm3, %v805_v52  ;;  %1780 = vrot.lane.b32.xlu0 %v6298_v50, %s5218_s13  ;;  %3801 = vmatpush1.msra.mxu0 %v3462_v51  ;;  %v3461_v52 = vld [vmem:[%s7798_s3 + $0x158] sm:$0xff] }
 0x1cd   : > { %1782 = vrot.lane.b32.xlu1 %v6300_v42, %s5218_s13  ;;  %3802 = vmatprep.subr.mxu0 %v6389_v38  ;;  %v3473_v51 = vld [vmem:[%s7798_s3 + $0x1b8] sm:$0xff] }
 0x1ce   : > { %v996_v56 = vpop.permute.xlu0 %995  ;;  %v2071_v58 = vld [vmem:[#allocation4 + $0x88] sm:$0xff]  ;;  %3803 = vmatpush1.msra.mxu0 %v3461_v52 }
 0x1cf   : > { %v998_v57 = vpop.permute.xlu1 %997  ;;  %1074 = vst.msk [vmem:[#allocation4 + $0x90] sm:$0xff] %vm1055_vm4, %v996_v56  ;;  %v5028_v59 = vpop.f32.mrf.mxu0  ;;  %5045 = vmatmul.mubr.msk.f32.gmra.mxu0 %vm2098_vm10, %v2071_v58  ;;  %3804 = vmatprep.subr.mxu0 %v6389_v38  ;;  %v3460_v56 = vld [vmem:[%s7798_s3 + $0x150] sm:$0xff] }
 0x1d0   : > { %1075 = vst.msk [vmem:[#allocation4 + $0x98] sm:$0xff] %vm1055_vm4, %v998_v57  ;;  %v2291_v60 = vadd.f32 %v5028_v59, %v6187_v49  ;;  %1973 = vrot.lane.b32.xlu0 %v6309_v53, %s5219_s16  ;;  %3805 = vmatpush1.msra.mxu0 %v3460_v56 }
 0x1d1   : > { %625 = vrot.lane.b32.xlu1 %v6238_v15, %s5212_s24  ;;  %v2285_v61 = vpop.f32.mrf.mxu0  ;;  %3806 = vmatprep.subr.mxu0 %v6389_v38 }
 0x1d2   : > { %vm2429_vm15 = vcmp.ge.f32.partialorder %v2291_v60, 0.0  ;;  %v2461_v63 = vmul.f32 0.2, %v2291_v60  ;;  %v2286_v2 = vadd.f32 %v6187_v49, %v2285_v61  ;;  %v1189_v3 = vpop.permute.xlu0 %1188 }
 0x1d3   : > { %v1191_v4 = vpop.permute.xlu1 %1190  ;;  %1267 = vst.msk [vmem:[#allocation4 + $0x90] sm:$0xff] %vm1248_vm5, %v1189_v3  ;;  %v6460_v3 = vld [vmem:[#allocation2 + $0x30f] sm:$0xff] }
 0x1d4   : > { %1268 = vst.msk [vmem:[#allocation4 + $0x98] sm:$0xff] %vm1248_vm5, %v1191_v4  ;;  %v2493_v54 = vsel %vm2429_vm15, %v2291_v60, %v2461_v63  ;;  %vm2428_vm0 = vcmp.ge.f32.partialorder %v2286_v2, 0.0  ;;  %v2460_v55 = vmul.f32 0.2, %v2286_v2  ;;  %1975 = vrot.lane.b32.xlu0 %v6319_v62, %s5219_s16  ;;  %v3458_v60 = vld [vmem:[%s7798_s3 + $0x140] sm:$0xff]  ;;  %v3456_v63 = vld [vmem:[%s7798_s3 + $0x130] sm:$0xff] }
 0x1d5   : > { %2526 = vst [vmem:[#allocation3 + $0xa8] sm:$0xff] %v2493_v54  ;;  %627 = vrot.lane.b32.xlu1 %v6240_v19, %s5212_s24  ;;  %v6360_v19 = vld [vmem:[#allocation2 + $0x2e0] sm:$0xff] }
 0x1d6   : > { %v2492_v5 = vsel %vm2428_vm0, %v2286_v2, %v2460_v55  ;;  %v1382_v6 = vpop.permute.xlu0 %1381  ;;  %v3455_v2 = vld [vmem:[%s7798_s3 + $0x128] sm:$0xff]  ;;  %v6463_v55 = vld [vmem:[#allocation2 + $0x317] sm:$0xff] }
 0x1d7   : > { %v1384_v7 = vpop.permute.xlu1 %1383  ;;  %2525 = vst [vmem:[#allocation3 + $0xa0] sm:$0xff] %v2492_v5  ;;  %1460 = vst.msk [vmem:[#allocation4 + $0x90] sm:$0xff] %vm1441_vm6, %v1382_v6  ;;  %3663 = vmatprep.mubr.f32.mxu1 %v2492_v5  ;;  %v3454_v5 = vld [vmem:[%s7798_s3 + $0x120] sm:$0xff]  ;;  %v3453_v6 = vld [vmem:[%s7798_s3 + $0x118] sm:$0xff] }
 0x1d8   : > { %1461 = vst.msk [vmem:[#allocation4 + $0x98] sm:$0xff] %vm1441_vm6, %v1384_v7  ;;  %818 = vrot.lane.b32.xlu0 %v6249_v20, %s5213_s25  ;;  %v6478_v7 = vld [vmem:[#allocation2 + $0x310] sm:$0xff] }
 0x1d9   : > { %820 = vrot.lane.b32.xlu1 %v6259_v46, %s5213_s25 }
 0x1da   : > { %v1576_v8 = vpop.permute.xlu0 %1575 }
 0x1db   : > { %v1578_v33 = vpop.permute.xlu1 %1577  ;;  %1654 = vst.msk [vmem:[#allocation4 + $0x90] sm:$0xff] %vm1635_vm7, %v1576_v8 }
 0x1dc   : > { %1655 = vst.msk [vmem:[#allocation4 + $0x98] sm:$0xff] %vm1635_vm7, %v1578_v33  ;;  %1011 = vrot.lane.b32.xlu0 %v6033_v41, %s5214_s26 }
 0x1dd   : > { %1013 = vrot.lane.b32.xlu1 %v6037_v43, %s5214_s26 }
 0x1de   : > { %v1769_v9 = vpop.permute.xlu0 %1768  ;;  %v2559_v13 = vld [vmem:[#allocation3 + $0x9f] sm:$0xff]  ;;  %v2560_v16 = vld [vmem:[#allocation3 + $0xa7] sm:$0xff] }
 0x1df   : > { %v1771_v35 = vpop.permute.xlu1 %1770  ;;  %1847 = vst.msk [vmem:[#allocation4 + $0x90] sm:$0xff] %vm1828_vm8, %v1769_v9  ;;  %3664 = vmatmul.mubr.f32.gmra.mxu1 %v2559_v13  ;;  %v3452_v13 = vld [vmem:[%s7798_s3 + $0x110] sm:$0xff] }
 0x1e0   : > { %1848 = vst.msk [vmem:[#allocation4 + $0x98] sm:$0xff] %vm1828_vm8, %v1771_v35  ;;  %1204 = vrot.lane.b32.xlu0 %v6298_v50, %s5215_s27  ;;  %3668 = vmatprep.mubr.f32.mxu1 %v2493_v54  ;;  %v6354_v18 = vpop.f32.mrf.mxu1  ;;  %v6481_v35 = vld [vmem:[#allocation2 + $0x318] sm:$0xff] }
 0x1e1   : > { %1206 = vrot.lane.b32.xlu1 %v6300_v42, %s5215_s27 }
 0x1e2   : > { %v1962_v15 = vpop.permute.xlu0 %1961  ;;  %v3637_v20 = vpop.f32.mrf.mxu1 }
 0x1e3   : > { %v614_v41 = vpop.permute.xlu1 %613  ;;  %2040 = vst.msk [vmem:[#allocation4 + $0x90] sm:$0xff] %vm2021_vm9, %v1962_v15  ;;  %3669 = vmatmul.mubr.f32.gmra.mxu1 %v2560_v16  ;;  %v3451_v15 = vld [vmem:[%s7798_s3 + $0x108] sm:$0xff]  ;;  %v6500_v20 = vld [vmem:[#allocation2 + $0x319] sm:$0xff] }
 0x1e4   : > { %690 = vst.msk [vmem:[#allocation4 + $0xa0] sm:$0xff] %vm669_vm2, %v614_v41  ;;  %1397 = vrot.lane.b32.xlu0 %v6309_v53, %s5216_s28  ;;  %v6367_v25 = vpop.f32.mrf.mxu1  ;;  %v6497_v41 = vld [vmem:[#allocation2 + $0x311] sm:$0xff] }
 0x1e5   : > { %1399 = vrot.lane.b32.xlu1 %v6319_v62, %s5216_s28 }
 0x1e6   : > { %v1964_v43 = vpop.permute.xlu0 %1963  ;;  %v3642_v46 = vpop.f32.mrf.mxu1 }
 0x1e7   : > { %v616_v17 = vpop.permute.xlu1 %615  ;;  %2041 = vst.msk [vmem:[#allocation4 + $0x98] sm:$0xff] %vm2021_vm9, %v1964_v43  ;;  %v3481_v46 = vld [vmem:[%s7798_s3 + $0x1f8] sm:$0xff] }
 0x1e8   : > { %691 = vst.msk [vmem:[#allocation4 + $0xa8] sm:$0xff] %vm669_vm2, %v616_v17  ;;  %1591 = vrot.lane.b32.xlu0 %v6101_v10, %s5217_s8 }
 0x1e9   : > { %1593 = vrot.lane.b32.xlu1 %v6105_v11, %s5217_s8 }
 0x1ea   : > { %v807_v21 = vpop.permute.xlu0 %806  ;;  %v2072_v23 = vld [vmem:[#allocation4 + $0x90] sm:$0xff] }
 0x1eb   : > { %v809_v22 = vpop.permute.xlu1 %808  ;;  %883 = vst.msk [vmem:[#allocation4 + $0xa0] sm:$0xff] %vm862_vm3, %v807_v21  ;;  %5047 = vmatprep.mubr.msk.f32.mxu0 %vm2098_vm10, %v2072_v23  ;;  %v3450_v21 = vld [vmem:[%s7798_s3 + $0x100] sm:$0xff] }
 0x1ec   : > { %884 = vst.msk [vmem:[#allocation4 + $0xa8] sm:$0xff] %vm862_vm3, %v809_v22  ;;  %1784 = vrot.lane.b32.xlu0 %v6360_v19, %s5218_s13 }
 0x1ed   : > { %1786 = vrot.lane.b32.xlu1 %v6362_v24, %s5218_s13 }
 0x1ee   : > { %v1000_v47 = vpop.permute.xlu0 %999  ;;  %v2073_v28 = vld [vmem:[#allocation4 + $0x98] sm:$0xff] }
 0x1ef   : > { %v1002_v27 = vpop.permute.xlu1 %1001  ;;  %1076 = vst.msk [vmem:[#allocation4 + $0xa0] sm:$0xff] %vm1055_vm4, %v1000_v47  ;;  %v5031_v29 = vpop.f32.mrf.mxu0  ;;  %5048 = vmatmul.mubr.msk.f32.gmra.mxu0 %vm2098_vm10, %v2073_v28 }
 0x1f0   : > { %1077 = vst.msk [vmem:[#allocation4 + $0xa8] sm:$0xff] %vm1055_vm4, %v1002_v27  ;;  %v2301_v30 = vadd.f32 %v5031_v29, %v6187_v49  ;;  %1977 = vrot.lane.b32.xlu0 %v6373_v26, %s5219_s16 }
 0x1f1   : > { %629 = vrot.lane.b32.xlu1 %v6298_v50, %s5212_s24  ;;  %v2295_v32 = vpop.f32.mrf.mxu0 }
 0x1f2   : > { %vm2431_vm1 = vcmp.ge.f32.partialorder %v2301_v30, 0.0  ;;  %v2463_v34 = vmul.f32 0.2, %v2301_v30  ;;  %v2296_v36 = vadd.f32 %v6187_v49, %v2295_v32  ;;  %v1193_v0 = vpop.permute.xlu0 %1192 }
 0x1f3   : > { %v1195_v37 = vpop.permute.xlu1 %1194  ;;  %1269 = vst.msk [vmem:[#allocation4 + $0xa0] sm:$0xff] %vm1248_vm5, %v1193_v0 }
 0x1f4   : > { %1270 = vst.msk [vmem:[#allocation4 + $0xa8] sm:$0xff] %vm1248_vm5, %v1195_v37  ;;  %v2495_v44 = vsel %vm2431_vm1, %v2301_v30, %v2463_v34  ;;  %vm2430_vm11 = vcmp.ge.f32.partialorder %v2296_v36, 0.0  ;;  %v2462_v12 = vmul.f32 0.2, %v2296_v36  ;;  %1979 = vrot.lane.b32.xlu0 %v6386_v1, %s5219_s16  ;;  %v3480_v30 = vld [vmem:[%s7798_s3 + $0x1f0] sm:$0xff] }
 0x1f5   : > { %2528 = vst [vmem:[#allocation3 + $0xd8] sm:$0xff] %v2495_v44  ;;  %631 = vrot.lane.b32.xlu1 %v6300_v42, %s5212_s24 }
 0x1f6   : > { %v2494_v14 = vsel %vm2430_vm11, %v2296_v36, %v2462_v12  ;;  %v1386_v48 = vpop.permute.xlu0 %1385  ;;  %v3479_v36 = vld [vmem:[%s7798_s3 + $0x1e8] sm:$0xff]  ;;  %v3476_v12 = vld [vmem:[%s7798_s3 + $0x1d0] sm:$0xff] }
 0x1f7   : > { %v1388_v50 = vpop.permute.xlu1 %1387  ;;  %2527 = vst [vmem:[#allocation3 + $0xd0] sm:$0xff] %v2494_v14  ;;  %1462 = vst.msk [vmem:[#allocation4 + $0xa0] sm:$0xff] %vm1441_vm6, %v1386_v48  ;;  %3673 = vmatprep.mubr.f32.mxu1 %v2494_v14  ;;  %v3474_v48 = vld [vmem:[%s7798_s3 + $0x1c0] sm:$0xff] }
 0x1f8   : > { %1463 = vst.msk [vmem:[#allocation4 + $0xa8] sm:$0xff] %vm1441_vm6, %v1388_v50  ;;  %822 = vrot.lane.b32.xlu0 %v6309_v53, %s5213_s25  ;;  %v3459_v53 = vld [vmem:[%s7798_s3 + $0x148] sm:$0xff] }
 0x1f9   : > { %824 = vrot.lane.b32.xlu1 %v6319_v62, %s5213_s25  ;;  %3807 = vmatpush1.msra.mxu0 %v3459_v53  ;;  %v3471_v53 = vld [vmem:[%s7798_s3 + $0x1a8] sm:$0xff] }
 0x1fa   : > { %v1580_v39 = vpop.permute.xlu0 %1579  ;;  %3808 = vmatprep.subr.mxu0 %v6389_v38 }
 0x1fb   : > { %v1582_v42 = vpop.permute.xlu1 %1581  ;;  %1656 = vst.msk [vmem:[#allocation4 + $0xa0] sm:$0xff] %vm1635_vm7, %v1580_v39  ;;  %3809 = vmatpush1.msra.mxu0 %v3458_v60  ;;  %v3470_v60 = vld [vmem:[%s7798_s3 + $0x1a0] sm:$0xff] }
 0x1fc   : > { %1657 = vst.msk [vmem:[#allocation4 + $0xa8] sm:$0xff] %vm1635_vm7, %v1582_v42  ;;  %1015 = vrot.lane.b32.xlu0 %v6101_v10, %s5214_s26  ;;  %v3457_v10 = vld [vmem:[%s7798_s3 + $0x138] sm:$0xff]  ;;  %3810 = vmatprep.subr.mxu0 %v6389_v38  ;;  %v3472_v42 = vld [vmem:[%s7798_s3 + $0x1b0] sm:$0xff] }
 0x1fd   : > { %1017 = vrot.lane.b32.xlu1 %v6105_v11, %s5214_s26  ;;  %3811 = vmatpush1.msra.mxu0 %v3457_v10 }
 0x1fe   : > { %v1773_v57 = vpop.permute.xlu0 %1772  ;;  %v2561_v59 = vld [vmem:[#allocation3 + $0xcf] sm:$0xff]  ;;  %v2562_v62 = vld [vmem:[#allocation3 + $0xd7] sm:$0xff]  ;;  %3812 = vmatprep.subr.mxu0 %v6389_v38 }
 0x1ff   : > { %v1775_v58 = vpop.permute.xlu1 %1774  ;;  %1849 = vst.msk [vmem:[#allocation4 + $0xa0] sm:$0xff] %vm1828_vm8, %v1773_v57  ;;  %3674 = vmatmul.mubr.f32.gmra.mxu1 %v2561_v59  ;;  %3813 = vmatpush1.msra.mxu0 %v3456_v63  ;;  %v1505_v57 = vld [vmem:[#allocation2 + $0x33f] sm:$0xff]  ;;  %v1506_v59 = vld [vmem:[#allocation2 + $0x347] sm:$0xff] }
 0x200   : > { %1850 = vst.msk [vmem:[#allocation4 + $0xa8] sm:$0xff] %vm1828_vm8, %v1775_v58  ;;  %1208 = vrot.lane.b32.xlu0 %v6360_v19, %s5215_s27  ;;  %3678 = vmatprep.mubr.f32.mxu1 %v2495_v44 }
 0x201   : > { %1210 = vrot.lane.b32.xlu1 %v6362_v24, %s5215_s27  ;;  %3814 = vmatprep.subr.mxu0 %v6389_v38 }
 0x202   : > { %v1966_v11 = vpop.permute.xlu0 %1965  ;;  %3815 = vmatpush1.msra.mxu0 %v3455_v2  ;;  %v1699_v2 = vld [vmem:[#allocation2 + $0x348] sm:$0xff] }
 0x203   : > { %v618_v61 = vpop.permute.xlu1 %617  ;;  %2042 = vst.msk [vmem:[#allocation4 + $0xa0] sm:$0xff] %vm2021_vm9, %v1966_v11  ;;  %3679 = vmatmul.mubr.f32.gmra.mxu1 %v2562_v62  ;;  %3816 = vmatprep.subr.mxu0 %v6389_v38  ;;  %v3469_v11 = vld [vmem:[%s7798_s3 + $0x198] sm:$0xff] }
 0x204   : > { %692 = vst.msk [vmem:[#allocation4 + $0xb0] sm:$0xff] %vm669_vm2, %v618_v61  ;;  %1401 = vrot.lane.b32.xlu0 %v6373_v26, %s5216_s28  ;;  %3817 = vmatpush1.msra.mxu0 %v3454_v5  ;;  %v1698_v61 = vld [vmem:[#allocation2 + $0x340] sm:$0xff] }
 0x205   : > { %1403 = vrot.lane.b32.xlu1 %v6386_v1, %s5216_s28  ;;  %3818 = vmatprep.subr.mxu0 %v6389_v38 }
 0x206   : > { %v1968_v4 = vpop.permute.xlu0 %1967  ;;  %3819 = vmatpush1.msra.mxu0 %v3453_v6 }
 0x207   : > { %v620_v54 = vpop.permute.xlu1 %619  ;;  %2043 = vst.msk [vmem:[#allocation4 + $0xa8] sm:$0xff] %vm2021_vm9, %v1968_v4  ;;  %3820 = vmatprep.subr.mxu0 %v6389_v38 }
 0x208   : > { %693 = vst.msk [vmem:[#allocation4 + $0xb8] sm:$0xff] %vm669_vm2, %v620_v54  ;;  %1595 = vrot.lane.b32.xlu0 %v6460_v3, %s5217_s8  ;;  %3821 = vmatpush1.msra.mxu0 %v3452_v13  ;;  %v1891_v54 = vld [vmem:[#allocation2 + $0x341] sm:$0xff] }
 0x209   : > { %1597 = vrot.lane.b32.xlu1 %v6463_v55, %s5217_s8  ;;  %3822 = vmatprep.subr.mxu0 %v6389_v38 }
 0x20a   : > { %v811_v8 = vpop.permute.xlu0 %810  ;;  %v2074_v9 = vld [vmem:[#allocation4 + $0xa0] sm:$0xff]  ;;  %3823 = vmatpush1.msra.mxu0 %v3451_v15 }
 0x20b   : > { %v813_v33 = vpop.permute.xlu1 %812  ;;  %885 = vst.msk [vmem:[#allocation4 + $0xb0] sm:$0xff] %vm862_vm3, %v811_v8  ;;  %5050 = vmatprep.mubr.msk.f32.mxu0 %vm2098_vm10, %v2074_v9  ;;  %3824 = vmatprep.subr.mxu0 %v6389_v38  ;;  %v3466_v9 = vld [vmem:[%s7798_s3 + $0x180] sm:$0xff] }
 0x20c   : > { %886 = vst.msk [vmem:[#allocation4 + $0xb8] sm:$0xff] %vm862_vm3, %v813_v33  ;;  %1788 = vrot.lane.b32.xlu0 %v6478_v7, %s5218_s13  ;;  %3825 = vmatpush1.msra.mxu0 %v3450_v21 }
 0x20d   : > { %1790 = vrot.lane.b32.xlu1 %v6481_v35, %s5218_s13  ;;  %3826 = vmatprep.subr.mxu0 %v6389_v38 }
 0x20e   : > { %v1004_v16 = vpop.permute.xlu0 %1003  ;;  %v2075_v17 = vld [vmem:[#allocation4 + $0xa8] sm:$0xff]  ;;  %3827 = vmatpush2.msra.mxu0 %v3481_v46 }
 0x20f   : > { %v1006_v43 = vpop.permute.xlu1 %1005  ;;  %1078 = vst.msk [vmem:[#allocation4 + $0xb0] sm:$0xff] %vm1055_vm4, %v1004_v16  ;;  %v5034_v22 = vpop.f32.mrf.mxu0  ;;  %5051 = vmatmul.mubr.msk.f32.gmra.mxu0 %vm2098_vm10, %v2075_v17  ;;  %3828 = vmatprep.subr.mxu0 %v6389_v38 }
 0x210   : > { %1079 = vst.msk [vmem:[#allocation4 + $0xb8] sm:$0xff] %vm1055_vm4, %v1006_v43  ;;  %v2311_v23 = vadd.f32 %v5034_v22, %v6187_v49  ;;  %1981 = vrot.lane.b32.xlu0 %v6497_v41, %s5219_s16  ;;  %3829 = vmatpush2.msra.mxu0 %v3480_v30 }
 0x211   : > { %1983 = vrot.lane.b32.xlu1 %v6500_v20, %s5219_s16  ;;  %v2305_v47 = vpop.f32.mrf.mxu0  ;;  %3830 = vmatprep.subr.mxu0 %v6389_v38 }
 0x212   : > { %vm2433_vm12 = vcmp.ge.f32.partialorder %v2311_v23, 0.0  ;;  %v2465_v27 = vmul.f32 0.2, %v2311_v23  ;;  %v2306_v28 = vadd.f32 %v6187_v49, %v2305_v47  ;;  %v1197_v29 = vpop.permute.xlu0 %1196  ;;  %3831 = vmatpush2.msra.mxu0 %v3479_v36 }
 0x213   : > { %1271 = vst.msk [vmem:[#allocation4 + $0xb0] sm:$0xff] %vm1248_vm5, %v1197_v29  ;;  %v1199_v31 = vpop.permute.xlu1 %1198  ;;  %3832 = vmatprep.subr.mxu0 %v6389_v38 }
 0x214   : > { %v2497_v32 = vsel %vm2433_vm12, %v2311_v23, %v2465_v27  ;;  %vm2432_vm13 = vcmp.ge.f32.partialorder %v2306_v28, 0.0  ;;  %v2464_v34 = vmul.f32 0.2, %v2306_v28  ;;  %1272 = vst.msk [vmem:[#allocation4 + $0xb8] sm:$0xff] %vm1248_vm5, %v1199_v31  ;;  %633 = vrot.lane.b32.xlu0 %v6360_v19, %s5212_s24  ;;  %3833 = vmatpush2.msra.mxu0 %v3478_v40 }
 0x215   : > { %2530 = vst [vmem:[#allocation3 + $0x108] sm:$0xff] %v2497_v32  ;;  %635 = vrot.lane.b32.xlu1 %v6362_v24, %s5212_s24  ;;  %v3477_v24 = vld [vmem:[%s7798_s3 + $0x1d8] sm:$0xff]  ;;  %3834 = vmatprep.subr.mxu0 %v6389_v38 }
 0x216   : > { %v2496_v0 = vsel %vm2432_vm13, %v2306_v28, %v2464_v34  ;;  %v1390_v37 = vpop.permute.xlu0 %1389  ;;  %3835 = vmatpush2.msra.mxu0 %v3477_v24 }
 0x217   : > { %2529 = vst [vmem:[#allocation3 + $0x100] sm:$0xff] %v2496_v0  ;;  %1464 = vst.msk [vmem:[#allocation4 + $0xb0] sm:$0xff] %vm1441_vm6, %v1390_v37  ;;  %v1392_v19 = vpop.permute.xlu1 %1391  ;;  %3683 = vmatprep.mubr.f32.mxu1 %v2496_v0  ;;  %3836 = vmatprep.subr.mxu0 %v6389_v38 }
 0x218   : > { %1465 = vst.msk [vmem:[#allocation4 + $0xb8] sm:$0xff] %vm1441_vm6, %v1392_v19  ;;  %826 = vrot.lane.b32.xlu0 %v6373_v26, %s5213_s25  ;;  %3837 = vmatpush2.msra.mxu0 %v3476_v12  ;;  %v3475_v26 = vld [vmem:[%s7798_s3 + $0x1c8] sm:$0xff]  ;;  %v6659_v12 = vld [vmem:[%s7797_s2] ss:$0 sm:$0xff] }
 0x219   : > { %828 = vrot.lane.b32.xlu1 %v6386_v1, %s5213_s25  ;;  %3838 = vmatprep.subr.mxu0 %v6389_v38 }
 0x21a   : > { %v1584_v44 = vpop.permute.xlu0 %1583  ;;  %3839 = vmatpush2.msra.mxu0 %v3475_v26 }
 0x21b   : > { %1658 = vst.msk [vmem:[#allocation4 + $0xb0] sm:$0xff] %vm1635_vm7, %v1584_v44  ;;  %v1586_v45 = vpop.permute.xlu1 %1585  ;;  %3840 = vmatprep.subr.mxu0 %v6389_v38 }
 0x21c   : > { %1659 = vst.msk [vmem:[#allocation4 + $0xb8] sm:$0xff] %vm1635_vm7, %v1586_v45  ;;  %1019 = vrot.lane.b32.xlu0 %v6460_v3, %s5214_s26  ;;  %3841 = vmatpush2.msra.mxu0 %v3474_v48  ;;  %v3468_v3 = vld [vmem:[%s7798_s3 + $0x190] sm:$0xff] }
 0x21d   : > { %1021 = vrot.lane.b32.xlu1 %v6463_v55, %s5214_s26  ;;  %3842 = vmatprep.subr.mxu0 %v6389_v38  ;;  %v3467_v55 = vld [vmem:[%s7798_s3 + $0x188] sm:$0xff] }
 0x21e   : > { %v1777_v1 = vpop.permute.xlu0 %1776  ;;  %v6561_v14 = vld [vmem:[#allocation3 + $0xff] sm:$0xff]  ;;  %v6577_v39 = vld [vmem:[#allocation3 + $0x107] sm:$0xff]  ;;  %3843 = vmatpush2.msra.mxu0 %v3473_v51 }
 0x21f   : > { %1851 = vst.msk [vmem:[#allocation4 + $0xb0] sm:$0xff] %vm1828_vm8, %v1777_v1  ;;  %v1779_v50 = vpop.permute.xlu1 %1778  ;;  %3684 = vmatmul.mubr.f32.gmra.mxu1 %v6561_v14  ;;  %3844 = vmatprep.subr.mxu0 %v6389_v38 }
 0x220   : > { %1852 = vst.msk [vmem:[#allocation4 + $0xb8] sm:$0xff] %vm1828_vm8, %v1779_v50  ;;  %1212 = vrot.lane.b32.xlu0 %v6478_v7, %s5215_s27  ;;  %3688 = vmatprep.mubr.f32.mxu1 %v2497_v32  ;;  %v1892_v7 = vld [vmem:[#allocation2 + $0x349] sm:$0xff] }
 0x221   : > { %1214 = vrot.lane.b32.xlu1 %v6481_v35, %s5215_s27  ;;  %3845 = vmatpush2.msra.mxu0 %v3472_v42 }
 0x222   : > { %v1970_v52 = vpop.permute.xlu0 %1969  ;;  %3846 = vmatprep.subr.mxu0 %v6389_v38 }
 0x223   : > { %2044 = vst.msk [vmem:[#allocation4 + $0xb0] sm:$0xff] %vm2021_vm9, %v1970_v52  ;;  %v622_v56 = vpop.permute.xlu1 %621  ;;  %3689 = vmatmul.mubr.f32.gmra.mxu1 %v6577_v39  ;;  %3847 = vmatpush2.msra.mxu0 %v3471_v53 }
 0x224   : > { %694 = vst.msk [vmem:[#allocation4 + $0xc0] sm:$0xff] %vm669_vm2, %v622_v56  ;;  %1405 = vrot.lane.b32.xlu0 %v6497_v41, %s5216_s28  ;;  %3848 = vmatprep.subr.mxu0 %v6389_v38 }
 0x225   : > { %1407 = vrot.lane.b32.xlu1 %v6500_v20, %s5216_s28  ;;  %3849 = vmatpush2.msra.mxu0 %v3470_v60  ;;  %s7701_s28 = scalar_lea.vmem %s7800_s5, %s4923_s20 }
 0x226   : > { %v1972_v58 = vpop.permute.xlu0 %1971  ;;  %3850 = vmatprep.subr.mxu0 %v6389_v38 }
 0x227   : > { %2045 = vst.msk [vmem:[#allocation4 + $0xb8] sm:$0xff] %vm2021_vm9, %v1972_v58  ;;  %v624_v10 = vpop.permute.xlu1 %623  ;;  %3851 = vmatpush2.msra.mxu0 %v3469_v11 }
 0x228   : > { %695 = vst.msk [vmem:[#allocation4 + $0xc8] sm:$0xff] %vm669_vm2, %v624_v10  ;;  %1599 = vrot.lane.b32.xlu0 %v1505_v57, %s5217_s8  ;;  %3852 = vmatprep.subr.mxu0 %v6389_v38 }
 0x229   : > { %1601 = vrot.lane.b32.xlu1 %v1506_v59, %s5217_s8  ;;  %3853 = vmatpush2.msra.mxu0 %v3468_v3 }
 0x22a   : > { %v815_v62 = vpop.permute.xlu0 %814  ;;  %v2076_v63 = vld [vmem:[#allocation4 + $0xb0] sm:$0xff]  ;;  %3854 = vmatprep.subr.mxu0 %v6389_v38 }
 0x22b   : > { %887 = vst.msk [vmem:[#allocation4 + $0xc0] sm:$0xff] %vm862_vm3, %v815_v62  ;;  %v817_v4 = vpop.permute.xlu1 %816  ;;  %5053 = vmatprep.mubr.msk.f32.mxu0 %vm2098_vm10, %v2076_v63  ;;  %3855 = vmatpush2.msra.mxu0 %v3467_v55 }
 0x22c   : > { %888 = vst.msk [vmem:[#allocation4 + $0xc8] sm:$0xff] %vm862_vm3, %v817_v4  ;;  %1792 = vrot.lane.b32.xlu0 %v1698_v61, %s5218_s13  ;;  %3856 = vmatprep.subr.mxu0 %v6389_v38 }
 0x22d   : > { %1794 = vrot.lane.b32.xlu1 %v1699_v2, %s5218_s13  ;;  %3857 = vmatpush2.msra.mxu0 %v3466_v9 }
 0x22e   : > { %v1008_v5 = vpop.permute.xlu0 %1007  ;;  %v2077_v6 = vld [vmem:[#allocation4 + $0xb8] sm:$0xff]  ;;  %4244 = vmatprep.subr.mxu0 %v6389_v38 }
 0x22f   : > { %1080 = vst.msk [vmem:[#allocation4 + $0xc0] sm:$0xff] %vm1055_vm4, %v1008_v5  ;;  %v1010_v8 = vpop.permute.xlu1 %1009  ;;  %v5037_v33 = vpop.f32.mrf.mxu0  ;;  %5054 = vmatmul.mubr.msk.f32.gmra.mxu0 %vm2098_vm10, %v2077_v6 }
 0x230   : > { %1081 = vst.msk [vmem:[#allocation4 + $0xc8] sm:$0xff] %vm1055_vm4, %v1010_v8  ;;  %v2321_v35 = vadd.f32 %v5037_v33, %v6187_v49  ;;  %1985 = vrot.lane.b32.xlu0 %v1891_v54, %s5219_s16 }
 0x231   : > { %1987 = vrot.lane.b32.xlu1 %v1892_v7, %s5219_s16  ;;  %v2315_v13 = vpop.f32.mrf.mxu0 }
 0x232   : > { %vm2435_vm14 = vcmp.ge.f32.partialorder %v2321_v35, 0.0  ;;  %v2467_v15 = vmul.f32 0.2, %v2321_v35  ;;  %v2316_v41 = vadd.f32 %v6187_v49, %v2315_v13  ;;  %v1201_v16 = vpop.permute.xlu0 %1200 }
 0x233   : > { %1273 = vst.msk [vmem:[#allocation4 + $0xc0] sm:$0xff] %vm1248_vm5, %v1201_v16  ;;  %v1203_v43 = vpop.permute.xlu1 %1202 }
 0x234   : > { %v2499_v17 = vsel %vm2435_vm14, %v2321_v35, %v2467_v15  ;;  %vm2434_vm15 = vcmp.ge.f32.partialorder %v2316_v41, 0.0  ;;  %v2466_v20 = vmul.f32 0.2, %v2316_v41  ;;  %1274 = vst.msk [vmem:[#allocation4 + $0xc8] sm:$0xff] %vm1248_vm5, %v1203_v43 }
 0x235   : > { %2532 = vst [vmem:[#allocation3 + $0x138] sm:$0xff] %v2499_v17 }
 0x236   : > { %v2498_v21 = vsel %vm2434_vm15, %v2316_v41, %v2466_v20  ;;  %v1394_v22 = vpop.permute.xlu0 %1393 }
 0x237   : > { %2531 = vst [vmem:[#allocation3 + $0x130] sm:$0xff] %v2498_v21  ;;  %1466 = vst.msk [vmem:[#allocation4 + $0xc0] sm:$0xff] %vm1441_vm6, %v1394_v22  ;;  %v1396_v23 = vpop.permute.xlu1 %1395  ;;  %3693 = vmatprep.mubr.f32.mxu1 %v2498_v21 }
 0x238   : > { %1467 = vst.msk [vmem:[#allocation4 + $0xc8] sm:$0xff] %vm1441_vm6, %v1396_v23 }
 0x23a   : > { %v1588_v49 = vpop.permute.xlu0 %1587 }
 0x23b   : > { %1660 = vst.msk [vmem:[#allocation4 + $0xc0] sm:$0xff] %vm1635_vm7, %v1588_v49  ;;  %v1590_v46 = vpop.permute.xlu1 %1589 }
 0x23c   : > { %1661 = vst.msk [vmem:[#allocation4 + $0xc8] sm:$0xff] %vm1635_vm7, %v1590_v46 }
 0x23e   : > { %v1781_v47 = vpop.permute.xlu0 %1780  ;;  %v6638_v27 = vld [vmem:[#allocation3 + $0x12f] sm:$0xff]  ;;  %v6643_v30 = vld [vmem:[#allocation3 + $0x137] sm:$0xff] }
 0x23f   : > { %1853 = vst.msk [vmem:[#allocation4 + $0xc0] sm:$0xff] %vm1828_vm8, %v1781_v47  ;;  %v1783_v28 = vpop.permute.xlu1 %1782  ;;  %3694 = vmatmul.mubr.f32.gmra.mxu1 %v6638_v27  ;;  %v3497_v47 = vld [vmem:[%s7798_s3 + $0x278] sm:$0xff] }
 0x240   : > { %1854 = vst.msk [vmem:[#allocation4 + $0xc8] sm:$0xff] %vm1828_vm8, %v1783_v28  ;;  %3698 = vmatprep.mubr.f32.mxu1 %v2499_v17  ;;  %4020 = vmatpush1.msra.mxu1 %v3497_v47  ;;  %v3496_v28 = vld [vmem:[%s7798_s3 + $0x270] sm:$0xff] }
 0x241   : > { %4021 = vmatprep.subr.mxu1 %v6389_v38 }
 0x242   : > { %v1974_v29 = vpop.permute.xlu0 %1973  ;;  %4022 = vmatpush1.msra.mxu1 %v3496_v28 }
 0x243   : > { %2046 = vst.msk [vmem:[#allocation4 + $0xc0] sm:$0xff] %vm2021_vm9, %v1974_v29  ;;  %v626_v31 = vpop.permute.xlu1 %625  ;;  %3699 = vmatmul.mubr.f32.gmra.mxu1 %v6643_v30  ;;  %4023 = vmatprep.subr.mxu1 %v6389_v38 }
 0x244   : > { %696 = vst.msk [vmem:[#allocation4 + $0xd0] sm:$0xff] %vm669_vm2, %v626_v31 }
 0x246   : > { %v1976_v32 = vpop.permute.xlu0 %1975 }
 0x247   : > { %2047 = vst.msk [vmem:[#allocation4 + $0xc8] sm:$0xff] %vm2021_vm9, %v1976_v32  ;;  %v628_v34 = vpop.permute.xlu1 %627  ;;  %v3495_v32 = vld [vmem:[%s7798_s3 + $0x268] sm:$0xff] }
 0x248   : > { %697 = vst.msk [vmem:[#allocation4 + $0xd8] sm:$0xff] %vm669_vm2, %v628_v34  ;;  %4024 = vmatpush1.msra.mxu1 %v3495_v32 }
 0x249   : > { %4025 = vmatprep.subr.mxu1 %v6389_v38 }
 0x24a   : > { %v819_v36 = vpop.permute.xlu0 %818  ;;  %v2078_v0 = vld [vmem:[#allocation4 + $0xc0] sm:$0xff] }
 0x24b   : > { %889 = vst.msk [vmem:[#allocation4 + $0xd0] sm:$0xff] %vm862_vm3, %v819_v36  ;;  %v821_v37 = vpop.permute.xlu1 %820  ;;  %5056 = vmatprep.mubr.msk.f32.mxu0 %vm2098_vm10, %v2078_v0 }
 0x24c   : > { %890 = vst.msk [vmem:[#allocation4 + $0xd8] sm:$0xff] %vm862_vm3, %v821_v37 }
 0x24e   : > { %v1012_v40 = vpop.permute.xlu0 %1011  ;;  %v2079_v19 = vld [vmem:[#allocation4 + $0xc8] sm:$0xff] }
 0x24f   : > { %1082 = vst.msk [vmem:[#allocation4 + $0xd0] sm:$0xff] %vm1055_vm4, %v1012_v40  ;;  %v1014_v24 = vpop.permute.xlu1 %1013  ;;  %v5040_v44 = vpop.f32.mrf.mxu0  ;;  %5057 = vmatmul.mubr.msk.f32.gmra.mxu0 %vm2098_vm10, %v2079_v19  ;;  %v3494_v19 = vld [vmem:[%s7798_s3 + $0x260] sm:$0xff] }
 0x250   : > { %1083 = vst.msk [vmem:[#allocation4 + $0xd8] sm:$0xff] %vm1055_vm4, %v1014_v24  ;;  %v2331_v45 = vadd.f32 %v6659_v12, %v5040_v44  ;;  %4026 = vmatpush1.msra.mxu1 %v3494_v19 }
 0x251   : > { %v2325_v26 = vpop.f32.mrf.mxu0  ;;  %4027 = vmatprep.subr.mxu1 %v6389_v38 }
 0x252   : > { %vm2437_vm0 = vcmp.ge.f32.partialorder %v2331_v45, 0.0  ;;  %v2469_v1 = vmul.f32 0.2, %v2331_v45  ;;  %v2326_v48 = vadd.f32 %v6659_v12, %v2325_v26  ;;  %v1205_v50 = vpop.permute.xlu0 %1204 }
 0x253   : > { %1275 = vst.msk [vmem:[#allocation4 + $0xd0] sm:$0xff] %vm1248_vm5, %v1205_v50  ;;  %v1207_v51 = vpop.permute.xlu1 %1206 }
 0x254   : > { %v2501_v52 = vsel %vm2437_vm0, %v2331_v45, %v2469_v1  ;;  %vm2436_vm1 = vcmp.ge.f32.partialorder %v2326_v48, 0.0  ;;  %v2468_v42 = vmul.f32 0.2, %v2326_v48  ;;  %1276 = vst.msk [vmem:[#allocation4 + $0xd8] sm:$0xff] %vm1248_vm5, %v1207_v51 }
 0x255   : > { %2534 = vst [vmem:[#allocation3 + $0x168] sm:$0xff] %v2501_v52 }
 0x256   : > { %v2500_v56 = vsel %vm2436_vm1, %v2326_v48, %v2468_v42  ;;  %v1398_v53 = vpop.permute.xlu0 %1397  ;;  %v3493_v48 = vld [vmem:[%s7798_s3 + $0x258] sm:$0xff] }
 0x257   : > { %2533 = vst [vmem:[#allocation3 + $0x160] sm:$0xff] %v2500_v56  ;;  %1468 = vst.msk [vmem:[#allocation4 + $0xd0] sm:$0xff] %vm1441_vm6, %v1398_v53  ;;  %v1400_v57 = vpop.permute.xlu1 %1399  ;;  %3703 = vmatprep.mubr.f32.mxu1 %v2500_v56  ;;  %4028 = vmatpush1.msra.mxu1 %v3493_v48 }
 0x258   : > { %1469 = vst.msk [vmem:[#allocation4 + $0xd8] sm:$0xff] %vm1441_vm6, %v1400_v57  ;;  %4029 = vmatprep.subr.mxu1 %v6389_v38 }
 0x25a   : > { %v1592_v58 = vpop.permute.xlu0 %1591 }
 0x25b   : > { %1662 = vst.msk [vmem:[#allocation4 + $0xd0] sm:$0xff] %vm1635_vm7, %v1592_v58  ;;  %v1594_v59 = vpop.permute.xlu1 %1593  ;;  %v3491_v58 = vld [vmem:[%s7798_s3 + $0x248] sm:$0xff] }
 0x25c   : > { %1663 = vst.msk [vmem:[#allocation4 + $0xd8] sm:$0xff] %vm1635_vm7, %v1594_v59 }
 0x25e   : > { %v1785_v60 = vpop.permute.xlu0 %1784  ;;  %v6669_v10 = vld [vmem:[#allocation3 + $0x15f] sm:$0xff]  ;;  %v6676_v2 = vld [vmem:[#allocation3 + $0x167] sm:$0xff] }
 0x25f   : > { %1855 = vst.msk [vmem:[#allocation4 + $0xd0] sm:$0xff] %vm1828_vm8, %v1785_v60  ;;  %v1787_v11 = vpop.permute.xlu1 %1786  ;;  %v6672_v61 = vpop.f32.mrf.mxu1  ;;  %3704 = vmatmul.mubr.f32.gmra.mxu1 %v6669_v10 }
 0x260   : > { %1856 = vst.msk [vmem:[#allocation4 + $0xd8] sm:$0xff] %vm1828_vm8, %v1787_v11  ;;  %3708 = vmatprep.mubr.f32.mxu1 %v2501_v52  ;;  %v3492_v52 = vld [vmem:[%s7798_s3 + $0x250] sm:$0xff] }
 0x261   : > { %v3647_v62 = vpop.f32.mrf.mxu1  ;;  %4030 = vmatpush1.msra.mxu1 %v3492_v52 }
 0x262   : > { %v1978_v63 = vpop.permute.xlu0 %1977  ;;  %4031 = vmatprep.subr.mxu1 %v6389_v38 }
 0x263   : > { %2048 = vst.msk [vmem:[#allocation4 + $0xd0] sm:$0xff] %vm2021_vm9, %v1978_v63  ;;  %v630_v3 = vpop.permute.xlu1 %629  ;;  %v6679_v4 = vpop.f32.mrf.mxu1  ;;  %3709 = vmatmul.mubr.f32.gmra.mxu1 %v6676_v2 }
 0x264   : > { %698 = vst.msk [vmem:[#allocation4 + $0xe0] sm:$0xff] %vm669_vm2, %v630_v3  ;;  %4032 = vmatpush1.msra.mxu1 %v3491_v58  ;;  %v3527_v58 = vld [vmem:[%s7798_s3 + $0x368] sm:$0xff] }
 0x265   : > { %v3652_v54 = vpop.f32.mrf.mxu1  ;;  %4033 = vmatprep.subr.mxu1 %v6389_v38 }
 0x266   : > { %v1980_v55 = vpop.permute.xlu0 %1979 }
 0x267   : > { %2049 = vst.msk [vmem:[#allocation4 + $0xd8] sm:$0xff] %vm2021_vm9, %v1980_v55  ;;  %v632_v5 = vpop.permute.xlu1 %631 }
 0x268   : > { %699 = vst.msk [vmem:[#allocation4 + $0xe8] sm:$0xff] %vm669_vm2, %v632_v5 }
 0x26a   : > { %v823_v6 = vpop.permute.xlu0 %822  ;;  %v2080_v7 = vld [vmem:[#allocation4 + $0xd0] sm:$0xff] }
 0x26b   : > { %891 = vst.msk [vmem:[#allocation4 + $0xe0] sm:$0xff] %vm862_vm3, %v823_v6  ;;  %v825_v8 = vpop.permute.xlu1 %824  ;;  %5059 = vmatprep.mubr.msk.f32.mxu0 %vm2098_vm10, %v2080_v7 }
 0x26c   : > { %892 = vst.msk [vmem:[#allocation4 + $0xe8] sm:$0xff] %vm862_vm3, %v825_v8 }
 0x26e   : > { %v1016_v33 = vpop.permute.xlu0 %1015  ;;  %v2081_v9 = vld [vmem:[#allocation4 + $0xd8] sm:$0xff] }
 0x26f   : > { %1084 = vst.msk [vmem:[#allocation4 + $0xe0] sm:$0xff] %vm1055_vm4, %v1016_v33  ;;  %v1018_v35 = vpop.permute.xlu1 %1017  ;;  %v5043_v13 = vpop.f32.mrf.mxu0  ;;  %5060 = vmatmul.mubr.msk.f32.gmra.mxu0 %vm2098_vm10, %v2081_v9 }
 0x270   : > { %1085 = vst.msk [vmem:[#allocation4 + $0xe8] sm:$0xff] %vm1055_vm4, %v1018_v35  ;;  %v2341_v15 = vadd.f32 %v6659_v12, %v5043_v13  ;;  %v3490_v35 = vld [vmem:[%s7798_s3 + $0x240] sm:$0xff]  ;;  %v3489_v13 = vld [vmem:[%s7798_s3 + $0x238] sm:$0xff] }
 0x271   : > { %v2335_v41 = vpop.f32.mrf.mxu0  ;;  %4034 = vmatpush1.msra.mxu1 %v3490_v35  ;;  %v3522_v35 = vld [vmem:[%s7798_s3 + $0x340] sm:$0xff] }
 0x272   : > { %vm2439_vm11 = vcmp.ge.f32.partialorder %v2341_v15, 0.0  ;;  %v2471_v16 = vmul.f32 0.2, %v2341_v15  ;;  %v2336_v43 = vadd.f32 %v6659_v12, %v2335_v41  ;;  %v1209_v17 = vpop.permute.xlu0 %1208  ;;  %4035 = vmatprep.subr.mxu1 %v6389_v38 }
 0x273   : > { %1277 = vst.msk [vmem:[#allocation4 + $0xe0] sm:$0xff] %vm1248_vm5, %v1209_v17  ;;  %v1211_v20 = vpop.permute.xlu1 %1210  ;;  %4036 = vmatpush1.msra.mxu1 %v3489_v13 }
 0x274   : > { %v2503_v21 = vsel %vm2439_vm11, %v2341_v15, %v2471_v16  ;;  %vm2438_vm12 = vcmp.ge.f32.partialorder %v2336_v43, 0.0  ;;  %v2470_v22 = vmul.f32 0.2, %v2336_v43  ;;  %1278 = vst.msk [vmem:[#allocation4 + $0xe8] sm:$0xff] %vm1248_vm5, %v1211_v20  ;;  %v3488_v15 = vld [vmem:[%s7798_s3 + $0x230] sm:$0xff]  ;;  %4037 = vmatprep.subr.mxu1 %v6389_v38 }
 0x275   : > { %2536 = vst [vmem:[#allocation3 + $0x198] sm:$0xff] %v2503_v21  ;;  %4038 = vmatpush1.msra.mxu1 %v3488_v15 }
 0x276   : > { %v2502_v23 = vsel %vm2438_vm12, %v2336_v43, %v2470_v22  ;;  %v1402_v49 = vpop.permute.xlu0 %1401  ;;  %v3487_v43 = vld [vmem:[%s7798_s3 + $0x228] sm:$0xff]  ;;  %4039 = vmatprep.subr.mxu1 %v6389_v38 }
 0x277   : > { %2535 = vst [vmem:[#allocation3 + $0x190] sm:$0xff] %v2502_v23  ;;  %1470 = vst.msk [vmem:[#allocation4 + $0xe0] sm:$0xff] %vm1441_vm6, %v1402_v49  ;;  %v1404_v46 = vpop.permute.xlu1 %1403  ;;  %3713 = vmatprep.mubr.f32.mxu1 %v2502_v23  ;;  %4040 = vmatpush1.msra.mxu1 %v3487_v43  ;;  %v3486_v49 = vld [vmem:[%s7798_s3 + $0x220] sm:$0xff] }
 0x278   : > { %1471 = vst.msk [vmem:[#allocation4 + $0xe8] sm:$0xff] %vm1441_vm6, %v1404_v46  ;;  %4041 = vmatprep.subr.mxu1 %v6389_v38  ;;  %v2750_v43 = vld [vmem:[#allocation3 + $0xa7] sm:$0xff] }
 0x279   : > { %4042 = vmatpush1.msra.mxu1 %v3486_v49  ;;  %v3520_v49 = vld [vmem:[%s7798_s3 + $0x330] sm:$0xff] }
 0x27a   : > { %v1596_v29 = vpop.permute.xlu0 %1595  ;;  %4043 = vmatprep.subr.mxu1 %v6389_v38 }
 0x27b   : > { %1664 = vst.msk [vmem:[#allocation4 + $0xe0] sm:$0xff] %vm1635_vm7, %v1596_v29  ;;  %v1598_v31 = vpop.permute.xlu1 %1597 }
 0x27c   : > { %1665 = vst.msk [vmem:[#allocation4 + $0xe8] sm:$0xff] %vm1635_vm7, %v1598_v31  ;;  %v3485_v31 = vld [vmem:[%s7798_s3 + $0x218] sm:$0xff] }
 0x27d   : > { %4044 = vmatpush1.msra.mxu1 %v3485_v31  ;;  %v2751_v31 = vld [vmem:[#allocation3 + $0xcf] sm:$0xff] }
 0x27e   : > { %v1789_v34 = vpop.permute.xlu0 %1788  ;;  %v6710_v36 = vld [vmem:[#allocation3 + $0x18f] sm:$0xff]  ;;  %v6721_v44 = vld [vmem:[#allocation3 + $0x197] sm:$0xff]  ;;  %4045 = vmatprep.subr.mxu1 %v6389_v38 }
 0x27f   : > { %1857 = vst.msk [vmem:[#allocation4 + $0xe0] sm:$0xff] %vm1828_vm8, %v1789_v34  ;;  %v1791_v0 = vpop.permute.xlu1 %1790  ;;  %v6713_v37 = vpop.f32.mrf.mxu1  ;;  %3714 = vmatmul.mubr.f32.gmra.mxu1 %v6710_v36  ;;  %v3484_v34 = vld [vmem:[%s7798_s3 + $0x210] sm:$0xff] }
 0x280   : > { %1858 = vst.msk [vmem:[#allocation4 + $0xe8] sm:$0xff] %vm1828_vm8, %v1791_v0  ;;  %3718 = vmatprep.mubr.f32.mxu1 %v2503_v21  ;;  %v3483_v0 = vld [vmem:[%s7798_s3 + $0x208] sm:$0xff]  ;;  %4046 = vmatpush1.msra.mxu1 %v3484_v34 }
 0x281   : > { %v3657_v40 = vpop.f32.mrf.mxu1  ;;  %4047 = vmatprep.subr.mxu1 %v6389_v38  ;;  %v3511_v34 = vld [vmem:[%s7798_s3 + $0x2e8] sm:$0xff] }
 0x282   : > { %v1982_v24 = vpop.permute.xlu0 %1981  ;;  %4048 = vmatpush1.msra.mxu1 %v3483_v0 }
 0x283   : > { %2050 = vst.msk [vmem:[#allocation4 + $0xe0] sm:$0xff] %vm2021_vm9, %v1982_v24  ;;  %v1984_v45 = vpop.permute.xlu1 %1983  ;;  %v6724_v26 = vpop.f32.mrf.mxu1  ;;  %3719 = vmatmul.mubr.f32.gmra.mxu1 %v6721_v44  ;;  %4049 = vmatprep.subr.mxu1 %v6389_v38  ;;  %v2745_v24 = vld [vmem:[#allocation3 + $0x3f] sm:$0xff]  ;;  %v3528_v38 = vld [vmem:[%s7798_s3 + $0x370] sm:$0xff] }
 0x284   : > { %2051 = vst.msk [vmem:[#allocation4 + $0xe8] sm:$0xff] %vm2021_vm9, %v1984_v45  ;;  %v2681_v45 = vld [vmem:[#allocation3 + $0x11] sm:$0xff] }
 0x285   : > { %v3662_v1 = vpop.f32.mrf.mxu1 }
 0x286   : > { %v634_v50 = vpop.permute.xlu0 %633  ;;  %v3529_v1 = vld [vmem:[%s7798_s3 + $0x378] sm:$0xff] }
 0x287   : > { %700 = vst.msk [vmem:[#allocation4 + $0xf0] sm:$0xff] %vm669_vm2, %v634_v50  ;;  %v636_v51 = vpop.permute.xlu1 %635 }
 0x288   : > { %701 = vst.msk [vmem:[#allocation4 + $0xf8] sm:$0xff] %vm669_vm2, %v636_v51  ;;  %v2746_v51 = vld [vmem:[#allocation3 + $0x47] sm:$0xff] }
 0x28a   : > { %v827_v42 = vpop.permute.xlu0 %826  ;;  %v2082_v56 = vld [vmem:[#allocation4 + $0xe0] sm:$0xff] }
 0x28b   : > { %893 = vst.msk [vmem:[#allocation4 + $0xf0] sm:$0xff] %vm862_vm3, %v827_v42  ;;  %v829_v53 = vpop.permute.xlu1 %828  ;;  %5062 = vmatprep.mubr.msk.f32.mxu0 %vm2098_vm10, %v2082_v56  ;;  %v2083_v57 = vld [vmem:[#allocation4 + $0xe8] sm:$0xff]  ;;  %v2682_v42 = vld [vmem:[#allocation3 + $0x19] sm:$0xff] }
 0x28c   : > { %894 = vst.msk [vmem:[#allocation4 + $0xf8] sm:$0xff] %vm862_vm3, %v829_v53  ;;  %5063 = vmatmul.mubr.msk.f32.gmra.mxu0 %vm2098_vm10, %v2083_v57  ;;  %v6813_v57 = vld [vmem:[#allocation3] sm:$0xff] }
 0x28e   : > { %v1020_v59 = vpop.permute.xlu0 %1019 }
 0x28f   : > { %1086 = vst.msk [vmem:[#allocation4 + $0xf0] sm:$0xff] %vm1055_vm4, %v1020_v59  ;;  %v1022_v60 = vpop.permute.xlu1 %1021  ;;  %v5046_v11 = vpop.f32.mrf.mxu0 }
 0x290   : > { %1087 = vst.msk [vmem:[#allocation4 + $0xf8] sm:$0xff] %vm1055_vm4, %v1022_v60  ;;  %v2351_v62 = vadd.f32 %v6659_v12, %v5046_v11  ;;  %v2747_v11 = vld [vmem:[#allocation3 + $0x6f] sm:$0xff] }
 0x291   : > { %v2345_v63 = vpop.f32.mrf.mxu0 }
 0x292   : > { %vm2441_vm2 = vcmp.ge.f32.partialorder %v2351_v62, 0.0  ;;  %v2473_v3 = vmul.f32 0.2, %v2351_v62  ;;  %v2346_v54 = vadd.f32 %v6659_v12, %v2345_v63  ;;  %v1213_v55 = vpop.permute.xlu0 %1212 }
 0x293   : > { %1279 = vst.msk [vmem:[#allocation4 + $0xf0] sm:$0xff] %vm1248_vm5, %v1213_v55  ;;  %v1215_v5 = vpop.permute.xlu1 %1214  ;;  %v3482_v55 = vld [vmem:[%s7798_s3 + $0x200] sm:$0xff] }
 0x294   : > { %v2505_v6 = vsel %vm2441_vm2, %v2351_v62, %v2473_v3  ;;  %vm2440_vm3 = vcmp.ge.f32.partialorder %v2346_v54, 0.0  ;;  %v2472_v7 = vmul.f32 0.2, %v2346_v54  ;;  %1280 = vst.msk [vmem:[#allocation4 + $0xf8] sm:$0xff] %vm1248_vm5, %v1215_v5  ;;  %v3526_v62 = vld [vmem:[%s7798_s3 + $0x360] sm:$0xff]  ;;  %v3525_v3 = vld [vmem:[%s7798_s3 + $0x358] sm:$0xff]  ;;  %4050 = vmatpush1.msra.mxu1 %v3482_v55 }
 0x295   : > { %2538 = vst [vmem:[#allocation3 + $0x1c8] sm:$0xff] %v2505_v6  ;;  %v2748_v5 = vld [vmem:[#allocation3 + $0x77] sm:$0xff]  ;;  %4051 = vmatprep.subr.mxu1 %v6813_v57  ;;  %v3507_v55 = vld [vmem:[%s7798_s3 + $0x2c8] sm:$0xff] }
 0x296   : > { %v2504_v8 = vsel %vm2440_vm3, %v2346_v54, %v2472_v7  ;;  %v1406_v33 = vpop.permute.xlu0 %1405  ;;  %v6827_v54 = vld [vmem:[#allocation3 + $0x41] sm:$0xff] }
 0x297   : > { %2537 = vst [vmem:[#allocation3 + $0x1c0] sm:$0xff] %v2504_v8  ;;  %1472 = vst.msk [vmem:[#allocation4 + $0xf0] sm:$0xff] %vm1441_vm6, %v1406_v33  ;;  %v1408_v9 = vpop.permute.xlu1 %1407  ;;  %3723 = vmatprep.mubr.f32.mxu1 %v2504_v8  ;;  %v3523_v7 = vld [vmem:[%s7798_s3 + $0x348] sm:$0xff]  ;;  %v3513_v33 = vld [vmem:[%s7798_s3 + $0x2f8] sm:$0xff] }
 0x298   : > { %1473 = vst.msk [vmem:[#allocation4 + $0xf8] sm:$0xff] %vm1441_vm6, %v1408_v9  ;;  %v6841_v8 = vld [vmem:[#allocation3 + $0x49] sm:$0xff]  ;;  %v2749_v9 = vld [vmem:[#allocation3 + $0x9f] sm:$0xff]  ;;  %4052 = vmatpush2.msra.mxu1 %v3513_v33 }
 0x299   : > { %4053 = vmatprep.subr.mxu1 %v6813_v57  ;;  %v3506_v33 = vld [vmem:[%s7798_s3 + $0x2c0] sm:$0xff] }
 0x29a   : > { %v1600_v41 = vpop.permute.xlu0 %1599 }
 0x29b   : > { %1666 = vst.msk [vmem:[#allocation4 + $0xf0] sm:$0xff] %vm1635_vm7, %v1600_v41  ;;  %v1602_v16 = vpop.permute.xlu1 %1601  ;;  %v6858_v41 = vld [vmem:[#allocation3 + $0x71] sm:$0xff] }
 0x29c   : > { %1667 = vst.msk [vmem:[#allocation4 + $0xf8] sm:$0xff] %vm1635_vm7, %v1602_v16  ;;  %v3521_v16 = vld [vmem:[%s7798_s3 + $0x338] sm:$0xff] }
 0x29e   : > { %v1793_v17 = vpop.permute.xlu0 %1792  ;;  %v6772_v20 = vld [vmem:[#allocation3 + $0x1bf] sm:$0xff]  ;;  %v6783_v47 = vld [vmem:[#allocation3 + $0x1c7] sm:$0xff] }
 0x29f   : > { %1859 = vst.msk [vmem:[#allocation4 + $0xf0] sm:$0xff] %vm1828_vm8, %v1793_v17  ;;  %v1795_v21 = vpop.permute.xlu1 %1794  ;;  %v6775_v22 = vpop.f32.mrf.mxu1  ;;  %3724 = vmatmul.mubr.f32.gmra.mxu1 %v6772_v20 }
 0x2a0   : > { %1860 = vst.msk [vmem:[#allocation4 + $0xf8] sm:$0xff] %vm1828_vm8, %v1795_v21  ;;  %3728 = vmatprep.mubr.f32.mxu1 %v2505_v6  ;;  %v3524_v6 = vld [vmem:[%s7798_s3 + $0x350] sm:$0xff] }
 0x2a1   : > { %v3667_v23 = vpop.f32.mrf.mxu1  ;;  %v3512_v21 = vld [vmem:[%s7798_s3 + $0x2f0] sm:$0xff] }
 0x2a2   : > { %v1986_v46 = vpop.permute.xlu0 %1985  ;;  %4054 = vmatpush2.msra.mxu1 %v3512_v21  ;;  %v6987_v21 = vld [vmem:[#allocation3 + $0x131] sm:$0xff] }
 0x2a3   : > { %2052 = vst.msk [vmem:[#allocation4 + $0xf0] sm:$0xff] %vm2021_vm9, %v1986_v46  ;;  %v1988_v28 = vpop.permute.xlu1 %1987  ;;  %v6786_v29 = vpop.f32.mrf.mxu1  ;;  %3729 = vmatmul.mubr.f32.gmra.mxu1 %v6783_v47  ;;  %4055 = vmatprep.subr.mxu1 %v6813_v57 }
 0x2a4   : > { %2053 = vst.msk [vmem:[#allocation4 + $0xf8] sm:$0xff] %vm2021_vm9, %v1988_v28  ;;  %v6877_v28 = vld [vmem:[#allocation3 + $0x79] sm:$0xff]  ;;  %4056 = vmatpush2.msra.mxu1 %v3511_v34 }
 0x2a5   : > { %v3672_v32 = vpop.f32.mrf.mxu1  ;;  %4057 = vmatprep.subr.mxu1 %v6813_v57 }
 0x2a6   : > { %v3519_v32 = vld [vmem:[%s7798_s3 + $0x328] sm:$0xff] }
 0x2aa   : > { %v2084_v40 = vld [vmem:[#allocation4 + $0xf0] sm:$0xff] }
 0x2ab   : > { %5065 = vmatprep.mubr.msk.f32.mxu0 %vm2098_vm10, %v2084_v40  ;;  %v2085_v19 = vld [vmem:[#allocation4 + $0xf8] sm:$0xff]  ;;  %v3518_v40 = vld [vmem:[%s7798_s3 + $0x320] sm:$0xff] }
 0x2ac   : > { %5066 = vmatmul.mubr.msk.f32.gmra.mxu0 %vm2098_vm10, %v2085_v19  ;;  %v6892_v19 = vld [vmem:[#allocation3 + $0xa1] sm:$0xff] }
 0x2ad   : > { %3858 = vmatprep.mubr.f32.mxu0 %v2745_v24  ;;  %v2752_v24 = vld [vmem:[#allocation3 + $0xd7] sm:$0xff] }
 0x2af   : > { %v5049_v48 = vpop.f32.mrf.mxu0 }
 0x2b0   : > { %v2361_v50 = vadd.f32 %v6659_v12, %v5049_v48  ;;  %3859 = vmatmul.mubr.f32.vlgmr.msra.gmra.mxu0 %v2681_v45  ;;  %v3517_v45 = vld [vmem:[%s7798_s3 + $0x318] sm:$0xff]  ;;  %v3516_v48 = vld [vmem:[%s7798_s3 + $0x310] sm:$0xff] }
 0x2b1   : > { %v2355_v52 = vpop.f32.mrf.mxu0  ;;  %3863 = vmatprep.mubr.f32.mxu0 %v2746_v51  ;;  %4245 = vmatpush1.msra.mxu0 %v3529_v1  ;;  %v3510_v1 = vld [vmem:[%s7798_s3 + $0x2e0] sm:$0xff]  ;;  %v3515_v51 = vld [vmem:[%s7798_s3 + $0x308] sm:$0xff] }
 0x2b2   : > { %vm2443_vm4 = vcmp.ge.f32.partialorder %v2361_v50, 0.0  ;;  %v2475_v56 = vmul.f32 0.2, %v2361_v50  ;;  %v2356_v53 = vadd.f32 %v6659_v12, %v2355_v52  ;;  %4246 = vmatprep.subr.mxu0 %v6813_v57  ;;  %4058 = vmatpush2.msra.mxu1 %v3510_v1  ;;  %v3514_v52 = vld [vmem:[%s7798_s3 + $0x300] sm:$0xff] }
 0x2b3   : > { %4247 = vmatpush1.msra.mxu0 %v3528_v38  ;;  %v3509_v38 = vld [vmem:[%s7798_s3 + $0x2d8] sm:$0xff]  ;;  %4059 = vmatprep.subr.mxu1 %v6813_v57  ;;  %v7019_v1 = vld [vmem:[#allocation3 + $0x161] sm:$0xff] }
 0x2b4   : > { %v2507_v59 = vsel %vm2443_vm4, %v2361_v50, %v2475_v56  ;;  %vm2442_vm5 = vcmp.ge.f32.partialorder %v2356_v53, 0.0  ;;  %v2474_v60 = vmul.f32 0.2, %v2356_v53  ;;  %3864 = vmatmul.mubr.f32.gmra.mxu0 %v2682_v42  ;;  %4248 = vmatprep.subr.mxu0 %v6813_v57  ;;  %v6907_v50 = vld [vmem:[#allocation3 + $0xa9] sm:$0xff]  ;;  %v6923_v56 = vld [vmem:[#allocation3 + $0xd1] sm:$0xff] }
 0x2b5   : > { %2540 = vst [vmem:[#allocation3 + $0x1f8] sm:$0xff] %v2507_v59  ;;  %3868 = vmatprep.mubr.f32.mxu0 %v2747_v11  ;;  %4249 = vmatpush1.msra.mxu0 %v3527_v58  ;;  %v3508_v58 = vld [vmem:[%s7798_s3 + $0x2d0] sm:$0xff] }
 0x2b6   : > { %v2506_v63 = vsel %vm2442_vm5, %v2356_v53, %v2474_v60  ;;  %4250 = vmatprep.subr.mxu0 %v6813_v57  ;;  %4060 = vmatpush2.msra.mxu1 %v3509_v38  ;;  %v7035_v38 = vld [vmem:[#allocation3 + $0x169] sm:$0xff] }
 0x2b7   : > { %2539 = vst [vmem:[#allocation3 + $0x1f0] sm:$0xff] %v2506_v63  ;;  %3733 = vmatprep.mubr.f32.mxu1 %v2506_v63  ;;  %4251 = vmatpush1.msra.mxu0 %v3526_v62  ;;  %v3544_v62 = vld [vmem:[%s7798_s3 + $0x3f0] sm:$0xff]  ;;  %v6941_v63 = vld [vmem:[#allocation3 + $0xd9] sm:$0xff] }
 0x2b8   : > { %3869 = vmatmul.mubr.f32.gmra.mxu0 %v6827_v54  ;;  %4252 = vmatprep.subr.mxu0 %v6813_v57 }
 0x2b9   : > { %3873 = vmatprep.mubr.f32.mxu0 %v2748_v5  ;;  %4253 = vmatpush1.msra.mxu0 %v3525_v3 }
 0x2ba   : > { %4254 = vmatprep.subr.mxu0 %v6813_v57  ;;  %4061 = vmatprep.subr.mxu1 %v6813_v57 }
 0x2bb   : > { %4255 = vmatpush1.msra.mxu0 %v3524_v6  ;;  %4062 = vmatpush2.msra.mxu1 %v3508_v58  ;;  %v3543_v6 = vld [vmem:[%s7798_s3 + $0x3e8] sm:$0xff] }
 0x2bc   : > { %3874 = vmatmul.mubr.f32.gmra.mxu0 %v6841_v8  ;;  %4256 = vmatprep.subr.mxu0 %v6813_v57 }
 0x2bd   : > { %3878 = vmatprep.mubr.f32.mxu0 %v2749_v9  ;;  %4257 = vmatpush1.msra.mxu0 %v3523_v7  ;;  %v6954_v7 = vld [vmem:[#allocation3 + $0x101] sm:$0xff]  ;;  %v3505_v9 = vld [vmem:[%s7798_s3 + $0x2b8] sm:$0xff] }
 0x2be   : > { %v6852_v13 = vld [vmem:[#allocation3 + $0x1ef] sm:$0xff]  ;;  %4258 = vmatprep.subr.mxu0 %v6813_v57  ;;  %v6868_v23 = vld [vmem:[#allocation3 + $0x1f7] sm:$0xff]  ;;  %4063 = vmatprep.subr.mxu1 %v6813_v57 }
 0x2bf   : > { %v6855_v15 = vpop.f32.mrf.mxu1  ;;  %3734 = vmatmul.mubr.f32.gmra.mxu1 %v6852_v13  ;;  %4259 = vmatpush1.msra.mxu0 %v3522_v35  ;;  %v6969_v35 = vld [vmem:[#allocation3 + $0x109] sm:$0xff] }
 0x2c0   : > { %3879 = vmatmul.mubr.f32.gmra.mxu0 %v6858_v41  ;;  %3738 = vmatprep.mubr.f32.mxu1 %v2507_v59 }
 0x2c1   : > { %3883 = vmatprep.mubr.f32.mxu0 %v2750_v43  ;;  %v3677_v17 = vpop.f32.mrf.mxu1  ;;  %4260 = vmatprep.subr.mxu0 %v6813_v57  ;;  %v3504_v43 = vld [vmem:[%s7798_s3 + $0x2b0] sm:$0xff] }
 0x2c2   : > { %4261 = vmatpush1.msra.mxu0 %v3521_v16  ;;  %4064 = vmatpush2.msra.mxu1 %v3507_v55  ;;  %v3541_v16 = vld [vmem:[%s7798_s3 + $0x3d8] sm:$0xff] }
 0x2c3   : > { %v6874_v46 = vpop.f32.mrf.mxu1  ;;  %3739 = vmatmul.mubr.f32.gmra.mxu1 %v6868_v23  ;;  %4262 = vmatprep.subr.mxu0 %v6813_v57  ;;  %v7073_v55 = vld [vmem:[%s7798_s3 + $0x478] sm:$0xff] }
 0x2c4   : > { %3884 = vmatmul.mubr.f32.gmra.mxu0 %v6877_v28  ;;  %4065 = vmatprep.subr.mxu1 %v6813_v57 }
 0x2c5   : > { %3888 = vmatprep.mubr.f32.mxu0 %v2751_v31  ;;  %v3682_v0 = vpop.f32.mrf.mxu1  ;;  %4263 = vmatpush1.msra.mxu0 %v3520_v49  ;;  %v3503_v31 = vld [vmem:[%s7798_s3 + $0x2a8] sm:$0xff] }
 0x2c6   : > { %4264 = vmatprep.subr.mxu0 %v6813_v57  ;;  %4066 = vmatpush2.msra.mxu1 %v3506_v33  ;;  %v7004_v0 = vld [vmem:[#allocation3 + $0x139] sm:$0xff]  ;;  %v2699_v33 = vld [vmem:[#allocation3 + $0x1c1] sm:$0xff] }
 0x2c7   : > { %4265 = vmatpush1.msra.mxu0 %v3519_v32  ;;  %4067 = vmatprep.subr.mxu1 %v6813_v57 }
 0x2c8   : > { %3889 = vmatmul.mubr.f32.gmra.mxu0 %v6892_v19  ;;  %4266 = vmatprep.subr.mxu0 %v6813_v57 }
 0x2c9   : > { %3893 = vmatprep.mubr.f32.mxu0 %v2752_v24  ;;  %4267 = vmatpush1.msra.mxu0 %v3518_v40  ;;  %v3539_v40 = vld [vmem:[%s7798_s3 + $0x3c8] sm:$0xff] }
 0x2ca   : > { %4268 = vmatprep.subr.mxu0 %v6813_v57  ;;  %4068 = vmatpush2.msra.mxu1 %v3505_v9  ;;  %v3531_v9 = vld [vmem:[%s7798_s3 + $0x388] sm:$0xff] }
 0x2cb   : > { %4269 = vmatpush1.msra.mxu0 %v3517_v45  ;;  %4069 = vmatprep.subr.mxu1 %v6813_v57  ;;  %v3501_v45 = vld [vmem:[%s7798_s3 + $0x298] sm:$0xff] }
 0x2cc   : > { %3894 = vmatmul.mubr.f32.gmra.mxu0 %v6907_v50  ;;  %4270 = vmatprep.subr.mxu0 %v6813_v57 }
 0x2cd   : > { %3898 = vmatprep.mubr.f32.mxu0 %v6561_v14  ;;  %4271 = vmatpush1.msra.mxu0 %v3516_v48  ;;  %v3545_v14 = vld [vmem:[%s7798_s3 + $0x3f8] sm:$0xff]  ;;  %v3500_v48 = vld [vmem:[%s7798_s3 + $0x290] sm:$0xff] }
 0x2ce   : > { %4272 = vmatprep.subr.mxu0 %v6813_v57  ;;  %4070 = vmatpush2.msra.mxu1 %v3504_v43 }
 0x2cf   : > { %v5052_v42 = vpop.f32.mrf.mxu0  ;;  %4273 = vmatpush1.msra.mxu0 %v3515_v51  ;;  %4071 = vmatprep.subr.mxu1 %v6813_v57  ;;  %v3499_v51 = vld [vmem:[%s7798_s3 + $0x288] sm:$0xff] }
 0x2d0   : > { %v2371_v53 = vadd.f32 %v6659_v12, %v5052_v42  ;;  %3899 = vmatmul.mubr.f32.gmra.mxu0 %v6923_v56  ;;  %4274 = vmatprep.subr.mxu0 %v6813_v57  ;;  %v3536_v42 = vld [vmem:[%s7798_s3 + $0x3b0] sm:$0xff] }
 0x2d1   : > { %v2365_v59 = vpop.f32.mrf.mxu0  ;;  %3903 = vmatprep.mubr.f32.mxu0 %v6577_v39  ;;  %4275 = vmatpush1.msra.mxu0 %v3514_v52  ;;  %v3498_v52 = vld [vmem:[%s7798_s3 + $0x280] sm:$0xff] }
 0x2d2   : > { %vm2445_vm6 = vcmp.ge.f32.partialorder %v2371_v53, 0.0  ;;  %v2477_v60 = vmul.f32 0.2, %v2371_v53  ;;  %v2366_v11 = vadd.f32 %v6659_v12, %v2365_v59  ;;  %4276 = vmatprep.subr.mxu0 %v6813_v57  ;;  %4072 = vmatpush2.msra.mxu1 %v3503_v31 }
 0x2d3   : > { %4277 = vmatpush2.msra.mxu0 %v3545_v14  ;;  %4073 = vmatprep.subr.mxu1 %v6813_v57  ;;  %v7051_v14 = vld [vmem:[#allocation3 + $0x191] sm:$0xff] }
 0x2d4   : > { %v2509_v3 = vsel %vm2445_vm6, %v2371_v53, %v2477_v60  ;;  %vm2444_vm7 = vcmp.ge.f32.partialorder %v2366_v11, 0.0  ;;  %v2476_v39 = vmul.f32 0.2, %v2366_v11  ;;  %3904 = vmatmul.mubr.f32.gmra.mxu0 %v6941_v63  ;;  %4278 = vmatprep.subr.mxu0 %v6813_v57 }
 0x2d5   : > { %2542 = vst [vmem:[#allocation3 + $0x228] sm:$0xff] %v2509_v3  ;;  %3908 = vmatprep.mubr.f32.mxu0 %v6638_v27  ;;  %4279 = vmatpush2.msra.mxu0 %v3544_v62  ;;  %v3542_v27 = vld [vmem:[%s7798_s3 + $0x3e0] sm:$0xff] }
 0x2d6   : > { %v2508_v5 = vsel %vm2444_vm7, %v2366_v11, %v2476_v39  ;;  %4280 = vmatprep.subr.mxu0 %v6813_v57  ;;  %v3535_v11 = vld [vmem:[%s7798_s3 + $0x3a8] sm:$0xff]  ;;  %v7062_v62 = vld [vmem:[#allocation3 + $0x199] sm:$0xff] }
 0x2d7   : > { %2541 = vst [vmem:[#allocation3 + $0x220] sm:$0xff] %v2508_v5  ;;  %3743 = vmatprep.mubr.f32.mxu1 %v2508_v5  ;;  %4281 = vmatpush2.msra.mxu0 %v3543_v6  ;;  %v3533_v5 = vld [vmem:[%s7798_s3 + $0x398] sm:$0xff] }
 0x2d8   : > { %3909 = vmatmul.mubr.f32.gmra.mxu0 %v6954_v7  ;;  %4282 = vmatprep.subr.mxu0 %v6813_v57 }
 0x2d9   : > { %3913 = vmatprep.mubr.f32.mxu0 %v6643_v30  ;;  %4283 = vmatpush2.msra.mxu0 %v3542_v27  ;;  %v2700_v27 = vld [vmem:[#allocation3 + $0x1c9] sm:$0xff] }
 0x2da   : > { %4284 = vmatprep.subr.mxu0 %v6813_v57 }
 0x2db   : > { %4285 = vmatpush2.msra.mxu0 %v3541_v16 }
 0x2dc   : > { %3914 = vmatmul.mubr.f32.gmra.mxu0 %v6969_v35  ;;  %4286 = vmatprep.subr.mxu0 %v6813_v57 }
 0x2dd   : > { %3918 = vmatprep.mubr.f32.mxu0 %v6669_v10  ;;  %v3540_v10 = vld [vmem:[%s7798_s3 + $0x3d0] sm:$0xff] }
 0x2de   : > { %v6978_v30 = vld [vmem:[#allocation3 + $0x21f] sm:$0xff]  ;;  %v6998_v32 = vld [vmem:[#allocation3 + $0x227] sm:$0xff]  ;;  %4287 = vmatpush2.msra.mxu0 %v3540_v10 }
 0x2df   : > { %v6984_v17 = vpop.f32.mrf.mxu1  ;;  %3744 = vmatmul.mubr.f32.gmra.mxu1 %v6978_v30  ;;  %4288 = vmatprep.subr.mxu0 %v6813_v57 }
 0x2e0   : > { %3919 = vmatmul.mubr.f32.gmra.mxu0 %v6987_v21  ;;  %3748 = vmatprep.mubr.f32.mxu1 %v2509_v3 }
 0x2e1   : > { %3923 = vmatprep.mubr.f32.mxu0 %v6676_v2  ;;  %v3687_v49 = vpop.f32.mrf.mxu1  ;;  %v3502_v2 = vld [vmem:[%s7798_s3 + $0x2a0] sm:$0xff]  ;;  %4289 = vmatpush2.msra.mxu0 %v3539_v40 }
 0x2e2   : > { %4074 = vmatpush2.msra.mxu1 %v3502_v2  ;;  %4290 = vmatprep.subr.mxu0 %v6813_v57  ;;  %v2702_v2 = vld [vmem:[#allocation3 + $0x1f9] sm:$0xff]  ;;  %v2703_v40 = vld [vmem:[#allocation3 + $0x221] sm:$0xff] }
 0x2e3   : > { %v7001_v34 = vpop.f32.mrf.mxu1  ;;  %3749 = vmatmul.mubr.f32.gmra.mxu1 %v6998_v32  ;;  %4075 = vmatprep.subr.mxu1 %v6813_v57 }
 0x2e4   : > { %3924 = vmatmul.mubr.f32.gmra.mxu0 %v7004_v0  ;;  %4076 = vmatpush2.msra.mxu1 %v3501_v45 }
 0x2e5   : > { %3928 = vmatprep.mubr.f32.mxu0 %v6710_v36  ;;  %v3692_v24 = vpop.f32.mrf.mxu1  ;;  %v3538_v36 = vld [vmem:[%s7798_s3 + $0x3c0] sm:$0xff]  ;;  %4077 = vmatprep.subr.mxu1 %v6813_v57 }
 0x2e6   : > { %4078 = vmatpush2.msra.mxu1 %v3500_v48  ;;  %4291 = vmatpush2.msra.mxu0 %v3538_v36 }
 0x2e7   : > { %4079 = vmatprep.subr.mxu1 %v6813_v57  ;;  %4292 = vmatprep.subr.mxu0 %v6813_v57 }
 0x2e8   : > { %3929 = vmatmul.mubr.f32.gmra.mxu0 %v7019_v1  ;;  %4080 = vmatpush2.msra.mxu1 %v3499_v51 }
 0x2e9   : > { %3933 = vmatprep.mubr.f32.mxu0 %v6721_v44  ;;  %v3537_v44 = vld [vmem:[%s7798_s3 + $0x3b8] sm:$0xff]  ;;  %4081 = vmatprep.subr.mxu1 %v6813_v57 }
 0x2ea   : > { %4082 = vmatpush2.msra.mxu1 %v3498_v52  ;;  %4293 = vmatpush2.msra.mxu0 %v3537_v44 }
 0x2eb   : > { %4294 = vmatprep.subr.mxu0 %v6813_v57  ;;  %5148 = vmatprep.subr.mxu1 %v7073_v55 }
 0x2ec   : > { %3934 = vmatmul.mubr.f32.gmra.mxu0 %v7035_v38 }
 0x2ed   : > { %3938 = vmatprep.mubr.f32.mxu0 %v6772_v20  ;;  %4295 = vmatpush2.msra.mxu0 %v3536_v42 }
 0x2ee   : > { %4296 = vmatprep.subr.mxu0 %v6813_v57 }
 0x2ef   : > { %v5055_v53 = vpop.f32.mrf.mxu0  ;;  %4297 = vmatpush2.msra.mxu0 %v3535_v11 }
 0x2f0   : > { %v2381_v58 = vadd.f32 %v6659_v12, %v5055_v53  ;;  %3939 = vmatmul.mubr.f32.gmra.mxu0 %v7051_v14  ;;  %4298 = vmatprep.subr.mxu0 %v6813_v57 }
 0x2f1   : > { %v2375_v59 = vpop.f32.mrf.mxu0  ;;  %3943 = vmatprep.mubr.f32.mxu0 %v6783_v47  ;;  %v3534_v47 = vld [vmem:[%s7798_s3 + $0x3a0] sm:$0xff] }
 0x2f2   : > { %vm2447_vm8 = vcmp.ge.f32.partialorder %v2381_v58, 0.0  ;;  %v2479_v20 = vmul.f32 0.2, %v2381_v58  ;;  %v2376_v60 = vadd.f32 %v6659_v12, %v2375_v59  ;;  %4299 = vmatpush2.msra.mxu0 %v3534_v47  ;;  %v7115_v47 = vld [vmem:[%s7797_s2] ss:$0 sm:$0xff] }
 0x2f3   : > { %4300 = vmatprep.subr.mxu0 %v6813_v57 }
 0x2f4   : > { %v2511_v3 = vsel %vm2447_vm8, %v2381_v58, %v2479_v20  ;;  %vm2446_vm9 = vcmp.ge.f32.partialorder %v2376_v60, 0.0  ;;  %v2478_v39 = vmul.f32 0.2, %v2376_v60  ;;  %3944 = vmatmul.mubr.f32.gmra.mxu0 %v7062_v62 }
 0x2f5   : > { %2544 = vst [vmem:[#allocation3 + $0x258] sm:$0xff] %v2511_v3  ;;  %3948 = vmatprep.mubr.f32.mxu0 %v6852_v13  ;;  %4301 = vmatpush2.msra.mxu0 %v3533_v5  ;;  %v3532_v13 = vld [vmem:[%s7798_s3 + $0x390] sm:$0xff] }
 0x2f6   : > { %v2510_v6 = vsel %vm2446_vm9, %v2376_v60, %v2478_v39  ;;  %4302 = vmatprep.subr.mxu0 %v6813_v57 }
 0x2f7   : > { %2543 = vst [vmem:[#allocation3 + $0x250] sm:$0xff] %v2510_v6  ;;  %3753 = vmatprep.mubr.f32.mxu1 %v2510_v6  ;;  %4303 = vmatpush2.msra.mxu0 %v3532_v13 }
 0x2f8   : > { %3949 = vmatmul.mubr.f32.gmra.mxu0 %v2699_v33  ;;  %4304 = vmatprep.subr.mxu0 %v6813_v57 }
 0x2f9   : > { %3953 = vmatprep.mubr.f32.mxu0 %v6868_v23  ;;  %4305 = vmatpush2.msra.mxu0 %v3531_v9  ;;  %v2701_v23 = vld [vmem:[#allocation3 + $0x1f1] sm:$0xff] }
 0x2fa   : > { %4306 = vmatprep.subr.mxu0 %v6813_v57 }
 0x2fc   : > { %3954 = vmatmul.mubr.f32.gmra.mxu0 %v2700_v27  ;;  %v7109_v11 = vld [vmem:[#allocation3 + $0x259] sm:$0xff] }
 0x2fd   : > { %3958 = vmatprep.mubr.f32.mxu0 %v6978_v30  ;;  %v3530_v30 = vld [vmem:[%s7798_s3 + $0x380] sm:$0xff] }
 0x2fe   : > { %v2577_v16 = vld [vmem:[#allocation3 + $0x24f] sm:$0xff]  ;;  %v2578_v49 = vld [vmem:[#allocation3 + $0x257] sm:$0xff]  ;;  %4307 = vmatpush2.msra.mxu0 %v3530_v30 }
 0x2ff   : > { %v7090_v43 = vpop.f32.mrf.mxu1  ;;  %3754 = vmatmul.mubr.f32.gmra.mxu1 %v2577_v16  ;;  %5068 = vmatprep.subr.mxu0 %v7073_v55  ;;  %v7104_v59 = vld [vmem:[#allocation3 + $0x251] sm:$0xff] }
 0x300   : > { %3959 = vmatmul.mubr.f32.gmra.mxu0 %v2701_v23  ;;  %3758 = vmatprep.mubr.f32.mxu1 %v2511_v3 }
 0x301   : > { %3963 = vmatprep.mubr.f32.mxu0 %v6998_v32  ;;  %v3697_v10 = vpop.f32.mrf.mxu1  ;;  %v2704_v32 = vld [vmem:[#allocation3 + $0x229] sm:$0xff] }
 0x303   : > { %v7097_v31 = vpop.f32.mrf.mxu1  ;;  %3759 = vmatmul.mubr.f32.gmra.mxu1 %v2578_v49 }
 0x304   : > { %3964 = vmatmul.mubr.f32.gmra.mxu0 %v2702_v2 }
 0x305   : > { %3968 = vmatprep.mubr.f32.mxu0 %v2577_v16  ;;  %v3702_v57 = vpop.f32.mrf.mxu1 }
 0x308   : > { %3969 = vmatmul.mubr.f32.gmra.mxu0 %v2703_v40 }
 0x309   : > { %3973 = vmatprep.mubr.f32.mxu0 %v2578_v49 }
 0x30c   : > { %3974 = vmatmul.mubr.f32.gmra.mxu0 %v2704_v32 }
 0x30f   : > { %v5058_v24 = vpop.f32.mrf.mxu0 }
 0x310   : > { %v2391_v45 = vadd.f32 %v6659_v12, %v5058_v24 }
 0x311   : > { %v2385_v48 = vpop.f32.mrf.mxu0 }
 0x312   : > { %vm2449_vm10 = vcmp.ge.f32.partialorder %v2391_v45, 0.0  ;;  %v2481_v36 = vmul.f32 0.2, %v2391_v45  ;;  %v2386_v51 = vadd.f32 %v6659_v12, %v2385_v48 }
 0x314   : > { %v2513_v52 = vsel %vm2449_vm10, %v2391_v45, %v2481_v36  ;;  %vm2448_vm13 = vcmp.ge.f32.partialorder %v2386_v51, 0.0  ;;  %v2480_v44 = vmul.f32 0.2, %v2386_v51 }
 0x315   : > { %2546 = vst [vmem:[#allocation3 + $0x288] sm:$0xff] %v2513_v52 }
 0x316   : > { %v2512_v42 = vsel %vm2448_vm13, %v2386_v51, %v2480_v44 }
 0x317   : > { %2545 = vst [vmem:[#allocation3 + $0x280] sm:$0xff] %v2512_v42  ;;  %3763 = vmatprep.mubr.f32.mxu1 %v2512_v42 }
 0x31c   : > { %v7130_v40 = vld [vmem:[#allocation3 + $0x289] sm:$0xff] }
 0x31e   : > { %v2769_v53 = vld [vmem:[#allocation3 + $0x27f] sm:$0xff]  ;;  %v2770_v20 = vld [vmem:[#allocation3 + $0x287] sm:$0xff] }
 0x31f   : > { %3978 = vmatprep.mubr.f32.mxu0 %v2769_v53  ;;  %v7102_v58 = vpop.f32.mrf.mxu1  ;;  %3764 = vmatmul.mubr.f32.gmra.mxu1 %v2769_v53  ;;  %v7125_v30 = vld [vmem:[#allocation3 + $0x281] sm:$0xff] }
 0x320   : > { %3979 = vmatmul.mubr.f32.gmra.mxu0 %v7104_v59  ;;  %3768 = vmatprep.mubr.f32.mxu1 %v2513_v52 }
 0x321   : > { %3983 = vmatprep.mubr.f32.mxu0 %v2770_v20  ;;  %v3707_v12 = vpop.f32.mrf.mxu1 }
 0x323   : > { %v7107_v60 = vpop.f32.mrf.mxu1  ;;  %3769 = vmatmul.mubr.f32.gmra.mxu1 %v2770_v20 }
 0x324   : > { %3984 = vmatmul.mubr.f32.gmra.mxu0 %v7109_v11 }
 0x325   : > { %v3712_v3 = vpop.f32.mrf.mxu1 }
 0x32f   : > { %v5061_v39 = vpop.f32.mrf.mxu0 }
 0x330   : > { %v2401_v5 = vadd.f32 %v7115_v47, %v5061_v39 }
 0x331   : > { %v2395_v6 = vpop.f32.mrf.mxu0 }
 0x332   : > { %vm2451_vm14 = vcmp.ge.f32.partialorder %v2401_v5, 0.0  ;;  %v2483_v33 = vmul.f32 0.2, %v2401_v5  ;;  %v2396_v13 = vadd.f32 %v7115_v47, %v2395_v6 }
 0x334   : > { %v2515_v27 = vsel %vm2451_vm14, %v2401_v5, %v2483_v33  ;;  %vm2450_vm15 = vcmp.ge.f32.partialorder %v2396_v13, 0.0  ;;  %v2482_v9 = vmul.f32 0.2, %v2396_v13  ;;  %v2809_v33 = vld [vmem:[#allocation3 + $0x40] sm:$0xff] }
 0x335   : > { %2548 = vst [vmem:[#allocation3 + $0x2b8] sm:$0xff] %v2515_v27 }
 0x336   : > { %v7119_v16 = vsel %vm2450_vm15, %v2396_v13, %v2482_v9  ;;  %v7165_v13 = vld [vmem:[%s7798_s3 + $0x470] sm:$0xff]  ;;  %v7172_v9 = vld [vmem:[%s7798_s3 + $0x468] sm:$0xff] }
 0x337   : > { %2547 = vst [vmem:[#allocation3 + $0x2b0] sm:$0xff] %v7119_v16  ;;  %3773 = vmatprep.mubr.f32.mxu1 %v7119_v16 }
 0x33c   : > { %v7156_v39 = vld [vmem:[#allocation3 + $0x2b9] sm:$0xff] }
 0x33e   : > { %v2771_v23 = vld [vmem:[#allocation3 + $0x2af] sm:$0xff]  ;;  %v2772_v49 = vld [vmem:[#allocation3 + $0x2b7] sm:$0xff] }
 0x33f   : > { %3988 = vmatprep.mubr.f32.mxu0 %v2771_v23  ;;  %v7123_v10 = vpop.f32.mrf.mxu1  ;;  %3774 = vmatmul.mubr.f32.gmra.mxu1 %v2771_v23  ;;  %v7146_v20 = vld [vmem:[#allocation3 + $0x2b1] sm:$0xff]  ;;  %v7179_v23 = vld [vmem:[%s7798_s3 + $0x460] sm:$0xff] }
 0x340   : > { %3989 = vmatmul.mubr.f32.gmra.mxu0 %v7125_v30  ;;  %3778 = vmatprep.mubr.f32.mxu1 %v2515_v27 }
 0x341   : > { %3993 = vmatprep.mubr.f32.mxu0 %v2772_v49  ;;  %v3717_v2 = vpop.f32.mrf.mxu1 }
 0x342   : > { %v7196_v2 = vld [vmem:[%s7798_s3 + $0x450] sm:$0xff] }
 0x343   : > { %v7128_v57 = vpop.f32.mrf.mxu1  ;;  %3779 = vmatmul.mubr.f32.gmra.mxu1 %v2772_v49  ;;  %v7190_v49 = vld [vmem:[#allocation3 + $0x70] sm:$0xff] }
 0x344   : > { %3994 = vmatmul.mubr.f32.gmra.mxu0 %v7130_v40 }
 0x345   : > { %v3722_v32 = vpop.f32.mrf.mxu1 }
 0x34c   : > { %v5064_v24 = vpop.f32.mrf.mxu0 }
 0x34d   : > { %v2411_v45 = vadd.f32 %v7115_v47, %v5064_v24 }
 0x34e   : > { %v2405_v48 = vpop.f32.mrf.mxu0 }
 0x34f   : > { %vm2453_vm0 = vcmp.ge.f32.partialorder %v2411_v45, 0.0  ;;  %v2485_v36 = vmul.f32 0.2, %v2411_v45  ;;  %v2406_v51 = vadd.f32 %v7115_v47, %v2405_v48  ;;  %v7213_v48 = vld [vmem:[%s7798_s3 + $0x448] sm:$0xff] }
 0x351   : > { %v7135_v52 = vsel %vm2453_vm0, %v2411_v45, %v2485_v36  ;;  %vm2452_vm1 = vcmp.ge.f32.partialorder %v2406_v51, 0.0  ;;  %v2484_v44 = vmul.f32 0.2, %v2406_v51 }
 0x352   : > { %7810 = vst [vmem:[#allocation6_spill] sm:$0xff] %v7135_v52  ;;  %2550 = vst [vmem:[#allocation3 + $0x2e8] sm:$0xff] %v7135_v52 }
 0x353   : > { %v7138_v42 = vsel %vm2452_vm1, %v2406_v51, %v2484_v44 }
 0x354   : > { %2549 = vst [vmem:[#allocation3 + $0x2e0] sm:$0xff] %v7138_v42  ;;  %3783 = vmatprep.mubr.f32.mxu1 %v7138_v42 }
 0x35b   : > { %v7142_v53 = vld [vmem:[#allocation3 + $0x2df] sm:$0xff]  ;;  %v7150_v12 = vld [vmem:[#allocation3 + $0x2e7] sm:$0xff] }
 0x35c   : > { %7811 = vst [vmem:[#allocation7_spill] sm:$0xff] %v7142_v53  ;;  %3998 = vmatprep.mubr.f32.mxu0 %v7142_v53  ;;  %3784 = vmatmul.mubr.f32.gmra.mxu1 %v7142_v53  ;;  %7812 = vst [vmem:[#allocation8_spill] sm:$0xff] %v7150_v12 }
 0x35d   : > { %3999 = vmatmul.mubr.f32.gmra.mxu0 %v7146_v20  ;;  %3788 = vmatprep.mubr.f32.mxu1 %v7135_v52  ;;  %v7337_v52 = vld [vmem:[#allocation3 + $0x100] sm:$0xff] }
 0x35e   : > { %4003 = vmatprep.mubr.f32.mxu0 %v7150_v12 }
 0x35f   : > { %v7153_v3 = vpop.f32.mrf.mxu1 }
 0x360   : > { %3789 = vmatmul.mubr.f32.gmra.mxu1 %v7150_v12 }
 0x361   : > { %4004 = vmatmul.mubr.f32.gmra.mxu0 %v7156_v39  ;;  %v3727_v5 = vpop.f32.mrf.mxu1  ;;  %4083 = vmatprep.mubr.f32.mxu1 %v6827_v54  ;;  %v2810_v54 = vld [vmem:[#allocation3 + $0x48] sm:$0xff] }
 0x362   : > { %v7217_v5 = vld [vmem:[#allocation3 + $0x78] sm:$0xff] }
 0x363   : > { %v7160_v6 = vpop.f32.mrf.mxu1 }
 0x364   : > { %4084 = vmatmul.mubr.f32.vlgmr.msra.gmra.mxu1 %v2809_v33 }
 0x365   : > { %v3732_v27 = vpop.f32.mrf.mxu1  ;;  %4088 = vmatprep.mubr.f32.mxu1 %v6841_v8  ;;  %5164 = vmatpush3.msra.mxu1 %v7073_v55  ;;  %v7187_v8 = vld [vmem:[%s7798_s3 + $0x458] sm:$0xff] }
 0x366   : > { %5149 = vmatprep.subr.mxu1 %v7165_v13 }
 0x367   : > { %5165 = vmatpush3.msra.mxu1 %v7165_v13 }
 0x368   : > { %4089 = vmatmul.mubr.f32.gmra.mxu1 %v2810_v54  ;;  %5150 = vmatprep.subr.mxu1 %v7172_v9 }
 0x369   : > { %4093 = vmatprep.mubr.f32.mxu1 %v6858_v41  ;;  %5166 = vmatpush3.msra.mxu1 %v7172_v9  ;;  %v7201_v41 = vld [vmem:[%s7799_s4] ss:$0 sm:$0xff] }
 0x36a   : > { %5151 = vmatprep.subr.mxu1 %v7179_v23  ;;  %v3636_v24 = vadd.f32 %v7201_v41, %v6354_v18  ;;  %v7223_v18 = vld [vmem:[%s7798_s3 + $0x440] sm:$0xff] }
 0x36b   : > { %5167 = vmatpush3.msra.mxu1 %v7179_v23 }
 0x36c   : > { %v5067_v32 = vpop.f32.mrf.mxu0  ;;  %4094 = vmatmul.mubr.f32.gmra.mxu1 %v7190_v49  ;;  %5152 = vmatprep.subr.mxu1 %v7187_v8 }
 0x36d   : > { %v2421_v45 = vadd.f32 %v7115_v47, %v5067_v32  ;;  %4098 = vmatprep.mubr.f32.mxu1 %v6877_v28  ;;  %5168 = vmatpush3.msra.mxu1 %v7187_v8  ;;  %v3641_v28 = vadd.f32 %v7201_v41, %v6367_v25  ;;  %v7238_v32 = vld [vmem:[%s7798_s3 + $0x438] sm:$0xff] }
 0x36e   : > { %v2415_v36 = vpop.f32.mrf.mxu0  ;;  %5153 = vmatprep.subr.mxu1 %v7196_v2 }
 0x36f   : > { %vm2455_vm11 = vcmp.ge.f32.partialorder %v2421_v45, 0.0  ;;  %v2487_v51 = vmul.f32 0.2, %v2421_v45  ;;  %v2416_v44 = vadd.f32 %v7115_v47, %v2415_v36  ;;  %5169 = vmatpush3.msra.mxu1 %v7196_v2  ;;  %v7244_v36 = vld [vmem:[#allocation3 + $0xa0] sm:$0xff] }
 0x370   : > { %v3860_v33 = vpop.f32.mrf.mxu0  ;;  %4099 = vmatmul.mubr.f32.gmra.mxu1 %v7217_v5  ;;  %5154 = vmatprep.subr.mxu1 %v7213_v48 }
 0x371   : > { %v7229_v27 = vsel %vm2455_vm11, %v2421_v45, %v2487_v51  ;;  %vm2454_vm12 = vcmp.ge.f32.partialorder %v2416_v44, 0.0  ;;  %v2486_v47 = vmul.f32 0.2, %v2416_v44  ;;  %v7231_v54 = vadd.f32 %v3860_v33, %v3636_v24  ;;  %4103 = vmatprep.mubr.f32.mxu1 %v6892_v19  ;;  %5170 = vmatpush3.msra.mxu1 %v7213_v48  ;;  %v7250_v19 = vld [vmem:[%s7798_s3 + $0x430] sm:$0xff] }
 0x372   : > { %7813 = vst [vmem:[#allocation9_spill] sm:$0xff] %v7229_v27  ;;  %2552 = vst [vmem:[#allocation3 + $0x318] sm:$0xff] %v7229_v27  ;;  %v3862_v25 = vpop.f32.mrf.mxu0  ;;  %5155 = vmatprep.subr.mxu1 %v7223_v18  ;;  %v3661_v27 = vadd.f32 %v7201_v41, %v6724_v26  ;;  %v3666_v26 = vadd.f32 %v7201_v41, %v6775_v22 }
 0x373   : > { %7814 = vst [vmem:[#allocation10_spill] sm:$0xff] %v7231_v54  ;;  %v7242_v45 = vsel %vm2454_vm12, %v2416_v44, %v2486_v47  ;;  %5171 = vmatpush3.msra.mxu1 %v7223_v18  ;;  %v7262_v44 = vld [vmem:[%s7798_s3 + $0x428] sm:$0xff]  ;;  %v3646_v47 = vadd.f32 %v7201_v41, %v6672_v61  ;;  %v7286_v54 = vld [vmem:[#allocation3 + $0xd0] sm:$0xff] }
 0x374   : > { %7815 = vst [vmem:[#allocation11_spill] sm:$0xff] %v7242_v45  ;;  %2551 = vst [vmem:[#allocation3 + $0x310] sm:$0xff] %v7242_v45  ;;  %v3865_v24 = vpop.f32.mrf.mxu0  ;;  %4104 = vmatmul.mubr.f32.gmra.mxu1 %v7244_v36  ;;  %5156 = vmatprep.subr.mxu1 %v7238_v32  ;;  %v7267_v25 = vld [vmem:[#allocation3 + $0xa8] sm:$0xff] }
 0x375   : > { %v7255_v51 = vadd.f32 %v3865_v24, %v3641_v28  ;;  %4108 = vmatprep.mubr.f32.mxu1 %v6907_v50  ;;  %5172 = vmatpush3.msra.mxu1 %v7238_v32  ;;  %v7273_v50 = vld [vmem:[%s7798_s3 + $0x420] sm:$0xff] }
 0x376   : > { %v3867_v33 = vpop.f32.mrf.mxu0  ;;  %5157 = vmatprep.subr.mxu1 %v7250_v19 }
 0x377   : > { %7816 = vst [vmem:[#allocation12_spill] sm:$0xff] %v7255_v51  ;;  %5173 = vmatpush3.msra.mxu1 %v7250_v19  ;;  %v3651_v33 = vadd.f32 %v7201_v41, %v6679_v4 }
 0x378   : > { %v3870_v28 = vpop.f32.mrf.mxu0  ;;  %4109 = vmatmul.mubr.f32.gmra.mxu1 %v7267_v25  ;;  %5158 = vmatprep.subr.mxu1 %v7262_v44 }
 0x379   : > { %v7277_v24 = vadd.f32 %v3870_v28, %v3646_v47  ;;  %4113 = vmatprep.mubr.f32.mxu1 %v6923_v56  ;;  %5174 = vmatpush3.msra.mxu1 %v7262_v44  ;;  %v7292_v47 = vld [vmem:[%s7798_s3 + $0x418] sm:$0xff]  ;;  %v7295_v28 = vld [vmem:[#allocation3 + $0x2e1] sm:$0xff] }
 0x37a   : > { %v3872_v61 = vpop.f32.mrf.mxu0  ;;  %5159 = vmatprep.subr.mxu1 %v7273_v50 }
 0x37b   : > { %7817 = vst [vmem:[#allocation13_spill] sm:$0xff] %v7277_v24  ;;  %v7284_v51 = vld [vmem:[#allocation3 + $0x30f] sm:$0xff]  ;;  %5175 = vmatpush3.msra.mxu1 %v7273_v50  ;;  %v7301_v4 = vld [vmem:[#allocation3 + $0x317] sm:$0xff] }
 0x37c   : > { %7818 = vst [vmem:[#allocation14_spill] sm:$0xff] %v7284_v51  ;;  %v3875_v56 = vpop.f32.mrf.mxu0  ;;  %4008 = vmatprep.mubr.f32.mxu0 %v7284_v51  ;;  %4114 = vmatmul.mubr.f32.gmra.mxu1 %v7286_v54  ;;  %7820 = vst [vmem:[#allocation16_spill] sm:$0xff] %v7301_v4  ;;  %v7307_v24 = vld [vmem:[%s7798_s3 + $0x410] sm:$0xff] }
 0x37d   : > { %v7298_v61 = vadd.f32 %v3875_v56, %v3651_v33  ;;  %4009 = vmatmul.mubr.f32.gmra.mxu0 %v7295_v28  ;;  %4118 = vmatprep.mubr.f32.mxu1 %v6941_v63  ;;  %v3656_v33 = vadd.f32 %v7201_v41, %v6713_v37  ;;  %v7318_v51 = vld [vmem:[#allocation3 + $0x2e9] sm:$0xff] }
 0x37e   : > { %v3877_v12 = vpop.f32.mrf.mxu0  ;;  %4013 = vmatprep.mubr.f32.mxu0 %v7301_v4  ;;  %5160 = vmatprep.subr.mxu1 %v7292_v47 }
 0x37f   : > { %7819 = vst [vmem:[#allocation15_spill] sm:$0xff] %v7298_v61  ;;  %v7313_v56 = vpop.f32.mrf.mxu1  ;;  %v7315_v61 = vld [vmem:[#allocation3 + $0xd8] sm:$0xff]  ;;  %5176 = vmatpush3.msra.mxu1 %v7292_v47  ;;  %v7325_v12 = vld [vmem:[%s7798_s3 + $0x408] sm:$0xff] }
 0x380   : > { %v3880_v63 = vpop.f32.mrf.mxu0  ;;  %4119 = vmatmul.mubr.f32.gmra.mxu1 %v7315_v61  ;;  %5161 = vmatprep.subr.mxu1 %v7307_v24 }
 0x381   : > { %v7327_v4 = vadd.f32 %v3880_v63, %v3656_v33  ;;  %4014 = vmatmul.mubr.f32.gmra.mxu0 %v7318_v51  ;;  %v3737_v37 = vpop.f32.mrf.mxu1  ;;  %4123 = vmatprep.mubr.f32.mxu1 %v6954_v7  ;;  %v2938_v63 = vld [vmem:[#allocation3 + $0x6f] sm:$0xff] }
 0x382   : > { %v3882_v53 = vpop.f32.mrf.mxu0  ;;  %4308 = vmatprep.mubr.f32.mxu0 %v7190_v49  ;;  %5177 = vmatpush3.msra.mxu1 %v7307_v24  ;;  %v7348_v49 = vld [vmem:[#allocation3 + $0x108] sm:$0xff] }
 0x383   : > { %v7335_v45 = vpop.f32.mrf.mxu1  ;;  %5162 = vmatprep.subr.mxu1 %v7325_v12 }
 0x384   : > { %v3885_v33 = vpop.f32.mrf.mxu0  ;;  %4124 = vmatmul.mubr.f32.gmra.mxu1 %v7337_v52 }
 0x385   : > { %v7341_v37 = vadd.f32 %v3885_v33, %v3661_v27  ;;  %4309 = vmatmul.mubr.f32.vlgmr.msra.gmra.mxu0 %v2938_v63  ;;  %v3742_v7 = vpop.f32.mrf.mxu1  ;;  %4128 = vmatprep.mubr.f32.mxu1 %v6969_v35  ;;  %v2939_v33 = vld [vmem:[#allocation3 + $0x77] sm:$0xff]  ;;  %v7357_v35 = vld [vmem:[%s7798_s3 + $0x400] sm:$0xff] }
 0x386   : > { %5069 = vmatpush3.msra.mxu0 %v7073_v55  ;;  %v3887_v53 = vpop.f32.mrf.mxu0  ;;  %4313 = vmatprep.mubr.f32.mxu0 %v7217_v5  ;;  %v3671_v5 = vadd.f32 %v7201_v41, %v6786_v29  ;;  %v7366_v63 = vld [vmem:[#allocation3 + $0x130] sm:$0xff]  ;;  %v2940_v7 = vld [vmem:[#allocation3 + $0x9f] sm:$0xff]  ;;  %v3676_v29 = vadd.f32 %v7201_v41, %v6855_v15  ;;  %v3681_v15 = vadd.f32 %v7201_v41, %v6874_v46 }
 0x387   : > { %5070 = vmatprep.subr.mxu0 %v7165_v13  ;;  %5178 = vmatpush3.msra.mxu1 %v7325_v12  ;;  %v3686_v46 = vadd.f32 %v7201_v41, %v6984_v17  ;;  %v3691_v17 = vadd.f32 %v7201_v41, %v7001_v34  ;;  %v3696_v34 = vadd.f32 %v7201_v41, %v7090_v43 }
 0x388   : > { %v3890_v27 = vpop.f32.mrf.mxu0  ;;  %4129 = vmatmul.mubr.f32.gmra.mxu1 %v7348_v49  ;;  %5071 = vmatpush3.msra.mxu0 %v7165_v13 }
 0x389   : > { %v7359_v55 = vadd.f32 %v3890_v27, %v3666_v26  ;;  %4314 = vmatmul.mubr.f32.gmra.mxu0 %v2939_v33  ;;  %4133 = vmatprep.mubr.f32.mxu1 %v6987_v21  ;;  %v2941_v26 = vld [vmem:[#allocation3 + $0xa7] sm:$0xff] }
 0x38a   : > { %v3892_v22 = vpop.f32.mrf.mxu0  ;;  %4318 = vmatprep.mubr.f32.mxu0 %v7244_v36  ;;  %5072 = vmatprep.subr.mxu0 %v7172_v9 }
 0x38b   : > { %5073 = vmatpush3.msra.mxu0 %v7172_v9  ;;  %5163 = vmatprep.subr.mxu1 %v7357_v35  ;;  %v7379_v9 = vld [vmem:[#allocation3 + $0x138] sm:$0xff] }
 0x38c   : > { %v3895_v13 = vpop.f32.mrf.mxu0  ;;  %4134 = vmatmul.mubr.f32.gmra.mxu1 %v7366_v63  ;;  %5074 = vmatprep.subr.mxu0 %v7179_v23  ;;  %v2943_v22 = vld [vmem:[#allocation3 + $0xd7] sm:$0xff] }
 0x38d   : > { %v7372_v21 = vadd.f32 %v3895_v13, %v3671_v5  ;;  %4319 = vmatmul.mubr.f32.gmra.mxu0 %v2940_v7  ;;  %4138 = vmatprep.mubr.f32.mxu1 %v7004_v0 }
 0x38e   : > { %v3897_v36 = vpop.f32.mrf.mxu0  ;;  %4323 = vmatprep.mubr.f32.mxu0 %v7267_v25  ;;  %5075 = vmatpush3.msra.mxu0 %v7179_v23  ;;  %v7392_v25 = vld [vmem:[#allocation3 + $0x160] sm:$0xff] }
 0x38f   : > { %5076 = vmatprep.subr.mxu0 %v7187_v8  ;;  %5179 = vmatpush3.msra.mxu1 %v7357_v35  ;;  %v2945_v36 = vld [vmem:[#allocation3 + $0x107] sm:$0xff] }
 0x390   : > { %v3900_v53 = vpop.f32.mrf.mxu0  ;;  %4139 = vmatmul.mubr.f32.gmra.mxu1 %v7379_v9  ;;  %5077 = vmatpush3.msra.mxu0 %v7187_v8  ;;  %v2942_v8 = vld [vmem:[#allocation3 + $0xcf] sm:$0xff] }
 0x391   : > { %v7385_v0 = vadd.f32 %v3900_v53, %v3676_v29  ;;  %4324 = vmatmul.mubr.f32.gmra.mxu0 %v2941_v26  ;;  %4143 = vmatprep.mubr.f32.mxu1 %v7019_v1  ;;  %v7434_v29 = vld [vmem:[#allocation3 + $0x1c1] sm:$0xff] }
 0x392   : > { %v3902_v23 = vpop.f32.mrf.mxu0  ;;  %4328 = vmatprep.mubr.f32.mxu0 %v7286_v54  ;;  %5078 = vmatprep.subr.mxu0 %v7196_v2  ;;  %v7446_v26 = vld [vmem:[#allocation3 + $0x1c0] sm:$0xff] }
 0x393   : > { %5079 = vmatpush3.msra.mxu0 %v7196_v2  ;;  %v7404_v2 = vld [vmem:[#allocation3 + $0x168] sm:$0xff] }
 0x394   : > { %v3905_v27 = vpop.f32.mrf.mxu0  ;;  %4144 = vmatmul.mubr.f32.gmra.mxu1 %v7392_v25  ;;  %5080 = vmatprep.subr.mxu0 %v7213_v48  ;;  %v2946_v23 = vld [vmem:[#allocation3 + $0x12f] sm:$0xff] }
 0x395   : > { %v7397_v33 = vadd.f32 %v3905_v27, %v3681_v15  ;;  %4329 = vmatmul.mubr.f32.gmra.mxu0 %v2942_v8  ;;  %4148 = vmatprep.mubr.f32.mxu1 %v7035_v38  ;;  %v7450_v15 = vld [vmem:[#allocation3 + $0x1c9] sm:$0xff] }
 0x396   : > { %v3907_v1 = vpop.f32.mrf.mxu0  ;;  %4333 = vmatprep.mubr.f32.mxu0 %v7315_v61  ;;  %5081 = vmatpush3.msra.mxu0 %v7213_v48  ;;  %v7416_v48 = vld [vmem:[#allocation3 + $0x190] sm:$0xff]  ;;  %v7460_v8 = vld [vmem:[#allocation3 + $0x1c8] sm:$0xff] }
 0x397   : > { %5082 = vmatprep.subr.mxu0 %v7223_v18 }
 0x398   : > { %v3910_v54 = vpop.f32.mrf.mxu0  ;;  %4149 = vmatmul.mubr.f32.gmra.mxu1 %v7404_v2  ;;  %5083 = vmatpush3.msra.mxu0 %v7223_v18  ;;  %v2944_v18 = vld [vmem:[#allocation3 + $0xff] sm:$0xff] }
 0x399   : > { %v7409_v5 = vadd.f32 %v3910_v54, %v3686_v46  ;;  %4334 = vmatmul.mubr.f32.gmra.mxu0 %v2943_v22  ;;  %4153 = vmatprep.mubr.f32.mxu1 %v7051_v14  ;;  %v2947_v46 = vld [vmem:[#allocation3 + $0x137] sm:$0xff] }
 0x39a   : > { %v3912_v38 = vpop.f32.mrf.mxu0  ;;  %4338 = vmatprep.mubr.f32.mxu0 %v7337_v52  ;;  %5084 = vmatprep.subr.mxu0 %v7238_v32  ;;  %v7464_v54 = vld [vmem:[#allocation3 + $0x1f1] sm:$0xff] }
 0x39b   : > { %5085 = vmatpush3.msra.mxu0 %v7238_v32  ;;  %v7430_v32 = vld [vmem:[#allocation3 + $0x198] sm:$0xff] }
 0x39c   : > { %v3915_v61 = vpop.f32.mrf.mxu0  ;;  %4154 = vmatmul.mubr.f32.gmra.mxu1 %v7416_v48  ;;  %5086 = vmatprep.subr.mxu0 %v7250_v19 }
 0x39d   : > { %v7421_v13 = vadd.f32 %v3915_v61, %v3691_v17  ;;  %4339 = vmatmul.mubr.f32.gmra.mxu0 %v2944_v18  ;;  %4158 = vmatprep.mubr.f32.mxu1 %v7062_v62  ;;  %v7478_v17 = vld [vmem:[#allocation3 + $0x1f9] sm:$0xff] }
 0x39e   : > { %v3917_v14 = vpop.f32.mrf.mxu0  ;;  %4343 = vmatprep.mubr.f32.mxu0 %v7348_v49  ;;  %5087 = vmatpush3.msra.mxu0 %v7250_v19  ;;  %v3701_v49 = vadd.f32 %v7201_v41, %v7097_v31 }
 0x39f   : > { %v7428_v52 = vpop.f32.mrf.mxu1  ;;  %5088 = vmatprep.subr.mxu0 %v7262_v44  ;;  %v2949_v14 = vld [vmem:[#allocation3 + $0x167] sm:$0xff] }
 0x3a0   : > { %v3920_v7 = vpop.f32.mrf.mxu0  ;;  %4159 = vmatmul.mubr.f32.gmra.mxu1 %v7430_v32  ;;  %5089 = vmatpush3.msra.mxu0 %v7262_v44 }
 0x3a1   : > { %v7437_v62 = vadd.f32 %v3920_v7, %v3696_v34  ;;  %4344 = vmatmul.mubr.f32.gmra.mxu0 %v2945_v36  ;;  %v3747_v19 = vpop.f32.mrf.mxu1  ;;  %4163 = vmatprep.mubr.f32.mxu1 %v7434_v29  ;;  %v7491_v34 = vld [vmem:[#allocation3 + $0x221] sm:$0xff] }
 0x3a2   : > { %v3922_v43 = vpop.f32.mrf.mxu0  ;;  %4348 = vmatprep.mubr.f32.mxu0 %v7366_v63  ;;  %5090 = vmatprep.subr.mxu0 %v7273_v50  ;;  %v2950_v19 = vld [vmem:[#allocation3 + $0x18f] sm:$0xff] }
 0x3a3   : > { %v7444_v53 = vpop.f32.mrf.mxu1  ;;  %5091 = vmatpush3.msra.mxu0 %v7273_v50  ;;  %v3706_v50 = vadd.f32 %v7201_v41, %v7102_v58  ;;  %v3711_v58 = vadd.f32 %v7201_v41, %v7107_v60  ;;  %v3716_v60 = vadd.f32 %v7201_v41, %v7123_v10  ;;  %v2829_v10 = vld [vmem:[#allocation3 + $0x220] sm:$0xff]  ;;  %v7499_v43 = vld [vmem:[#allocation3 + $0x229] sm:$0xff] }
 0x3a4   : > { %v3925_v44 = vpop.f32.mrf.mxu0  ;;  %4164 = vmatmul.mubr.f32.gmra.mxu1 %v7446_v26  ;;  %5092 = vmatprep.subr.mxu0 %v7292_v47 }
 0x3a5   : > { %v7453_v63 = vadd.f32 %v3925_v44, %v3701_v49  ;;  %4349 = vmatmul.mubr.f32.gmra.mxu0 %v2946_v23  ;;  %v3752_v27 = vpop.f32.mrf.mxu1  ;;  %4168 = vmatprep.mubr.f32.mxu1 %v7450_v15  ;;  %v2830_v23 = vld [vmem:[#allocation3 + $0x228] sm:$0xff] }
 0x3a6   : > { %v3927_v31 = vpop.f32.mrf.mxu0  ;;  %4353 = vmatprep.mubr.f32.mxu0 %v7379_v9  ;;  %5093 = vmatpush3.msra.mxu0 %v7292_v47  ;;  %v7474_v9 = vld [vmem:[#allocation3 + $0x1f0] sm:$0xff] }
 0x3a7   : > { %5094 = vmatprep.subr.mxu0 %v7307_v24 }
 0x3a8   : > { %v3930_v1 = vpop.f32.mrf.mxu0  ;;  %4169 = vmatmul.mubr.f32.gmra.mxu1 %v7460_v8  ;;  %5095 = vmatpush3.msra.mxu0 %v7307_v24  ;;  %v2948_v24 = vld [vmem:[#allocation3 + $0x15f] sm:$0xff] }
 0x3a9   : > { %v7467_v22 = vadd.f32 %v3930_v1, %v3706_v50  ;;  %4354 = vmatmul.mubr.f32.gmra.mxu0 %v2947_v46  ;;  %4173 = vmatprep.mubr.f32.mxu1 %v7464_v54  ;;  %v3731_v1 = vadd.f32 %v7201_v41, %v7160_v6  ;;  %v2831_v46 = vld [vmem:[#allocation3 + $0x250] sm:$0xff]  ;;  %v2953_v6 = vld [vmem:[#allocation3 + $0x1c7] sm:$0xff] }
 0x3aa   : > { %v3932_v47 = vpop.f32.mrf.mxu0  ;;  %4358 = vmatprep.mubr.f32.mxu0 %v7392_v25  ;;  %5096 = vmatprep.subr.mxu0 %v7325_v12 }
 0x3ab   : > { %5097 = vmatpush3.msra.mxu0 %v7325_v12  ;;  %v7488_v12 = vld [vmem:[#allocation3 + $0x1f8] sm:$0xff] }
 0x3ac   : > { %v3935_v38 = vpop.f32.mrf.mxu0  ;;  %4174 = vmatmul.mubr.f32.gmra.mxu1 %v7474_v9  ;;  %5098 = vmatprep.subr.mxu0 %v7357_v35  ;;  %v2952_v47 = vld [vmem:[#allocation3 + $0x1bf] sm:$0xff] }
 0x3ad   : > { %v7481_v61 = vadd.f32 %v3935_v38, %v3711_v58  ;;  %4359 = vmatmul.mubr.f32.gmra.mxu0 %v2948_v24  ;;  %4178 = vmatprep.mubr.f32.mxu1 %v7478_v17 }
 0x3ae   : > { %v3937_v25 = vpop.f32.mrf.mxu0  ;;  %4363 = vmatprep.mubr.f32.mxu0 %v7404_v2  ;;  %5099 = vmatpush3.msra.mxu0 %v7357_v35  ;;  %v3721_v35 = vadd.f32 %v7201_v41, %v7128_v57  ;;  %v2951_v57 = vld [vmem:[#allocation3 + $0x197] sm:$0xff] }
 0x3b0   : > { %v3940_v18 = vpop.f32.mrf.mxu0  ;;  %4179 = vmatmul.mubr.f32.gmra.mxu1 %v7488_v12 }
 0x3b1   : > { %v7493_v7 = vadd.f32 %v3940_v18, %v3716_v60  ;;  %4364 = vmatmul.mubr.f32.gmra.mxu0 %v2949_v14  ;;  %4183 = vmatprep.mubr.f32.mxu1 %v7491_v34 }
 0x3b2   : > { %v3942_v36 = vpop.f32.mrf.mxu0  ;;  %4368 = vmatprep.mubr.f32.mxu0 %v7416_v48  ;;  %v3726_v48 = vadd.f32 %v7201_v41, %v7153_v3 }
 0x3b3   : > { %v2954_v36 = vld [vmem:[#allocation3 + $0x1ef] sm:$0xff] }
 0x3b4   : > { %v3945_v2 = vpop.f32.mrf.mxu0  ;;  %4184 = vmatmul.mubr.f32.gmra.mxu1 %v2829_v10 }
 0x3b5   : > { %v7501_v49 = vadd.f32 %v3945_v2, %v3721_v35  ;;  %4369 = vmatmul.mubr.f32.gmra.mxu0 %v2950_v19  ;;  %4188 = vmatprep.mubr.f32.mxu1 %v7499_v43 }
 0x3b6   : > { %v3947_v44 = vpop.f32.mrf.mxu0  ;;  %4373 = vmatprep.mubr.f32.mxu0 %v7430_v32 }
 0x3b7   : > { %v2955_v44 = vld [vmem:[#allocation3 + $0x1f7] sm:$0xff] }
 0x3b8   : > { %v3950_v27 = vpop.f32.mrf.mxu0  ;;  %4189 = vmatmul.mubr.f32.gmra.mxu1 %v2830_v23 }
 0x3b9   : > { %v7507_v31 = vadd.f32 %v3950_v27, %v3726_v48  ;;  %4374 = vmatmul.mubr.f32.gmra.mxu0 %v2951_v57  ;;  %4193 = vmatprep.mubr.f32.mxu1 %v7104_v59  ;;  %v3736_v59 = vadd.f32 %v7201_v41, %v7313_v56  ;;  %v2833_v56 = vld [vmem:[#allocation3 + $0x280] sm:$0xff] }
 0x3ba   : > { %v3952_v50 = vpop.f32.mrf.mxu0  ;;  %4378 = vmatprep.mubr.f32.mxu0 %v7446_v26  ;;  %v2832_v26 = vld [vmem:[#allocation3 + $0x258] sm:$0xff] }
 0x3bc   : > { %v3955_v32 = vpop.f32.mrf.mxu0  ;;  %4194 = vmatmul.mubr.f32.gmra.mxu1 %v2831_v46 }
 0x3bd   : > { %v7513_v3 = vadd.f32 %v3955_v32, %v3731_v1  ;;  %4379 = vmatmul.mubr.f32.gmra.mxu0 %v2952_v47  ;;  %4198 = vmatprep.mubr.f32.mxu1 %v7109_v11  ;;  %v3741_v11 = vadd.f32 %v7201_v41, %v7335_v45  ;;  %v2836_v1 = vld [vmem:[#allocation3 + $0x2b8] sm:$0xff]  ;;  %v2957_v32 = vld [vmem:[#allocation3 + $0x227] sm:$0xff] }
 0x3be   : > { %v3957_v58 = vpop.f32.mrf.mxu0  ;;  %4383 = vmatprep.mubr.f32.mxu0 %v7460_v8 }
 0x3bf   : > { %v7519_v38 = vpop.f32.mrf.mxu1 }
 0x3c0   : > { %v3960_v24 = vpop.f32.mrf.mxu0  ;;  %4199 = vmatmul.mubr.f32.gmra.mxu1 %v2832_v26 }
 0x3c1   : > { %v7521_v25 = vadd.f32 %v3960_v24, %v3736_v59  ;;  %4384 = vmatmul.mubr.f32.gmra.mxu0 %v2953_v6  ;;  %v3757_v60 = vpop.f32.mrf.mxu1  ;;  %4203 = vmatprep.mubr.f32.mxu1 %v7125_v30  ;;  %v3746_v30 = vadd.f32 %v7201_v41, %v7428_v52  ;;  %v7823_v59 = vld [vmem:[#allocation9_spill] sm:$0xff] }
 0x3c2   : > { %v3962_v18 = vpop.f32.mrf.mxu0  ;;  %4388 = vmatprep.mubr.f32.mxu0 %v7474_v9  ;;  %v2834_v9 = vld [vmem:[#allocation3 + $0x288] sm:$0xff]  ;;  %v3078_v24 = vld [vmem:[#allocation3 + $0x191] sm:$0xff] }
 0x3c3   : > { %v7527_v8 = vpop.f32.mrf.mxu1  ;;  %v3026_v18 = vld [vmem:[#allocation3 + $0x2b0] sm:$0xff] }
 0x3c4   : > { %v3965_v14 = vpop.f32.mrf.mxu0  ;;  %4204 = vmatmul.mubr.f32.gmra.mxu1 %v2833_v56 }
 0x3c5   : > { %v7529_v35 = vadd.f32 %v3965_v14, %v3741_v11  ;;  %4389 = vmatmul.mubr.f32.gmra.mxu0 %v2954_v36  ;;  %v3762_v2 = vpop.f32.mrf.mxu1  ;;  %4208 = vmatprep.mubr.f32.mxu1 %v7130_v40  ;;  %v3751_v40 = vadd.f32 %v7201_v41, %v7444_v53  ;;  %v2959_v53 = vld [vmem:[#allocation3 + $0x257] sm:$0xff] }
 0x3c6   : > { %v3967_v19 = vpop.f32.mrf.mxu0  ;;  %4393 = vmatprep.mubr.f32.mxu0 %v7488_v12  ;;  %v2956_v12 = vld [vmem:[#allocation3 + $0x21f] sm:$0xff]  ;;  %v2962_v2 = vld [vmem:[#allocation3 + $0x2af] sm:$0xff] }
 0x3c7   : > { %v3079_v36 = vld [vmem:[#allocation3 + $0x199] sm:$0xff] }
 0x3c8   : > { %v3970_v45 = vpop.f32.mrf.mxu0  ;;  %4209 = vmatmul.mubr.f32.gmra.mxu1 %v2834_v9 }
 0x3c9   : > { %v7535_v48 = vadd.f32 %v3970_v45, %v3746_v30  ;;  %4394 = vmatmul.mubr.f32.gmra.mxu0 %v2955_v44  ;;  %4213 = vmatprep.mubr.f32.mxu1 %v7146_v20  ;;  %v2958_v20 = vld [vmem:[#allocation3 + $0x24f] sm:$0xff]  ;;  %v2963_v45 = vld [vmem:[#allocation3 + $0x2b7] sm:$0xff]  ;;  %v3028_v44 = vld [vmem:[#allocation3 + $0x2e0] sm:$0xff] }
 0x3ca   : > { %v3972_v27 = vpop.f32.mrf.mxu0  ;;  %4398 = vmatprep.mubr.f32.mxu0 %v2829_v10  ;;  %v7822_v10 = vld [vmem:[#allocation11_spill] sm:$0xff] }
 0x3cb   : > { %v3029_v27 = vld [vmem:[#allocation3 + $0x2e8] sm:$0xff] }
 0x3cc   : > { %v3975_v57 = vpop.f32.mrf.mxu0  ;;  %4214 = vmatmul.mubr.f32.gmra.mxu1 %v7119_v16  ;;  %v7821_v16 = vld [vmem:[#allocation6_spill] sm:$0xff] }
 0x3cd   : > { %v7541_v50 = vadd.f32 %v3975_v57, %v3751_v40  ;;  %4399 = vmatmul.mubr.f32.gmra.mxu0 %v2956_v12  ;;  %4218 = vmatprep.mubr.f32.mxu1 %v7156_v39  ;;  %v7548_v39 = vld [vmem:[#allocation3 + $0x311] sm:$0xff]  ;;  %v7826_v57 = vld [vmem:[#allocation14_spill] sm:$0xff] }
 0x3ce   : > { %v3977_v52 = vpop.f32.mrf.mxu0  ;;  %4403 = vmatprep.mubr.f32.mxu0 %v2830_v23  ;;  %v2960_v23 = vld [vmem:[#allocation3 + $0x27f] sm:$0xff]  ;;  %v7825_v40 = vld [vmem:[#allocation8_spill] sm:$0xff] }
 0x3cf   : > { %v7827_v12 = vld [vmem:[#allocation16_spill] sm:$0xff]  ;;  %v2968_v52 = vld [vmem:[#allocation3 + $0x33f] sm:$0xff] }
 0x3d0   : > { %4219 = vmatmul.mubr.f32.gmra.mxu1 %v2836_v1 }
 0x3d1   : > { %4404 = vmatmul.mubr.f32.gmra.mxu0 %v2957_v32  ;;  %4223 = vmatprep.mubr.f32.mxu1 %v7295_v28  ;;  %v2969_v32 = vld [vmem:[#allocation3 + $0x347] sm:$0xff] }
 0x3d2   : > { %4408 = vmatprep.mubr.f32.mxu0 %v2831_v46  ;;  %v7552_v46 = vld [vmem:[#allocation3 + $0x319] sm:$0xff] }
 0x3d4   : > { %4224 = vmatmul.mubr.f32.gmra.mxu1 %v7138_v42  ;;  %v3756_v42 = vadd.f32 %v7201_v41, %v7519_v38 }
 0x3d5   : > { %4409 = vmatmul.mubr.f32.gmra.mxu0 %v2958_v20  ;;  %4228 = vmatprep.mubr.f32.mxu1 %v7318_v51 }
 0x3d6   : > { %4413 = vmatprep.mubr.f32.mxu0 %v2832_v26  ;;  %v2961_v26 = vld [vmem:[#allocation3 + $0x287] sm:$0xff] }
 0x3d8   : > { %4229 = vmatmul.mubr.f32.gmra.mxu1 %v7821_v16 }
 0x3d9   : > { %4414 = vmatmul.mubr.f32.gmra.mxu0 %v2959_v53  ;;  %4233 = vmatprep.mubr.f32.mxu1 %v7548_v39 }
 0x3da   : > { %4418 = vmatprep.mubr.f32.mxu0 %v2833_v56  ;;  %v3761_v56 = vadd.f32 %v7201_v41, %v7527_v8  ;;  %v7824_v8 = vld [vmem:[#allocation7_spill] sm:$0xff] }
 0x3dc   : > { %4234 = vmatmul.mubr.f32.gmra.mxu1 %v7822_v10 }
 0x3dd   : > { %4419 = vmatmul.mubr.f32.gmra.mxu0 %v2960_v23  ;;  %4238 = vmatprep.mubr.f32.mxu1 %v7552_v46 }
 0x3de   : > { %4423 = vmatprep.mubr.f32.mxu0 %v2834_v9 }
 0x3df   : > { %v3765_v47 = vpop.f32.mrf.mxu1 }
 0x3e0   : > { %v3980_v58 = vpop.f32.mrf.mxu0  ;;  %4239 = vmatmul.mubr.f32.gmra.mxu1 %v7823_v59  ;;  %v3766_v20 = vadd.f32 %v7201_v41, %v3765_v47 }
 0x3e1   : > { %v7558_v6 = vadd.f32 %v3980_v58, %v3756_v42  ;;  %4424 = vmatmul.mubr.f32.gmra.mxu0 %v2961_v26  ;;  %v3767_v60 = vpop.f32.mrf.mxu1  ;;  %5118 = vmatprep.mubr.f32.mxu1 %v3078_v24  ;;  %v3066_v42 = vld [vmem:[#allocation3 + $0x71] sm:$0xff] }
 0x3e2   : > { %v3982_v11 = vpop.f32.mrf.mxu0  ;;  %4428 = vmatprep.mubr.f32.mxu0 %v3026_v18  ;;  %v3067_v60 = vld [vmem:[#allocation3 + $0x79] sm:$0xff]  ;;  %v3068_v18 = vld [vmem:[#allocation3 + $0xa1] sm:$0xff] }
 0x3e3   : > { %v3770_v14 = vpop.f32.mrf.mxu1  ;;  %v3097_v11 = vld [vmem:[#allocation3 + $0x349] sm:$0xff] }
 0x3e4   : > { %v3985_v38 = vpop.f32.mrf.mxu0  ;;  %5119 = vmatmul.mubr.f32.vlgmr.msra.gmra.mxu1 %v3079_v36  ;;  %v3070_v36 = vld [vmem:[#allocation3 + $0xd1] sm:$0xff] }
 0x3e5   : > { %v7562_v19 = vadd.f32 %v3985_v38, %v3761_v56  ;;  %4429 = vmatmul.mubr.f32.gmra.mxu0 %v2962_v2  ;;  %v3772_v30 = vpop.f32.mrf.mxu1  ;;  %5121 = vmatprep.mubr.f32.mxu1 %v7434_v29  ;;  %v3086_v29 = vld [vmem:[#allocation3 + $0x251] sm:$0xff]  ;;  %v3072_v38 = vld [vmem:[#allocation3 + $0x101] sm:$0xff]  ;;  %v3073_v2 = vld [vmem:[#allocation3 + $0x109] sm:$0xff] }
 0x3e6   : > { %v3987_v9 = vpop.f32.mrf.mxu0  ;;  %4433 = vmatprep.mubr.f32.mxu0 %v2836_v1  ;;  %v3091_v1 = vld [vmem:[#allocation3 + $0x2b9] sm:$0xff] }
 0x3e7   : > { %v3075_v30 = vld [vmem:[#allocation3 + $0x139] sm:$0xff]  ;;  %v3076_v9 = vld [vmem:[#allocation3 + $0x161] sm:$0xff] }
 0x3e8   : > { %5122 = vmatmul.mubr.f32.gmra.mxu1 %v7450_v15  ;;  %v3087_v15 = vld [vmem:[#allocation3 + $0x259] sm:$0xff] }
 0x3e9   : > { %4434 = vmatmul.mubr.f32.gmra.mxu0 %v2963_v45  ;;  %5124 = vmatprep.mubr.f32.mxu1 %v7464_v54  ;;  %v3088_v54 = vld [vmem:[#allocation3 + $0x281] sm:$0xff]  ;;  %v3077_v45 = vld [vmem:[#allocation3 + $0x169] sm:$0xff] }
 0x3ea   : > { %4438 = vmatprep.mubr.f32.mxu0 %v3028_v44 }
 0x3ec   : > { %5125 = vmatmul.mubr.f32.gmra.mxu1 %v7478_v17  ;;  %v3089_v17 = vld [vmem:[#allocation3 + $0x289] sm:$0xff] }
 0x3ed   : > { %4439 = vmatmul.mubr.f32.gmra.mxu0 %v7824_v8  ;;  %5127 = vmatprep.mubr.f32.mxu1 %v7491_v34  ;;  %v3090_v34 = vld [vmem:[#allocation3 + $0x2b1] sm:$0xff] }
 0x3ee   : > { %4443 = vmatprep.mubr.f32.mxu0 %v3029_v27 }
 0x3f0   : > { %5128 = vmatmul.mubr.f32.gmra.mxu1 %v7499_v43  ;;  %v5202_v43 = vld [vmem:[#allocation3] sm:$0xff] }
 0x3f1   : > { %4444 = vmatmul.mubr.f32.gmra.mxu0 %v7825_v40  ;;  %5130 = vmatprep.mubr.f32.mxu1 %v3086_v29 }
 0x3f2   : > { %4448 = vmatprep.mubr.f32.mxu0 %v7822_v10 }
 0x3f4   : > { %5131 = vmatmul.mubr.f32.gmra.mxu1 %v3087_v15 }
 0x3f5   : > { %4449 = vmatmul.mubr.f32.gmra.mxu0 %v7826_v57  ;;  %5133 = vmatprep.mubr.f32.mxu1 %v3088_v54 }
 0x3f6   : > { %4453 = vmatprep.mubr.f32.mxu0 %v7823_v59  ;;  %v3096_v59 = vld [vmem:[#allocation3 + $0x341] sm:$0xff] }
 0x3f8   : > { %5134 = vmatmul.mubr.f32.gmra.mxu1 %v3089_v17 }
 0x3f9   : > { %4454 = vmatmul.mubr.f32.gmra.mxu0 %v7827_v12  ;;  %5136 = vmatprep.mubr.f32.mxu1 %v3090_v34 }
 0x3fa   : > { %4458 = vmatprep.mubr.f32.mxu0 %v5202_v43 }
 0x3fc   : > { %5137 = vmatmul.mubr.f32.gmra.mxu1 %v3091_v1  ;;  %v7828_v1 = vld [vmem:[#allocation10_spill] sm:$0xff] }
 0x3fd   : > { %4459 = vmatmul.mubr.f32.gmra.mxu0 %v2968_v52  ;;  %5139 = vmatprep.mubr.f32.mxu1 %v7295_v28  ;;  %v3771_v28 = vadd.f32 %v7201_v41, %v3770_v14  ;;  %v3071_v14 = vld [vmem:[#allocation3 + $0xd9] sm:$0xff] }
 0x3fe   : > { %4463 = vmatprep.mubr.f32.mxu0 %v5202_v43 }
 0x3ff   : > { %v3775_v16 = vpop.f32.mrf.mxu1 }
 0x400   : > { %v3990_v53 = vpop.f32.mrf.mxu0  ;;  %5140 = vmatmul.mubr.f32.gmra.mxu1 %v7318_v51  ;;  %v3776_v44 = vadd.f32 %v7201_v41, %v3775_v16  ;;  %v7829_v16 = vld [vmem:[#allocation12_spill] sm:$0xff] }
 0x401   : > { %v7579_v10 = vadd.f32 %v3990_v53, %v3766_v20  ;;  %4464 = vmatmul.mubr.f32.gmra.mxu0 %v2969_v32  ;;  %v3777_v23 = vpop.f32.mrf.mxu1  ;;  %5142 = vmatprep.mubr.f32.mxu1 %v7548_v39  ;;  %v3069_v39 = vld [vmem:[#allocation3 + $0xa9] sm:$0xff] }
 0x402   : > { %v3992_v58 = vpop.f32.mrf.mxu0  ;;  %5100 = vmatprep.mubr.f32.mxu0 %v3066_v42 }
 0x403   : > { %v3780_v26 = vpop.f32.mrf.mxu1 }
 0x404   : > { %v3995_v24 = vpop.f32.mrf.mxu0  ;;  %5143 = vmatmul.mubr.f32.gmra.mxu1 %v7552_v46  ;;  %v3074_v46 = vld [vmem:[#allocation3 + $0x131] sm:$0xff]  ;;  %v3781_v54 = vadd.f32 %v7201_v41, %v3780_v26  ;;  %v7831_v26 = vld [vmem:[#allocation15_spill] sm:$0xff] }
 0x405   : > { %v7584_v47 = vadd.f32 %v3995_v24, %v3771_v28  ;;  %5101 = vmatmul.mubr.f32.vlgmr.msra.gmra.mxu0 %v3067_v60  ;;  %v3782_v51 = vpop.f32.mrf.mxu1  ;;  %5145 = vmatprep.mubr.f32.mxu1 %v3096_v59  ;;  %v7830_v59 = vld [vmem:[#allocation13_spill] sm:$0xff] }
 0x406   : > { %v3997_v56 = vpop.f32.mrf.mxu0  ;;  %5103 = vmatprep.mubr.f32.mxu0 %v3068_v18 }
 0x408   : > { %5146 = vmatmul.mubr.f32.gmra.mxu1 %v3097_v11 }
 0x409   : > { %5104 = vmatmul.mubr.f32.gmra.mxu0 %v3069_v39 }
 0x40a   : > { %5106 = vmatprep.mubr.f32.mxu0 %v3070_v36 }
 0x40d   : > { %5107 = vmatmul.mubr.f32.gmra.mxu0 %v3071_v14 }
 0x40e   : > { %5109 = vmatprep.mubr.f32.mxu0 %v3072_v38 }
 0x411   : > { %5110 = vmatmul.mubr.f32.gmra.mxu0 %v3073_v2 }
 0x412   : > { %5112 = vmatprep.mubr.f32.mxu0 %v3074_v46 }
 0x415   : > { %5113 = vmatmul.mubr.f32.gmra.mxu0 %v3075_v30 }
 0x416   : > { %5115 = vmatprep.mubr.f32.mxu0 %v3076_v9 }
 0x419   : > { %5116 = vmatmul.mubr.f32.gmra.mxu0 %v3077_v45 }
 0x41c   : > { %v3785_v8 = vpop.f32.mrf.mxu1 }
 0x41d   : > { %v4000_v27 = vpop.f32.mrf.mxu0  ;;  %v3786_v2 = vadd.f32 %v7201_v41, %v3785_v8 }
 0x41e   : > { %v7587_v29 = vadd.f32 %v4000_v27, %v3776_v44  ;;  %v3787_v40 = vpop.f32.mrf.mxu1 }
 0x41f   : > { %v4002_v15 = vpop.f32.mrf.mxu0 }
 0x420   : > { %v3790_v57 = vpop.f32.mrf.mxu1 }
 0x421   : > { %v4005_v17 = vpop.f32.mrf.mxu0  ;;  %v3791_v40 = vadd.f32 %v7201_v41, %v3790_v57 }
 0x422   : > { %v7590_v34 = vadd.f32 %v4005_v17, %v3781_v54  ;;  %v3792_v12 = vpop.f32.mrf.mxu1 }
 0x423   : > { %v4007_v43 = vpop.f32.mrf.mxu0 }
 0x424   : > { %v4085_v52 = vpop.f32.mrf.mxu1 }
 0x425   : > { %v4086_v32 = vadd.f32 %v4085_v52, %v7828_v1 }
 0x426   : > { %v4087_v20 = vpop.f32.mrf.mxu1 }
 0x428   : > { %v4090_v53 = vpop.f32.mrf.mxu1 }
 0x429   : > { %v4091_v23 = vadd.f32 %v4090_v53, %v7829_v16 }
 0x42a   : > { %v4092_v42 = vpop.f32.mrf.mxu1 }
 0x42c   : > { %v4095_v58 = vpop.f32.mrf.mxu1 }
 0x42d   : > { %v4096_v28 = vadd.f32 %v4095_v58, %v7830_v59 }
 0x42e   : > { %v4097_v24 = vpop.f32.mrf.mxu1 }
 0x430   : > { %v4100_v60 = vpop.f32.mrf.mxu1 }
 0x431   : > { %v4101_v51 = vadd.f32 %v4100_v60, %v7831_v26 }
 0x432   : > { %v4102_v18 = vpop.f32.mrf.mxu1 }
 0x434   : > { %v4105_v11 = vpop.f32.mrf.mxu1 }
 0x435   : > { %v4106_v56 = vadd.f32 %v4105_v11, %v7327_v4 }
 0x436   : > { %v4107_v39 = vpop.f32.mrf.mxu1 }
 0x438   : > { %v4110_v36 = vpop.f32.mrf.mxu1 }
 0x439   : > { %v4111_v14 = vadd.f32 %v4110_v36, %v7341_v37 }
 0x43a   : > { %v4112_v38 = vpop.f32.mrf.mxu1 }
 0x43c   : > { %v4115_v46 = vpop.f32.mrf.mxu1 }
 0x43d   : > { %v4010_v30 = vpop.f32.mrf.mxu0  ;;  %v4116_v9 = vadd.f32 %v4115_v46, %v7359_v55 }
 0x43e   : > { %v7600_v45 = vadd.f32 %v4010_v30, %v3786_v2  ;;  %v4117_v44 = vpop.f32.mrf.mxu1 }
 0x43f   : > { %v4012_v27 = vpop.f32.mrf.mxu0 }
 0x440   : > { %v4120_v15 = vpop.f32.mrf.mxu1 }
 0x441   : > { %v4015_v54 = vpop.f32.mrf.mxu0  ;;  %v4121_v4 = vadd.f32 %v4120_v15, %v7372_v21 }
 0x442   : > { %v7604_v17 = vadd.f32 %v4015_v54, %v3791_v40  ;;  %v4122_v37 = vpop.f32.mrf.mxu1 }
 0x443   : > { %v4017_v12 = vpop.f32.mrf.mxu0 }
 0x444   : > { %v4125_v43 = vpop.f32.mrf.mxu1 }
 0x445   : > { %v4126_v8 = vadd.f32 %v4125_v43, %v7385_v0  ;;  %v4310_v52 = vpop.f32.mrf.mxu0 }
 0x446   : > { %v7607_v1 = vadd.f32 %v4310_v52, %v4086_v32  ;;  %v4127_v55 = vpop.f32.mrf.mxu1 }
 0x447   : > { %v4312_v20 = vpop.f32.mrf.mxu0 }
 0x448   : > { %v4130_v53 = vpop.f32.mrf.mxu1 }
 0x449   : > { %v4131_v16 = vadd.f32 %v4130_v53, %v7397_v33  ;;  %v4315_v41 = vpop.f32.mrf.mxu0 }
 0x44a   : > { %v7610_v57 = vadd.f32 %v4315_v41, %v4091_v23  ;;  %v4132_v42 = vpop.f32.mrf.mxu1 }
 0x44b   : > { %v4317_v21 = vpop.f32.mrf.mxu0 }
 0x44c   : > { %v4135_v58 = vpop.f32.mrf.mxu1 }
 0x44d   : > { %v4136_v59 = vadd.f32 %v4135_v58, %v7409_v5  ;;  %v4320_v24 = vpop.f32.mrf.mxu0 }
 0x44e   : > { %v7613_v60 = vadd.f32 %v4320_v24, %v4096_v28  ;;  %v4137_v0 = vpop.f32.mrf.mxu1 }
 0x44f   : > { %v4322_v26 = vpop.f32.mrf.mxu0 }
 0x450   : > { %v4140_v32 = vpop.f32.mrf.mxu1 }
 0x451   : > { %v4141_v18 = vadd.f32 %v4140_v32, %v7421_v13  ;;  %v4325_v11 = vpop.f32.mrf.mxu0 }
 0x452   : > { %v7616_v39 = vadd.f32 %v4325_v11, %v4101_v51  ;;  %v4142_v33 = vpop.f32.mrf.mxu1 }
 0x453   : > { %v4327_v36 = vpop.f32.mrf.mxu0 }
 0x454   : > { %v4145_v23 = vpop.f32.mrf.mxu1 }
 0x455   : > { %v7619_v38 = vadd.f32 %v4145_v23, %v7437_v62  ;;  %v4330_v2 = vpop.f32.mrf.mxu0 }
 0x456   : > { %v7621_v46 = vadd.f32 %v4330_v2, %v4106_v56  ;;  %v4147_v5 = vpop.f32.mrf.mxu1 }
 0x457   : > { %v4332_v28 = vpop.f32.mrf.mxu0 }
 0x458   : > { %v4150_v30 = vpop.f32.mrf.mxu1 }
 0x459   : > { %v7624_v44 = vadd.f32 %v4150_v30, %v7453_v63  ;;  %v4335_v27 = vpop.f32.mrf.mxu0 }
 0x45a   : > { %v7626_v13 = vadd.f32 %v4335_v27, %v4111_v14  ;;  %v4152_v51 = vpop.f32.mrf.mxu1 }
 0x45b   : > { %v4337_v40 = vpop.f32.mrf.mxu0 }
 0x45c   : > { %v4155_v15 = vpop.f32.mrf.mxu1 }
 0x45d   : > { %v7629_v54 = vadd.f32 %v4155_v15, %v7467_v22  ;;  %v4340_v62 = vpop.f32.mrf.mxu0 }
 0x45e   : > { %v7631_v37 = vadd.f32 %v4340_v62, %v4116_v9  ;;  %v4157_v56 = vpop.f32.mrf.mxu1 }
 0x45f   : > { %v4342_v12 = vpop.f32.mrf.mxu0 }
 0x460   : > { %7832 = vst [vmem:[#allocation6_spill] sm:$0xff] %v7631_v37  ;;  %v4160_v43 = vpop.f32.mrf.mxu1 }
 0x461   : > { %v7634_v52 = vadd.f32 %v4160_v43, %v7481_v61  ;;  %v4345_v63 = vpop.f32.mrf.mxu0 }
 0x462   : > { %v7636_v55 = vadd.f32 %v4345_v63, %v4121_v4  ;;  %v4162_v14 = vpop.f32.mrf.mxu1 }
 0x463   : > { %v4347_v20 = vpop.f32.mrf.mxu0 }
 0x464   : > { %v4165_v53 = vpop.f32.mrf.mxu1 }
 0x465   : > { %v7639_v41 = vadd.f32 %v4165_v53, %v7493_v7  ;;  %v4350_v22 = vpop.f32.mrf.mxu0 }
 0x466   : > { %v7641_v42 = vadd.f32 %v4350_v22, %v4126_v8  ;;  %v4167_v9 = vpop.f32.mrf.mxu1 }
 0x467   : > { %v4352_v21 = vpop.f32.mrf.mxu0 }
 0x468   : > { %7833 = vst [vmem:[#allocation11_spill] sm:$0xff] %v7641_v42  ;;  %v4170_v58 = vpop.f32.mrf.mxu1 }
 0x469   : > { %v7644_v24 = vadd.f32 %v4170_v58, %v7501_v49  ;;  %v4355_v61 = vpop.f32.mrf.mxu0 }
 0x46a   : > { %v7646_v0 = vadd.f32 %v4355_v61, %v4131_v16  ;;  %v4172_v4 = vpop.f32.mrf.mxu1 }
 0x46b   : > { %v4357_v26 = vpop.f32.mrf.mxu0 }
 0x46c   : > { %7834 = vst [vmem:[#allocation9_spill] sm:$0xff] %v7646_v0  ;;  %v4175_v32 = vpop.f32.mrf.mxu1 }
 0x46d   : > { %v7649_v11 = vadd.f32 %v4175_v32, %v7507_v31  ;;  %v4360_v7 = vpop.f32.mrf.mxu0 }
 0x46e   : > { %v7651_v33 = vadd.f32 %v4360_v7, %v4136_v59  ;;  %v4177_v8 = vpop.f32.mrf.mxu1 }
 0x46f   : > { %v4362_v36 = vpop.f32.mrf.mxu0 }
 0x470   : > { %7835 = vst [vmem:[#allocation7_spill] sm:$0xff] %v7651_v33  ;;  %v7653_v23 = vpop.f32.mrf.mxu1 }
 0x471   : > { %v4365_v2 = vpop.f32.mrf.mxu0 }
 0x472   : > { %v7655_v5 = vadd.f32 %v4365_v2, %v4141_v18  ;;  %v4182_v49 = vpop.f32.mrf.mxu1 }
 0x473   : > { %v4367_v28 = vpop.f32.mrf.mxu0 }
 0x474   : > { %7836 = vst [vmem:[#allocation8_spill] sm:$0xff] %v7655_v5  ;;  %v7657_v16 = vpop.f32.mrf.mxu1 }
 0x475   : > { %v4370_v30 = vpop.f32.mrf.mxu0 }
 0x476   : > { %v4187_v27 = vpop.f32.mrf.mxu1  ;;  %v4371_v5 = vadd.f32 %v4370_v30, %v7619_v38 }
 0x477   : > { %v4372_v51 = vpop.f32.mrf.mxu0 }
 0x478   : > { %v7659_v40 = vpop.f32.mrf.mxu1 }
 0x479   : > { %v4375_v31 = vpop.f32.mrf.mxu0 }
 0x47a   : > { %v4192_v15 = vpop.f32.mrf.mxu1 }
 0x47b   : > { %v4377_v59 = vpop.f32.mrf.mxu0 }
 0x47c   : > { %v7661_v62 = vpop.f32.mrf.mxu1 }
 0x47d   : > { %v4380_v56 = vpop.f32.mrf.mxu0 }
 0x47e   : > { %v4197_v12 = vpop.f32.mrf.mxu1 }
 0x47f   : > { %v4382_v43 = vpop.f32.mrf.mxu0 }
 0x480   : > { %v7663_v63 = vpop.f32.mrf.mxu1 }
 0x481   : > { %v4385_v18 = vpop.f32.mrf.mxu0 }
 0x482   : > { %v4202_v14 = vpop.f32.mrf.mxu1  ;;  %v4386_v0 = vadd.f32 %v4385_v18, %v7634_v52 }
 0x483   : > { %v4387_v20 = vpop.f32.mrf.mxu0 }
 0x484   : > { %v7665_v53 = vpop.f32.mrf.mxu1 }
 0x485   : > { %v4390_v22 = vpop.f32.mrf.mxu0 }
 0x486   : > { %v4207_v9 = vpop.f32.mrf.mxu1 }
 0x487   : > { %v4392_v21 = vpop.f32.mrf.mxu0 }
 0x488   : > { %v7667_v58 = vpop.f32.mrf.mxu1 }
 0x489   : > { %v4395_v61 = vpop.f32.mrf.mxu0 }
 0x48a   : > { %v4212_v4 = vpop.f32.mrf.mxu1  ;;  %v4396_v18 = vadd.f32 %v4395_v61, %v7644_v24 }
 0x48b   : > { %v4397_v26 = vpop.f32.mrf.mxu0 }
 0x48c   : > { %v7669_v32 = vpop.f32.mrf.mxu1 }
 0x48d   : > { %v7671_v7 = vpop.f32.mrf.mxu0 }
 0x48e   : > { %v4217_v8 = vpop.f32.mrf.mxu1 }
 0x48f   : > { %v4402_v36 = vpop.f32.mrf.mxu0 }
 0x490   : > { %v7673_v2 = vpop.f32.mrf.mxu1 }
 0x491   : > { %v4405_v49 = vpop.f32.mrf.mxu0 }
 0x492   : > { %v4222_v28 = vpop.f32.mrf.mxu1 }
 0x493   : > { %v4407_v27 = vpop.f32.mrf.mxu0 }
 0x494   : > { %v7675_v51 = vpop.f32.mrf.mxu1 }
 0x495   : > { %v7677_v15 = vpop.f32.mrf.mxu0 }
 0x496   : > { %v4227_v59 = vpop.f32.mrf.mxu1 }
 0x497   : > { %v4412_v12 = vpop.f32.mrf.mxu0  ;;  %v4376_v59 = vadd.f32 %v4375_v31, %v7624_v44 }
 0x498   : > { %v7679_v43 = vpop.f32.mrf.mxu1 }
 0x499   : > { %v7681_v14 = vpop.f32.mrf.mxu0 }
 0x49a   : > { %v4232_v20 = vpop.f32.mrf.mxu1 }
 0x49b   : > { %v4417_v9 = vpop.f32.mrf.mxu0 }
 0x49c   : > { %v7683_v21 = vpop.f32.mrf.mxu1 }
 0x49d   : > { %v7685_v4 = vpop.f32.mrf.mxu0 }
 0x49e   : > { %v4237_v26 = vpop.f32.mrf.mxu1 }
 0x49f   : > { %v4422_v8 = vpop.f32.mrf.mxu0 }
 0x4a0   : > { %v7687_v36 = vpop.f32.mrf.mxu1  ;;  %v4381_v8 = vadd.f32 %v4380_v56, %v7629_v54  ;;  %v4181_v54 = vadd.f32 %v7653_v23, %v7513_v3 }
 0x4a1   : > { %v7689_v28 = vpop.f32.mrf.mxu0 }
 0x4a2   : > { %v4242_v27 = vpop.f32.mrf.mxu1 }
 0x4a3   : > { %v4427_v12 = vpop.f32.mrf.mxu0 }
 0x4a4   : > { %v5120_v33 = vpop.f32.mrf.mxu1 }
 0x4a5   : > { %v7693_v20 = vpop.f32.mrf.mxu0  ;;  %v4601_v9 = vadd.f32 %v5120_v33, %v4376_v59 }
 0x4a6   : > { %v4595_v42 = vpop.f32.mrf.mxu1 }
 0x4a7   : > { %vm4707_vm2 = vcmp.ge.f32.partialorder %v4601_v9, 0.0  ;;  %v4739_v26 = vmul.f32 0.2, %v4601_v9  ;;  %v4432_v44 = vpop.f32.mrf.mxu0  ;;  %v4596_v31 = vadd.f32 %v4595_v42, %v4371_v5  ;;  %v4391_v5 = vadd.f32 %v4390_v22, %v7639_v41 }
 0x4a8   : > { %v5123_v38 = vpop.f32.mrf.mxu1  ;;  %v4191_v41 = vadd.f32 %v7659_v40, %v7529_v35 }
 0x4a9   : > { %v4771_v30 = vsel %vm4707_vm2, %v4601_v9, %v4739_v26  ;;  %vm4706_vm3 = vcmp.ge.f32.partialorder %v4596_v31, 0.0  ;;  %v4738_v33 = vmul.f32 0.2, %v4596_v31  ;;  %v7704_v27 = vpop.f32.mrf.mxu0  ;;  %v4611_v52 = vadd.f32 %v5123_v38, %v4386_v0 }
 0x4aa   : > { %4803 = vst [vmem:[%s7701_s28 + $0x68] sm:$0xff] %v4771_v30  ;;  %v4605_v59 = vpop.f32.mrf.mxu1  ;;  %v4406_v26 = vadd.f32 %v4405_v49, %v4181_v54 }
 0x4ab   : > { %v4770_v12 = vsel %vm4706_vm3, %v4596_v31, %v4738_v33  ;;  %vm4709_vm4 = vcmp.ge.f32.partialorder %v4611_v52, 0.0  ;;  %v4741_v37 = vmul.f32 0.2, %v4611_v52  ;;  %v4437_v44 = vpop.f32.mrf.mxu0  ;;  %v4606_v42 = vadd.f32 %v4605_v59, %v4381_v8 }
 0x4ac   : > { %4802 = vst [vmem:[%s7701_s28 + $0x60] sm:$0xff] %v4770_v12  ;;  %v5126_v56 = vpop.f32.mrf.mxu1  ;;  %v4416_v59 = vadd.f32 %v7681_v14, %v4191_v41 }
 0x4ad   : > { %v4773_v9 = vsel %vm4709_vm4, %v4611_v52, %v4741_v37  ;;  %vm4708_vm5 = vcmp.ge.f32.partialorder %v4606_v42, 0.0  ;;  %v4740_v0 = vmul.f32 0.2, %v4606_v42  ;;  %v7712_v24 = vpop.f32.mrf.mxu0  ;;  %v4621_v61 = vadd.f32 %v5126_v56, %v4396_v18 }
 0x4ae   : > { %4805 = vst [vmem:[%s7701_s28 + $0x78] sm:$0xff] %v4773_v9  ;;  %v4615_v31 = vpop.f32.mrf.mxu1  ;;  %v4401_v37 = vadd.f32 %v7671_v7, %v7649_v11  ;;  %v4186_v18 = vadd.f32 %v7657_v16, %v7521_v25  ;;  %v4201_v7 = vadd.f32 %v7663_v63, %v7541_v50  ;;  %v4196_v56 = vadd.f32 %v7661_v62, %v7535_v48 }
 0x4af   : > { %v4772_v38 = vsel %vm4708_vm5, %v4606_v42, %v4740_v0  ;;  %vm4711_vm6 = vcmp.ge.f32.partialorder %v4621_v61, 0.0  ;;  %v4743_v8 = vmul.f32 0.2, %v4621_v61  ;;  %v4442_v30 = vpop.f32.mrf.mxu0  ;;  %v4616_v3 = vadd.f32 %v4615_v31, %v4391_v5 }
 0x4b0   : > { %4804 = vst [vmem:[%s7701_s28 + $0x70] sm:$0xff] %v4772_v38  ;;  %v5129_v23 = vpop.f32.mrf.mxu1  ;;  %v4411_v42 = vadd.f32 %v7677_v15, %v4186_v18  ;;  %v4426_v9 = vadd.f32 %v7689_v28, %v4201_v7  ;;  %v4421_v31 = vadd.f32 %v7685_v4, %v4196_v56  ;;  %v4206_v30 = vadd.f32 %v7665_v53, %v7558_v6 }
 0x4b1   : > { %v4775_v22 = vsel %vm4711_vm6, %v4621_v61, %v4743_v8  ;;  %vm4710_vm7 = vcmp.ge.f32.partialorder %v4616_v3, 0.0  ;;  %v4742_v49 = vmul.f32 0.2, %v4616_v3  ;;  %v4445_v33 = vpop.f32.mrf.mxu0  ;;  %v4631_v52 = vadd.f32 %v5129_v23, %v4406_v26 }
 0x4b2   : > { %4807 = vst [vmem:[%s7701_s28 + $0x88] sm:$0xff] %v4775_v22  ;;  %v4625_v12 = vpop.f32.mrf.mxu1  ;;  %v4211_v26 = vadd.f32 %v7667_v58, %v7562_v19  ;;  %v4221_v23 = vadd.f32 %v7673_v2, %v7584_v47  ;;  %v4431_v22 = vadd.f32 %v7693_v20, %v4206_v30  ;;  %v4216_v18 = vadd.f32 %v7669_v32, %v7579_v10 }
 0x4b3   : > { %v4774_v44 = vsel %vm4710_vm7, %v4616_v3, %v4742_v49  ;;  %vm4713_vm8 = vcmp.ge.f32.partialorder %v4631_v52, 0.0  ;;  %v4745_v35 = vmul.f32 0.2, %v4631_v52  ;;  %v4447_v11 = vpop.f32.mrf.mxu0  ;;  %v4626_v40 = vadd.f32 %v4625_v12, %v4401_v37 }
 0x4b4   : > { %4806 = vst [vmem:[%s7701_s28 + $0x80] sm:$0xff] %v4774_v44  ;;  %v5132_v54 = vpop.f32.mrf.mxu1  ;;  %v4436_v3 = vadd.f32 %v7704_v27, %v4211_v26  ;;  %v4441_v11 = vadd.f32 %v7712_v24, %v4216_v18 }
 0x4b5   : > { %v4777_v5 = vsel %vm4713_vm8, %v4631_v52, %v4745_v35  ;;  %vm4712_vm9 = vcmp.ge.f32.partialorder %v4626_v40, 0.0  ;;  %v4744_v25 = vmul.f32 0.2, %v4626_v40  ;;  %v7728_v16 = vpop.f32.mrf.mxu0  ;;  %v4641_v14 = vadd.f32 %v5132_v54, %v4416_v59 }
 0x4b6   : > { %4809 = vst [vmem:[%s7701_s28 + $0x98] sm:$0xff] %v4777_v5  ;;  %v4635_v0 = vpop.f32.mrf.mxu1  ;;  %v4446_v59 = vadd.f32 %v4445_v33, %v4221_v23  ;;  %v4231_v35 = vadd.f32 %v7679_v43, %v7590_v34 }
 0x4b7   : > { %v4776_v61 = vsel %vm4712_vm9, %v4626_v40, %v4744_v25  ;;  %vm4715_vm10 = vcmp.ge.f32.partialorder %v4641_v14, 0.0  ;;  %v4747_v50 = vmul.f32 0.2, %v4641_v14  ;;  %v4452_v63 = vpop.f32.mrf.mxu0  ;;  %v4636_v15 = vadd.f32 %v4635_v0, %v4411_v42 }
 0x4b8   : > { %4808 = vst [vmem:[%s7701_s28 + $0x90] sm:$0xff] %v4776_v61  ;;  %v5135_v38 = vpop.f32.mrf.mxu1  ;;  %v4226_v42 = vadd.f32 %v7675_v51, %v7587_v29 }
 0x4b9   : > { %v4779_v8 = vsel %vm4715_vm10, %v4641_v14, %v4747_v50  ;;  %vm4714_vm13 = vcmp.ge.f32.partialorder %v4636_v15, 0.0  ;;  %v4746_v48 = vmul.f32 0.2, %v4636_v15  ;;  %v4455_v62 = vpop.f32.mrf.mxu0  ;;  %v4651_v28 = vadd.f32 %v5135_v38, %v4426_v9 }
 0x4ba   : > { %4811 = vst [vmem:[%s7701_s28 + $0xa8] sm:$0xff] %v4779_v8  ;;  %v4645_v41 = vpop.f32.mrf.mxu1  ;;  %v4456_v54 = vadd.f32 %v4455_v62, %v4231_v35  ;;  %v4241_v14 = vadd.f32 %v7687_v36, %v7604_v17  ;;  %v4451_v56 = vadd.f32 %v7728_v16, %v4226_v42  ;;  %v4236_v50 = vadd.f32 %v7683_v21, %v7600_v45 }
 0x4bb   : > { %v4778_v37 = vsel %vm4714_vm13, %v4636_v15, %v4746_v48  ;;  %vm4717_vm14 = vcmp.ge.f32.partialorder %v4651_v28, 0.0  ;;  %v4749_v19 = vmul.f32 0.2, %v4651_v28  ;;  %v4457_v58 = vpop.f32.mrf.mxu0  ;;  %v4646_v4 = vadd.f32 %v4645_v41, %v4421_v31 }
 0x4bc   : > { %4810 = vst [vmem:[%s7701_s28 + $0xa0] sm:$0xff] %v4778_v37  ;;  %v5138_v49 = vpop.f32.mrf.mxu1 }
 0x4bd   : > { %v4781_v52 = vsel %vm4717_vm14, %v4651_v28, %v4749_v19  ;;  %vm4716_vm15 = vcmp.ge.f32.partialorder %v4646_v4, 0.0  ;;  %v4748_v6 = vmul.f32 0.2, %v4646_v4  ;;  %v4460_v53 = vpop.f32.mrf.mxu0  ;;  %v4661_v27 = vadd.f32 %v5138_v49, %v4436_v3 }
 0x4be   : > { %4813 = vst [vmem:[%s7701_s28 + $0xb8] sm:$0xff] %v4781_v52  ;;  %v4655_v12 = vpop.f32.mrf.mxu1  ;;  %v4461_v38 = vadd.f32 %v4460_v53, %v4236_v50 }
 0x4bf   : > { %v4780_v44 = vsel %vm4716_vm15, %v4646_v4, %v4748_v6  ;;  %vm4719_vm0 = vcmp.ge.f32.partialorder %v4661_v27, 0.0  ;;  %v4751_v47 = vmul.f32 0.2, %v4661_v27  ;;  %v4462_v2 = vpop.f32.mrf.mxu0  ;;  %v4656_v20 = vadd.f32 %v4655_v12, %v4431_v22 }
 0x4c0   : > { %4812 = vst [vmem:[%s7701_s28 + $0xb0] sm:$0xff] %v4780_v44  ;;  %v5141_v40 = vpop.f32.mrf.mxu1 }
 0x4c1   : > { %v4783_v7 = vsel %vm4719_vm0, %v4661_v27, %v4751_v47  ;;  %vm4718_vm1 = vcmp.ge.f32.partialorder %v4656_v20, 0.0  ;;  %v4750_v10 = vmul.f32 0.2, %v4656_v20  ;;  %v4465_v32 = vpop.f32.mrf.mxu0  ;;  %v4671_v33 = vadd.f32 %v5141_v40, %v4446_v59 }
 0x4c2   : > { %4815 = vst [vmem:[%s7701_s28 + $0xc8] sm:$0xff] %v4783_v7  ;;  %v4665_v5 = vpop.f32.mrf.mxu1  ;;  %v4466_v63 = vadd.f32 %v4465_v32, %v4241_v14 }
 0x4c3   : > { %v4782_v25 = vsel %vm4718_vm1, %v4656_v20, %v4750_v10  ;;  %vm4721_vm11 = vcmp.ge.f32.partialorder %v4671_v33, 0.0  ;;  %v4753_v34 = vmul.f32 0.2, %v4671_v33  ;;  %v4467_v43 = vpop.f32.mrf.mxu0  ;;  %v4666_v24 = vadd.f32 %v4665_v5, %v4441_v11  ;;  %v7837_v10 = vld [vmem:[#allocation6_spill] sm:$0xff] }
 0x4c4   : > { %4814 = vst [vmem:[%s7701_s28 + $0xc0] sm:$0xff] %v4782_v25  ;;  %v5144_v9 = vpop.f32.mrf.mxu1  ;;  %v7839_v43 = vld [vmem:[#allocation11_spill] sm:$0xff] }
 0x4c5   : > { %v4785_v0 = vsel %vm4721_vm11, %v4671_v33, %v4753_v34  ;;  %vm4720_vm12 = vcmp.ge.f32.partialorder %v4666_v24, 0.0  ;;  %v4752_v29 = vmul.f32 0.2, %v4666_v24  ;;  %v5102_v51 = vpop.f32.mrf.mxu0  ;;  %v4681_v61 = vadd.f32 %v5144_v9, %v4456_v54  ;;  %v7838_v54 = vld [vmem:[#allocation9_spill] sm:$0xff] }
 0x4c6   : > { %4817 = vst [vmem:[%s7701_s28 + $0xd8] sm:$0xff] %v4785_v0  ;;  %v4541_v15 = vadd.f32 %v5102_v51, %v7610_v57  ;;  %v4675_v26 = vpop.f32.mrf.mxu1  ;;  %v7840_v0 = vld [vmem:[#allocation8_spill] sm:$0xff] }
 0x4c7   : > { %v4784_v31 = vsel %vm4720_vm12, %v4666_v24, %v4752_v29  ;;  %vm4723_vm2 = vcmp.ge.f32.partialorder %v4681_v61, 0.0  ;;  %v4755_v17 = vmul.f32 0.2, %v4681_v61  ;;  %v4535_v36 = vpop.f32.mrf.mxu0  ;;  %v4676_v16 = vadd.f32 %v4675_v26, %v4451_v56 }
 0x4c8   : > { %4816 = vst [vmem:[%s7701_s28 + $0xd0] sm:$0xff] %v4784_v31  ;;  %vm4695_vm3 = vcmp.ge.f32.partialorder %v4541_v15, 0.0  ;;  %v4727_v8 = vmul.f32 0.2, %v4541_v15  ;;  %v4536_v48 = vadd.f32 %v4535_v36, %v7607_v1  ;;  %v5147_v62 = vpop.f32.mrf.mxu1 }
 0x4c9   : > { %v4787_v45 = vsel %vm4723_vm2, %v4681_v61, %v4755_v17  ;;  %vm4722_vm4 = vcmp.ge.f32.partialorder %v4676_v16, 0.0  ;;  %v4754_v21 = vmul.f32 0.2, %v4676_v16  ;;  %v5105_v57 = vpop.f32.mrf.mxu0  ;;  %v4691_v28 = vadd.f32 %v5147_v62, %v4466_v63  ;;  %v7841_v63 = vld [vmem:[#allocation7_spill] sm:$0xff] }
 0x4ca   : > { %v4759_v30 = vsel %vm4695_vm3, %v4541_v15, %v4727_v8  ;;  %4819 = vst [vmem:[%s7701_s28 + $0xe8] sm:$0xff] %v4787_v45  ;;  %vm4694_vm5 = vcmp.ge.f32.partialorder %v4536_v48, 0.0  ;;  %v4726_v3 = vmul.f32 0.2, %v4536_v48  ;;  %v4551_v41 = vadd.f32 %v5105_v57, %v7616_v39  ;;  %v4685_v37 = vpop.f32.mrf.mxu1 }
 0x4cb   : > { %4791 = vst [vmem:[%s7701_s28 + $0x8] sm:$0xff] %v4759_v30  ;;  %v4786_v19 = vsel %vm4722_vm4, %v4676_v16, %v4754_v21  ;;  %vm4725_vm6 = vcmp.ge.f32.partialorder %v4691_v28, 0.0  ;;  %v4757_v1 = vmul.f32 0.2, %v4691_v28  ;;  %v4545_v58 = vpop.f32.mrf.mxu0  ;;  %v4686_v4 = vadd.f32 %v4685_v37, %v4461_v38 }
 0x4cc   : > { %v4758_v23 = vsel %vm4694_vm5, %v4536_v48, %v4726_v3  ;;  %4818 = vst [vmem:[%s7701_s28 + $0xe0] sm:$0xff] %v4786_v19  ;;  %vm4697_vm7 = vcmp.ge.f32.partialorder %v4551_v41, 0.0  ;;  %v4729_v22 = vmul.f32 0.2, %v4551_v41  ;;  %v4546_v49 = vadd.f32 %v4545_v58, %v7613_v60 }
 0x4cd   : > { %4790 = vst [vmem:[%s7701_s28] sm:$0xff] %v4758_v23  ;;  %v4789_v52 = vsel %vm4725_vm6, %v4691_v28, %v4757_v1  ;;  %vm4724_vm8 = vcmp.ge.f32.partialorder %v4686_v4, 0.0  ;;  %v4756_v39 = vmul.f32 0.2, %v4686_v4  ;;  %v5108_v6 = vpop.f32.mrf.mxu0 }
 0x4ce   : > { %v4761_v53 = vsel %vm4697_vm7, %v4551_v41, %v4729_v22  ;;  %4821 = vst [vmem:[%s7701_s28 + $0xf8] sm:$0xff] %v4789_v52  ;;  %vm4696_vm9 = vcmp.ge.f32.partialorder %v4546_v49, 0.0  ;;  %v4728_v27 = vmul.f32 0.2, %v4546_v49  ;;  %v4561_v18 = vadd.f32 %v5108_v6, %v7626_v13 }
 0x4cf   : > { %4793 = vst [vmem:[%s7701_s28 + $0x18] sm:$0xff] %v4761_v53  ;;  %v4788_v59 = vsel %vm4724_vm8, %v4686_v4, %v4756_v39  ;;  %v4555_v12 = vpop.f32.mrf.mxu0 }
 0x4d0   : > { %v4760_v44 = vsel %vm4696_vm9, %v4546_v49, %v4728_v27  ;;  %4820 = vst [vmem:[%s7701_s28 + $0xf0] sm:$0xff] %v4788_v59  ;;  %vm4699_vm10 = vcmp.ge.f32.partialorder %v4561_v18, 0.0  ;;  %v4731_v60 = vmul.f32 0.2, %v4561_v18  ;;  %v4556_v47 = vadd.f32 %v4555_v12, %v7621_v46 }
 0x4d1   : > { %4792 = vst [vmem:[%s7701_s28 + $0x10] sm:$0xff] %v4760_v44  ;;  %v5111_v2 = vpop.f32.mrf.mxu0 }
 0x4d2   : > { %v4763_v20 = vsel %vm4699_vm10, %v4561_v18, %v4731_v60  ;;  %vm4698_vm13 = vcmp.ge.f32.partialorder %v4556_v47, 0.0  ;;  %v4730_v35 = vmul.f32 0.2, %v4556_v47  ;;  %v4571_v11 = vadd.f32 %v5111_v2, %v7636_v55 }
 0x4d3   : > { %4795 = vst [vmem:[%s7701_s28 + $0x28] sm:$0xff] %v4763_v20  ;;  %v4565_v13 = vpop.f32.mrf.mxu0 }
 0x4d4   : > { %v4762_v40 = vsel %vm4698_vm13, %v4556_v47, %v4730_v35  ;;  %vm4701_vm14 = vcmp.ge.f32.partialorder %v4571_v11, 0.0  ;;  %v4733_v7 = vmul.f32 0.2, %v4571_v11  ;;  %v4566_v32 = vadd.f32 %v4565_v13, %v7837_v10 }
 0x4d5   : > { %4794 = vst [vmem:[%s7701_s28 + $0x20] sm:$0xff] %v4762_v40  ;;  %v5114_v33 = vpop.f32.mrf.mxu0 }
 0x4d6   : > { %v4765_v42 = vsel %vm4701_vm14, %v4571_v11, %v4733_v7  ;;  %vm4700_vm15 = vcmp.ge.f32.partialorder %v4566_v32, 0.0  ;;  %v4732_v46 = vmul.f32 0.2, %v4566_v32  ;;  %v4581_v5 = vadd.f32 %v5114_v33, %v7838_v54 }
 0x4d7   : > { %4797 = vst [vmem:[%s7701_s28 + $0x38] sm:$0xff] %v4765_v42  ;;  %v4575_v25 = vpop.f32.mrf.mxu0 }
 0x4d8   : > { %v4764_v34 = vsel %vm4700_vm15, %v4566_v32, %v4732_v46  ;;  %vm4703_vm0 = vcmp.ge.f32.partialorder %v4581_v5, 0.0  ;;  %v4735_v55 = vmul.f32 0.2, %v4581_v5  ;;  %v4576_v24 = vadd.f32 %v4575_v25, %v7839_v43 }
 0x4d9   : > { %4796 = vst [vmem:[%s7701_s28 + $0x30] sm:$0xff] %v4764_v34  ;;  %v5117_v14 = vpop.f32.mrf.mxu0 }
 0x4da   : > { %v4767_v56 = vsel %vm4703_vm0, %v4581_v5, %v4735_v55  ;;  %vm4702_vm1 = vcmp.ge.f32.partialorder %v4576_v24, 0.0  ;;  %v4734_v9 = vmul.f32 0.2, %v4576_v24  ;;  %v4591_v29 = vadd.f32 %v5117_v14, %v7840_v0 }
 0x4db   : > { %4799 = vst [vmem:[%s7701_s28 + $0x48] sm:$0xff] %v4767_v56  ;;  %v4585_v51 = vpop.f32.mrf.mxu0 }
 0x4dc   : > { %v4766_v61 = vsel %vm4702_vm1, %v4576_v24, %v4734_v9  ;;  %vm4705_vm11 = vcmp.ge.f32.partialorder %v4591_v29, 0.0  ;;  %v4737_v50 = vmul.f32 0.2, %v4591_v29  ;;  %v4586_v15 = vadd.f32 %v4585_v51, %v7841_v63 }
 0x4dd   : > { %4798 = vst [vmem:[%s7701_s28 + $0x40] sm:$0xff] %v4766_v61 }
 0x4de   : > { %v4769_v26 = vsel %vm4705_vm11, %v4591_v29, %v4737_v50  ;;  %vm4704_vm12 = vcmp.ge.f32.partialorder %v4586_v15, 0.0  ;;  %v4736_v31 = vmul.f32 0.2, %v4586_v15 }
 0x4df   : > { %4801 = vst [vmem:[%s7701_s28 + $0x58] sm:$0xff] %v4769_v26 }
 0x4e0   : > { %v4768_v17 = vsel %vm4704_vm12, %v4586_v15, %v4736_v31 }
 0x4e1   : > { %4800 = vst [vmem:[%s7701_s28 + $0x50] sm:$0xff] %v4768_v17 }
 0x4e2 PF: > { %s15_s18 = sadd.s32 1, %s5209_s18  }
 0x4e3   : > { %p12_p4 = scmp.ge.s32.totalorder %s15_s18, 4  }
 0x4e5   :  { %14 = sbr.rel (!%p12_p4) target bundleno = 1 (0x1), region = 76 }

</bundles_post_ra>
